<compile_context>
chip_gen: v7x
topology: tpu7x:2x2x1
jax: 0.10.0
libtpu: 0.0.40
codegen_flags: <defaults>
</compile_context>

<pallas_src>
import functools

import jax
import jax.numpy as jnp
from jax.experimental import pallas as pl
from jax.experimental.pallas import tpu as pltpu

KSIZE = 3        # 3x3 convolution
NUM_LAYERS = 4   # conv1..conv4


def fused_conv_stack_kernel(x_ref, w_ref, b_ref, m_ref, o_ref, *, W):
    """Fused stack of NUM_LAYERS (3x3, pad=1) convs for one batch element, lane-dense.

    x_ref : (1, Cin,  H*W)                 f32 VMEM -- input activation, spatial flattened on lanes
    w_ref : (Cout, NUM_LAYERS*Cin*9)       f32 VMEM -- weight columns, col = (l*Cin+i)*9 + kh*3+kw
    b_ref : (Cout, NUM_LAYERS)             f32 VMEM -- bias columns
    m_ref : (9, H*W)                       f32 VMEM -- 0/1 boundary masks per tap (kh*3+kw)
    o_ref : (1, Cout, H*W)                 f32 VMEM -- output activation
    """
    _, Cin, HW = x_ref.shape
    Cout = o_ref.shape[1]

    Wt = w_ref[...]        # (Cout, NUM_LAYERS*Cin*9)  -- one vreg row of weight columns
    Bt = b_ref[...]        # (Cout, NUM_LAYERS)
    Mt = m_ref[...]        # (9, HW)

    # Static tap descriptors, hoisted above the layer loop.
    # We want shifted[p] = act[p + delta]  =>  roll shift = (-delta) mod HW.
    taps = []
    for kh in range(KSIZE):
        for kw in range(KSIZE):
            delta = (kh - 1) * W + (kw - 1)
            taps.append((kh * KSIZE + kw, (-delta) % HW, delta != 0))

    act = x_ref[0, :, :]   # (Cin, HW)
    for layer in range(NUM_LAYERS):
        # Stacked accumulator over output channels, initialized from the bias column.
        acc = jnp.zeros((Cout, HW), jnp.float32) + Bt[:, layer:layer + 1]
        for (k, shift, needs_mask) in taps:
            if needs_mask:
                # Lane rotation on the otherwise-idle XLU, then zero the wrapped/OOB lanes.
                shifted = pltpu.roll(act, shift=shift, axis=1) * Mt[k:k + 1, :]
            else:
                shifted = act                                   # center tap: identity, no mask
            for i in range(Cin):
                colix = (layer * Cin + i) * (KSIZE * KSIZE) + k
                # (Cout,1) weight column * (1,HW) shifted plane -> (Cout,HW) broadcast FMA.
                acc = acc + Wt[:, colix:colix + 1] * shifted[i:i + 1, :]
        act = acc

    o_ref[0, :, :] = act   # whole lane-dense rows: unmasked stores


def my_model_forward(x, params):
    """x: (N, 3, H, W) f32; params: list of 4 (weight (3,3,3,3) OIHW, bias (3,)) tuples."""
    N, C, H, W = x.shape
    HW = H * W
    Cout, Cin = params[0][0].shape[:2]
    assert Cin == C and Cout == C and len(params) == NUM_LAYERS

    # Weight table (Cout, NUM_LAYERS*Cin*9): column index = (l*Cin + i)*9 + kh*3 + kw.
    w_cols = jnp.concatenate(
        [w.astype(jnp.float32).reshape(Cout, Cin * KSIZE * KSIZE) for (w, _) in params],
        axis=1)
    # Bias table (Cout, NUM_LAYERS).
    b_cols = jnp.stack([b.astype(jnp.float32) for (_, b) in params], axis=1)

    # 0/1 boundary masks per tap over the flattened spatial axis (trace-time constants).
    pos = jnp.arange(HW, dtype=jnp.int32)
    row, col = pos // W, pos % W
    mask_rows = []
    for kh in range(KSIZE):
        for kw in range(KSIZE):
            dh, dw = kh - 1, kw - 1
            valid = ((row + dh >= 0) & (row + dh < H) &
                     (col + dw >= 0) & (col + dw < W))
            mask_rows.append(valid.astype(jnp.float32))
    mask_tbl = jnp.stack(mask_rows, axis=0)                      # (9, HW)

    x_flat = x.astype(jnp.float32).reshape(N, C, HW)             # lane-dense: 256 live lanes

    flops = NUM_LAYERS * 2 * N * Cout * Cin * KSIZE * KSIZE * HW
    bytes_accessed = 4 * (x_flat.size + N * Cout * HW + w_cols.size +
                          b_cols.size + mask_tbl.size)

    grid_spec = pltpu.PrefetchScalarGridSpec(
        num_scalar_prefetch=0,
        grid=(N,),                            # one batch element per step (2-core split on v7x)
        in_specs=[
            pl.BlockSpec((1, C, HW), lambda n: (n, 0, 0)),
            pl.BlockSpec((Cout, NUM_LAYERS * Cin * KSIZE * KSIZE), lambda n: (0, 0)),
            pl.BlockSpec((Cout, NUM_LAYERS), lambda n: (0, 0)),
            pl.BlockSpec((KSIZE * KSIZE, HW), lambda n: (0, 0)),
        ],
        out_specs=pl.BlockSpec((1, Cout, HW), lambda n: (n, 0, 0)),
    )

    out_flat = pl.pallas_call(
        functools.partial(fused_conv_stack_kernel, W=W),
        out_shape=jax.ShapeDtypeStruct((N, Cout, HW), jnp.float32),
        grid_spec=grid_spec,
        compiler_params=pltpu.CompilerParams(dimension_semantics=("parallel",)),
        cost_estimate=pl.CostEstimate(flops=flops, transcendentals=0,
                                      bytes_accessed=bytes_accessed),
    )(x_flat, w_cols, b_cols, mask_tbl)

    return out_flat.reshape(N, Cout, H, W)


def init_params(key):
    """Deterministic synthetic parameters for the 4 conv layers (Cout=Cin=3, k=3)."""
    params = []
    for _ in range(NUM_LAYERS):
        kw_key, kb_key, key = jax.random.split(key, 3)
        w = 0.1 * jax.random.normal(kw_key, (3, 3, KSIZE, KSIZE), dtype=jnp.float32)
        b = 0.1 * jax.random.normal(kb_key, (3,), dtype=jnp.float32)
        params.append((w, b))
    return params


def _reference_forward(x, params):
    """Pure-JAX reference (lax conv) for correctness checking."""
    for (w, b) in params:
        x = jax.lax.conv_general_dilated(
            x, w, window_strides=(1, 1), padding="SAME",
            dimension_numbers=("NCHW", "OIHW", "NCHW"))
        x = x + b[None, :, None, None]
    return x


if __name__ == "__main__":
    key = jax.random.PRNGKey(0)
    x_key, p_key = jax.random.split(key)
    # Input consistent with Conv2d(3, ...): NCHW = (2, 3, 16, 16)
    x = jax.random.normal(x_key, (2, 3, 16, 16), dtype=jnp.float32)
    params = init_params(p_key)

    fwd = jax.jit(my_model_forward)
    out = jax.block_until_ready(fwd(x, params))

    ref = jax.block_until_ready(_reference_forward(x, params))
    assert out.shape == (2, 3, 16, 16)
    assert jnp.allclose(out, ref, atol=1e-4, rtol=1e-4), float(jnp.max(jnp.abs(out - ref)))

    print("KERNEL_OK")
</pallas_src>

<mosaic_0001>
module attributes {stable_mosaic.version = 11 : i64} {
  func.func @fused_conv_stack_kernel(%arg0: i32, %arg1: memref<1x3x256xf32, #tpu.memory_space<vmem>>, %arg2: memref<3x108xf32, #tpu.memory_space<vmem>>, %arg3: memref<3x4xf32, #tpu.memory_space<vmem>>, %arg4: memref<9x256xf32, #tpu.memory_space<vmem>>, %arg5: memref<1x3x256xf32, #tpu.memory_space<vmem>>) attributes {dimension_semantics = [#tpu.dimension_semantics<parallel>], iteration_bounds = array<i64: 2>, scalar_prefetch = 0 : i64, scratch_operands = 0 : i64, tpu.core_type = #tpu.core_type<tc>, window_params = [{transform_indices = @transform_0, window_bounds = array<i64: 1, 3, 256>}, {pipeline_mode = #tpu.pipeline_mode<synchronous>, transform_indices = @transform_1, window_bounds = array<i64: 3, 108>}, {pipeline_mode = #tpu.pipeline_mode<synchronous>, transform_indices = @transform_2, window_bounds = array<i64: 3, 4>}, {pipeline_mode = #tpu.pipeline_mode<synchronous>, transform_indices = @transform_3, window_bounds = array<i64: 9, 256>}, {transform_indices = @transform_4, window_bounds = array<i64: 1, 3, 256>}]} {
    %c0 = arith.constant 0 : index
    %c0_0 = arith.constant 0 : index
    %0 = vector.load %arg2[%c0, %c0_0] : memref<3x108xf32, #tpu.memory_space<vmem>>, vector<3x108xf32>
    %c0_1 = arith.constant 0 : index
    %c0_2 = arith.constant 0 : index
    %1 = vector.load %arg3[%c0_1, %c0_2] : memref<3x4xf32, #tpu.memory_space<vmem>>, vector<3x4xf32>
    %c0_3 = arith.constant 0 : index
    %c0_4 = arith.constant 0 : index
    %2 = vector.load %arg4[%c0_3, %c0_4] : memref<9x256xf32, #tpu.memory_space<vmem>>, vector<9x256xf32>
    %c0_5 = arith.constant 0 : index
    %c0_6 = arith.constant 0 : index
    %c0_7 = arith.constant 0 : index
    %3 = vector.load %arg1[%c0_5, %c0_6, %c0_7] : memref<1x3x256xf32, #tpu.memory_space<vmem>>, vector<1x3x256xf32>
    %4 = vector.shape_cast %3 : vector<1x3x256xf32> to vector<3x256xf32>
    %cst = arith.constant 0.000000e+00 : f32
    %5 = vector.broadcast %cst : f32 to vector<3x256xf32>
    %6 = vector.extract_strided_slice %1 {offsets = [0, 0], sizes = [3, 1], strides = [1, 1]} : vector<3x4xf32> to vector<3x1xf32>
    %7 = vector.broadcast %6 : vector<3x1xf32> to vector<3x256xf32>
    %8 = arith.addf %5, %7 : vector<3x256xf32>
    %c17_i32 = arith.constant 17 : i32
    %9 = tpu.dynamic_rotate %4 by %c17_i32 dim 1 : vector<3x256xf32>, i32 -> vector<3x256xf32>
    %10 = vector.extract_strided_slice %2 {offsets = [0, 0], sizes = [1, 256], strides = [1, 1]} : vector<9x256xf32> to vector<1x256xf32>
    %11 = vector.broadcast %10 : vector<1x256xf32> to vector<3x256xf32>
    %12 = arith.mulf %9, %11 : vector<3x256xf32>
    %13 = vector.extract_strided_slice %0 {offsets = [0, 0], sizes = [3, 1], strides = [1, 1]} : vector<3x108xf32> to vector<3x1xf32>
    %14 = vector.extract_strided_slice %12 {offsets = [0, 0], sizes = [1, 256], strides = [1, 1]} : vector<3x256xf32> to vector<1x256xf32>
    %15 = vector.broadcast %13 : vector<3x1xf32> to vector<3x256xf32>
    %16 = vector.broadcast %14 : vector<1x256xf32> to vector<3x256xf32>
    %17 = arith.mulf %15, %16 : vector<3x256xf32>
    %18 = arith.addf %8, %17 : vector<3x256xf32>
    %19 = vector.extract_strided_slice %0 {offsets = [0, 9], sizes = [3, 1], strides = [1, 1]} : vector<3x108xf32> to vector<3x1xf32>
    %20 = vector.extract_strided_slice %12 {offsets = [1, 0], sizes = [1, 256], strides = [1, 1]} : vector<3x256xf32> to vector<1x256xf32>
    %21 = vector.broadcast %19 : vector<3x1xf32> to vector<3x256xf32>
    %22 = vector.broadcast %20 : vector<1x256xf32> to vector<3x256xf32>
    %23 = arith.mulf %21, %22 : vector<3x256xf32>
    %24 = arith.addf %18, %23 : vector<3x256xf32>
    %25 = vector.extract_strided_slice %0 {offsets = [0, 18], sizes = [3, 1], strides = [1, 1]} : vector<3x108xf32> to vector<3x1xf32>
    %26 = vector.extract_strided_slice %12 {offsets = [2, 0], sizes = [1, 256], strides = [1, 1]} : vector<3x256xf32> to vector<1x256xf32>
    %27 = vector.broadcast %25 : vector<3x1xf32> to vector<3x256xf32>
    %28 = vector.broadcast %26 : vector<1x256xf32> to vector<3x256xf32>
    %29 = arith.mulf %27, %28 : vector<3x256xf32>
    %30 = arith.addf %24, %29 : vector<3x256xf32>
    %c16_i32 = arith.constant 16 : i32
    %31 = tpu.dynamic_rotate %4 by %c16_i32 dim 1 : vector<3x256xf32>, i32 -> vector<3x256xf32>
    %32 = vector.extract_strided_slice %2 {offsets = [1, 0], sizes = [1, 256], strides = [1, 1]} : vector<9x256xf32> to vector<1x256xf32>
    %33 = vector.broadcast %32 : vector<1x256xf32> to vector<3x256xf32>
    %34 = arith.mulf %31, %33 : vector<3x256xf32>
    %35 = vector.extract_strided_slice %0 {offsets = [0, 1], sizes = [3, 1], strides = [1, 1]} : vector<3x108xf32> to vector<3x1xf32>
    %36 = vector.extract_strided_slice %34 {offsets = [0, 0], sizes = [1, 256], strides = [1, 1]} : vector<3x256xf32> to vector<1x256xf32>
    %37 = vector.broadcast %35 : vector<3x1xf32> to vector<3x256xf32>
    %38 = vector.broadcast %36 : vector<1x256xf32> to vector<3x256xf32>
    %39 = arith.mulf %37, %38 : vector<3x256xf32>
    %40 = arith.addf %30, %39 : vector<3x256xf32>
    %41 = vector.extract_strided_slice %0 {offsets = [0, 10], sizes = [3, 1], strides = [1, 1]} : vector<3x108xf32> to vector<3x1xf32>
    %42 = vector.extract_strided_slice %34 {offsets = [1, 0], sizes = [1, 256], strides = [1, 1]} : vector<3x256xf32> to vector<1x256xf32>
    %43 = vector.broadcast %41 : vector<3x1xf32> to vector<3x256xf32>
    %44 = vector.broadcast %42 : vector<1x256xf32> to vector<3x256xf32>
    %45 = arith.mulf %43, %44 : vector<3x256xf32>
    %46 = arith.addf %40, %45 : vector<3x256xf32>
    %47 = vector.extract_strided_slice %0 {offsets = [0, 19], sizes = [3, 1], strides = [1, 1]} : vector<3x108xf32> to vector<3x1xf32>
    %48 = vector.extract_strided_slice %34 {offsets = [2, 0], sizes = [1, 256], strides = [1, 1]} : vector<3x256xf32> to vector<1x256xf32>
    %49 = vector.broadcast %47 : vector<3x1xf32> to vector<3x256xf32>
    %50 = vector.broadcast %48 : vector<1x256xf32> to vector<3x256xf32>
    %51 = arith.mulf %49, %50 : vector<3x256xf32>
    %52 = arith.addf %46, %51 : vector<3x256xf32>
    %c15_i32 = arith.constant 15 : i32
    %53 = tpu.dynamic_rotate %4 by %c15_i32 dim 1 : vector<3x256xf32>, i32 -> vector<3x256xf32>
    %54 = vector.extract_strided_slice %2 {offsets = [2, 0], sizes = [1, 256], strides = [1, 1]} : vector<9x256xf32> to vector<1x256xf32>
    %55 = vector.broadcast %54 : vector<1x256xf32> to vector<3x256xf32>
    %56 = arith.mulf %53, %55 : vector<3x256xf32>
    %57 = vector.extract_strided_slice %0 {offsets = [0, 2], sizes = [3, 1], strides = [1, 1]} : vector<3x108xf32> to vector<3x1xf32>
    %58 = vector.extract_strided_slice %56 {offsets = [0, 0], sizes = [1, 256], strides = [1, 1]} : vector<3x256xf32> to vector<1x256xf32>
    %59 = vector.broadcast %57 : vector<3x1xf32> to vector<3x256xf32>
    %60 = vector.broadcast %58 : vector<1x256xf32> to vector<3x256xf32>
    %61 = arith.mulf %59, %60 : vector<3x256xf32>
    %62 = arith.addf %52, %61 : vector<3x256xf32>
    %63 = vector.extract_strided_slice %0 {offsets = [0, 11], sizes = [3, 1], strides = [1, 1]} : vector<3x108xf32> to vector<3x1xf32>
    %64 = vector.extract_strided_slice %56 {offsets = [1, 0], sizes = [1, 256], strides = [1, 1]} : vector<3x256xf32> to vector<1x256xf32>
    %65 = vector.broadcast %63 : vector<3x1xf32> to vector<3x256xf32>
    %66 = vector.broadcast %64 : vector<1x256xf32> to vector<3x256xf32>
    %67 = arith.mulf %65, %66 : vector<3x256xf32>
    %68 = arith.addf %62, %67 : vector<3x256xf32>
    %69 = vector.extract_strided_slice %0 {offsets = [0, 20], sizes = [3, 1], strides = [1, 1]} : vector<3x108xf32> to vector<3x1xf32>
    %70 = vector.extract_strided_slice %56 {offsets = [2, 0], sizes = [1, 256], strides = [1, 1]} : vector<3x256xf32> to vector<1x256xf32>
    %71 = vector.broadcast %69 : vector<3x1xf32> to vector<3x256xf32>
    %72 = vector.broadcast %70 : vector<1x256xf32> to vector<3x256xf32>
    %73 = arith.mulf %71, %72 : vector<3x256xf32>
    %74 = arith.addf %68, %73 : vector<3x256xf32>
    %c1_i32 = arith.constant 1 : i32
    %75 = tpu.dynamic_rotate %4 by %c1_i32 dim 1 : vector<3x256xf32>, i32 -> vector<3x256xf32>
    %76 = vector.extract_strided_slice %2 {offsets = [3, 0], sizes = [1, 256], strides = [1, 1]} : vector<9x256xf32> to vector<1x256xf32>
    %77 = vector.broadcast %76 : vector<1x256xf32> to vector<3x256xf32>
    %78 = arith.mulf %75, %77 : vector<3x256xf32>
    %79 = vector.extract_strided_slice %0 {offsets = [0, 3], sizes = [3, 1], strides = [1, 1]} : vector<3x108xf32> to vector<3x1xf32>
    %80 = vector.extract_strided_slice %78 {offsets = [0, 0], sizes = [1, 256], strides = [1, 1]} : vector<3x256xf32> to vector<1x256xf32>
    %81 = vector.broadcast %79 : vector<3x1xf32> to vector<3x256xf32>
    %82 = vector.broadcast %80 : vector<1x256xf32> to vector<3x256xf32>
    %83 = arith.mulf %81, %82 : vector<3x256xf32>
    %84 = arith.addf %74, %83 : vector<3x256xf32>
    %85 = vector.extract_strided_slice %0 {offsets = [0, 12], sizes = [3, 1], strides = [1, 1]} : vector<3x108xf32> to vector<3x1xf32>
    %86 = vector.extract_strided_slice %78 {offsets = [1, 0], sizes = [1, 256], strides = [1, 1]} : vector<3x256xf32> to vector<1x256xf32>
    %87 = vector.broadcast %85 : vector<3x1xf32> to vector<3x256xf32>
    %88 = vector.broadcast %86 : vector<1x256xf32> to vector<3x256xf32>
    %89 = arith.mulf %87, %88 : vector<3x256xf32>
    %90 = arith.addf %84, %89 : vector<3x256xf32>
    %91 = vector.extract_strided_slice %0 {offsets = [0, 21], sizes = [3, 1], strides = [1, 1]} : vector<3x108xf32> to vector<3x1xf32>
    %92 = vector.extract_strided_slice %78 {offsets = [2, 0], sizes = [1, 256], strides = [1, 1]} : vector<3x256xf32> to vector<1x256xf32>
    %93 = vector.broadcast %91 : vector<3x1xf32> to vector<3x256xf32>
    %94 = vector.broadcast %92 : vector<1x256xf32> to vector<3x256xf32>
    %95 = arith.mulf %93, %94 : vector<3x256xf32>
    %96 = arith.addf %90, %95 : vector<3x256xf32>
    %97 = vector.extract_strided_slice %0 {offsets = [0, 4], sizes = [3, 1], strides = [1, 1]} : vector<3x108xf32> to vector<3x1xf32>
    %98 = vector.extract_strided_slice %4 {offsets = [0, 0], sizes = [1, 256], strides = [1, 1]} : vector<3x256xf32> to vector<1x256xf32>
    %99 = vector.broadcast %97 : vector<3x1xf32> to vector<3x256xf32>
    %100 = vector.broadcast %98 : vector<1x256xf32> to vector<3x256xf32>
    %101 = arith.mulf %99, %100 : vector<3x256xf32>
    %102 = arith.addf %96, %101 : vector<3x256xf32>
    %103 = vector.extract_strided_slice %0 {offsets = [0, 13], sizes = [3, 1], strides = [1, 1]} : vector<3x108xf32> to vector<3x1xf32>
    %104 = vector.extract_strided_slice %4 {offsets = [1, 0], sizes = [1, 256], strides = [1, 1]} : vector<3x256xf32> to vector<1x256xf32>
    %105 = vector.broadcast %103 : vector<3x1xf32> to vector<3x256xf32>
    %106 = vector.broadcast %104 : vector<1x256xf32> to vector<3x256xf32>
    %107 = arith.mulf %105, %106 : vector<3x256xf32>
    %108 = arith.addf %102, %107 : vector<3x256xf32>
    %109 = vector.extract_strided_slice %0 {offsets = [0, 22], sizes = [3, 1], strides = [1, 1]} : vector<3x108xf32> to vector<3x1xf32>
    %110 = vector.extract_strided_slice %4 {offsets = [2, 0], sizes = [1, 256], strides = [1, 1]} : vector<3x256xf32> to vector<1x256xf32>
    %111 = vector.broadcast %109 : vector<3x1xf32> to vector<3x256xf32>
    %112 = vector.broadcast %110 : vector<1x256xf32> to vector<3x256xf32>
    %113 = arith.mulf %111, %112 : vector<3x256xf32>
    %114 = arith.addf %108, %113 : vector<3x256xf32>
    %c255_i32 = arith.constant 255 : i32
    %115 = tpu.dynamic_rotate %4 by %c255_i32 dim 1 : vector<3x256xf32>, i32 -> vector<3x256xf32>
    %116 = vector.extract_strided_slice %2 {offsets = [5, 0], sizes = [1, 256], strides = [1, 1]} : vector<9x256xf32> to vector<1x256xf32>
    %117 = vector.broadcast %116 : vector<1x256xf32> to vector<3x256xf32>
    %118 = arith.mulf %115, %117 : vector<3x256xf32>
    %119 = vector.extract_strided_slice %0 {offsets = [0, 5], sizes = [3, 1], strides = [1, 1]} : vector<3x108xf32> to vector<3x1xf32>
    %120 = vector.extract_strided_slice %118 {offsets = [0, 0], sizes = [1, 256], strides = [1, 1]} : vector<3x256xf32> to vector<1x256xf32>
    %121 = vector.broadcast %119 : vector<3x1xf32> to vector<3x256xf32>
    %122 = vector.broadcast %120 : vector<1x256xf32> to vector<3x256xf32>
    %123 = arith.mulf %121, %122 : vector<3x256xf32>
    %124 = arith.addf %114, %123 : vector<3x256xf32>
    %125 = vector.extract_strided_slice %0 {offsets = [0, 14], sizes = [3, 1], strides = [1, 1]} : vector<3x108xf32> to vector<3x1xf32>
    %126 = vector.extract_strided_slice %118 {offsets = [1, 0], sizes = [1, 256], strides = [1, 1]} : vector<3x256xf32> to vector<1x256xf32>
    %127 = vector.broadcast %125 : vector<3x1xf32> to vector<3x256xf32>
    %128 = vector.broadcast %126 : vector<1x256xf32> to vector<3x256xf32>
    %129 = arith.mulf %127, %128 : vector<3x256xf32>
    %130 = arith.addf %124, %129 : vector<3x256xf32>
    %131 = vector.extract_strided_slice %0 {offsets = [0, 23], sizes = [3, 1], strides = [1, 1]} : vector<3x108xf32> to vector<3x1xf32>
    %132 = vector.extract_strided_slice %118 {offsets = [2, 0], sizes = [1, 256], strides = [1, 1]} : vector<3x256xf32> to vector<1x256xf32>
    %133 = vector.broadcast %131 : vector<3x1xf32> to vector<3x256xf32>
    %134 = vector.broadcast %132 : vector<1x256xf32> to vector<3x256xf32>
    %135 = arith.mulf %133, %134 : vector<3x256xf32>
    %136 = arith.addf %130, %135 : vector<3x256xf32>
    %c241_i32 = arith.constant 241 : i32
    %137 = tpu.dynamic_rotate %4 by %c241_i32 dim 1 : vector<3x256xf32>, i32 -> vector<3x256xf32>
    %138 = vector.extract_strided_slice %2 {offsets = [6, 0], sizes = [1, 256], strides = [1, 1]} : vector<9x256xf32> to vector<1x256xf32>
    %139 = vector.broadcast %138 : vector<1x256xf32> to vector<3x256xf32>
    %140 = arith.mulf %137, %139 : vector<3x256xf32>
    %141 = vector.extract_strided_slice %0 {offsets = [0, 6], sizes = [3, 1], strides = [1, 1]} : vector<3x108xf32> to vector<3x1xf32>
    %142 = vector.extract_strided_slice %140 {offsets = [0, 0], sizes = [1, 256], strides = [1, 1]} : vector<3x256xf32> to vector<1x256xf32>
    %143 = vector.broadcast %141 : vector<3x1xf32> to vector<3x256xf32>
    %144 = vector.broadcast %142 : vector<1x256xf32> to vector<3x256xf32>
    %145 = arith.mulf %143, %144 : vector<3x256xf32>
    %146 = arith.addf %136, %145 : vector<3x256xf32>
    %147 = vector.extract_strided_slice %0 {offsets = [0, 15], sizes = [3, 1], strides = [1, 1]} : vector<3x108xf32> to vector<3x1xf32>
    %148 = vector.extract_strided_slice %140 {offsets = [1, 0], sizes = [1, 256], strides = [1, 1]} : vector<3x256xf32> to vector<1x256xf32>
    %149 = vector.broadcast %147 : vector<3x1xf32> to vector<3x256xf32>
    %150 = vector.broadcast %148 : vector<1x256xf32> to vector<3x256xf32>
    %151 = arith.mulf %149, %150 : vector<3x256xf32>
    %152 = arith.addf %146, %151 : vector<3x256xf32>
    %153 = vector.extract_strided_slice %0 {offsets = [0, 24], sizes = [3, 1], strides = [1, 1]} : vector<3x108xf32> to vector<3x1xf32>
    %154 = vector.extract_strided_slice %140 {offsets = [2, 0], sizes = [1, 256], strides = [1, 1]} : vector<3x256xf32> to vector<1x256xf32>
    %155 = vector.broadcast %153 : vector<3x1xf32> to vector<3x256xf32>
    %156 = vector.broadcast %154 : vector<1x256xf32> to vector<3x256xf32>
    %157 = arith.mulf %155, %156 : vector<3x256xf32>
    %158 = arith.addf %152, %157 : vector<3x256xf32>
    %c240_i32 = arith.constant 240 : i32
    %159 = tpu.dynamic_rotate %4 by %c240_i32 dim 1 : vector<3x256xf32>, i32 -> vector<3x256xf32>
    %160 = vector.extract_strided_slice %2 {offsets = [7, 0], sizes = [1, 256], strides = [1, 1]} : vector<9x256xf32> to vector<1x256xf32>
    %161 = vector.broadcast %160 : vector<1x256xf32> to vector<3x256xf32>
    %162 = arith.mulf %159, %161 : vector<3x256xf32>
    %163 = vector.extract_strided_slice %0 {offsets = [0, 7], sizes = [3, 1], strides = [1, 1]} : vector<3x108xf32> to vector<3x1xf32>
    %164 = vector.extract_strided_slice %162 {offsets = [0, 0], sizes = [1, 256], strides = [1, 1]} : vector<3x256xf32> to vector<1x256xf32>
    %165 = vector.broadcast %163 : vector<3x1xf32> to vector<3x256xf32>
    %166 = vector.broadcast %164 : vector<1x256xf32> to vector<3x256xf32>
    %167 = arith.mulf %165, %166 : vector<3x256xf32>
    %168 = arith.addf %158, %167 : vector<3x256xf32>
    %169 = vector.extract_strided_slice %0 {offsets = [0, 16], sizes = [3, 1], strides = [1, 1]} : vector<3x108xf32> to vector<3x1xf32>
    %170 = vector.extract_strided_slice %162 {offsets = [1, 0], sizes = [1, 256], strides = [1, 1]} : vector<3x256xf32> to vector<1x256xf32>
    %171 = vector.broadcast %169 : vector<3x1xf32> to vector<3x256xf32>
    %172 = vector.broadcast %170 : vector<1x256xf32> to vector<3x256xf32>
    %173 = arith.mulf %171, %172 : vector<3x256xf32>
    %174 = arith.addf %168, %173 : vector<3x256xf32>
    %175 = vector.extract_strided_slice %0 {offsets = [0, 25], sizes = [3, 1], strides = [1, 1]} : vector<3x108xf32> to vector<3x1xf32>
    %176 = vector.extract_strided_slice %162 {offsets = [2, 0], sizes = [1, 256], strides = [1, 1]} : vector<3x256xf32> to vector<1x256xf32>
    %177 = vector.broadcast %175 : vector<3x1xf32> to vector<3x256xf32>
    %178 = vector.broadcast %176 : vector<1x256xf32> to vector<3x256xf32>
    %179 = arith.mulf %177, %178 : vector<3x256xf32>
    %180 = arith.addf %174, %179 : vector<3x256xf32>
    %c239_i32 = arith.constant 239 : i32
    %181 = tpu.dynamic_rotate %4 by %c239_i32 dim 1 : vector<3x256xf32>, i32 -> vector<3x256xf32>
    %182 = vector.extract_strided_slice %2 {offsets = [8, 0], sizes = [1, 256], strides = [1, 1]} : vector<9x256xf32> to vector<1x256xf32>
    %183 = vector.broadcast %182 : vector<1x256xf32> to vector<3x256xf32>
    %184 = arith.mulf %181, %183 : vector<3x256xf32>
    %185 = vector.extract_strided_slice %0 {offsets = [0, 8], sizes = [3, 1], strides = [1, 1]} : vector<3x108xf32> to vector<3x1xf32>
    %186 = vector.extract_strided_slice %184 {offsets = [0, 0], sizes = [1, 256], strides = [1, 1]} : vector<3x256xf32> to vector<1x256xf32>
    %187 = vector.broadcast %185 : vector<3x1xf32> to vector<3x256xf32>
    %188 = vector.broadcast %186 : vector<1x256xf32> to vector<3x256xf32>
    %189 = arith.mulf %187, %188 : vector<3x256xf32>
    %190 = arith.addf %180, %189 : vector<3x256xf32>
    %191 = vector.extract_strided_slice %0 {offsets = [0, 17], sizes = [3, 1], strides = [1, 1]} : vector<3x108xf32> to vector<3x1xf32>
    %192 = vector.extract_strided_slice %184 {offsets = [1, 0], sizes = [1, 256], strides = [1, 1]} : vector<3x256xf32> to vector<1x256xf32>
    %193 = vector.broadcast %191 : vector<3x1xf32> to vector<3x256xf32>
    %194 = vector.broadcast %192 : vector<1x256xf32> to vector<3x256xf32>
    %195 = arith.mulf %193, %194 : vector<3x256xf32>
    %196 = arith.addf %190, %195 : vector<3x256xf32>
    %197 = vector.extract_strided_slice %0 {offsets = [0, 26], sizes = [3, 1], strides = [1, 1]} : vector<3x108xf32> to vector<3x1xf32>
    %198 = vector.extract_strided_slice %184 {offsets = [2, 0], sizes = [1, 256], strides = [1, 1]} : vector<3x256xf32> to vector<1x256xf32>
    %199 = vector.broadcast %197 : vector<3x1xf32> to vector<3x256xf32>
    %200 = vector.broadcast %198 : vector<1x256xf32> to vector<3x256xf32>
    %201 = arith.mulf %199, %200 : vector<3x256xf32>
    %202 = arith.addf %196, %201 : vector<3x256xf32>
    %cst_8 = arith.constant 0.000000e+00 : f32
    %203 = vector.broadcast %cst_8 : f32 to vector<3x256xf32>
    %204 = vector.extract_strided_slice %1 {offsets = [0, 1], sizes = [3, 1], strides = [1, 1]} : vector<3x4xf32> to vector<3x1xf32>
    %205 = vector.broadcast %204 : vector<3x1xf32> to vector<3x256xf32>
    %206 = arith.addf %203, %205 : vector<3x256xf32>
    %c17_i32_9 = arith.constant 17 : i32
    %207 = tpu.dynamic_rotate %202 by %c17_i32_9 dim 1 : vector<3x256xf32>, i32 -> vector<3x256xf32>
    %208 = vector.extract_strided_slice %2 {offsets = [0, 0], sizes = [1, 256], strides = [1, 1]} : vector<9x256xf32> to vector<1x256xf32>
    %209 = vector.broadcast %208 : vector<1x256xf32> to vector<3x256xf32>
    %210 = arith.mulf %207, %209 : vector<3x256xf32>
    %211 = vector.extract_strided_slice %0 {offsets = [0, 27], sizes = [3, 1], strides = [1, 1]} : vector<3x108xf32> to vector<3x1xf32>
    %212 = vector.extract_strided_slice %210 {offsets = [0, 0], sizes = [1, 256], strides = [1, 1]} : vector<3x256xf32> to vector<1x256xf32>
    %213 = vector.broadcast %211 : vector<3x1xf32> to vector<3x256xf32>
    %214 = vector.broadcast %212 : vector<1x256xf32> to vector<3x256xf32>
    %215 = arith.mulf %213, %214 : vector<3x256xf32>
    %216 = arith.addf %206, %215 : vector<3x256xf32>
    %217 = vector.extract_strided_slice %0 {offsets = [0, 36], sizes = [3, 1], strides = [1, 1]} : vector<3x108xf32> to vector<3x1xf32>
    %218 = vector.extract_strided_slice %210 {offsets = [1, 0], sizes = [1, 256], strides = [1, 1]} : vector<3x256xf32> to vector<1x256xf32>
    %219 = vector.broadcast %217 : vector<3x1xf32> to vector<3x256xf32>
    %220 = vector.broadcast %218 : vector<1x256xf32> to vector<3x256xf32>
    %221 = arith.mulf %219, %220 : vector<3x256xf32>
    %222 = arith.addf %216, %221 : vector<3x256xf32>
    %223 = vector.extract_strided_slice %0 {offsets = [0, 45], sizes = [3, 1], strides = [1, 1]} : vector<3x108xf32> to vector<3x1xf32>
    %224 = vector.extract_strided_slice %210 {offsets = [2, 0], sizes = [1, 256], strides = [1, 1]} : vector<3x256xf32> to vector<1x256xf32>
    %225 = vector.broadcast %223 : vector<3x1xf32> to vector<3x256xf32>
    %226 = vector.broadcast %224 : vector<1x256xf32> to vector<3x256xf32>
    %227 = arith.mulf %225, %226 : vector<3x256xf32>
    %228 = arith.addf %222, %227 : vector<3x256xf32>
    %c16_i32_10 = arith.constant 16 : i32
    %229 = tpu.dynamic_rotate %202 by %c16_i32_10 dim 1 : vector<3x256xf32>, i32 -> vector<3x256xf32>
    %230 = vector.extract_strided_slice %2 {offsets = [1, 0], sizes = [1, 256], strides = [1, 1]} : vector<9x256xf32> to vector<1x256xf32>
    %231 = vector.broadcast %230 : vector<1x256xf32> to vector<3x256xf32>
    %232 = arith.mulf %229, %231 : vector<3x256xf32>
    %233 = vector.extract_strided_slice %0 {offsets = [0, 28], sizes = [3, 1], strides = [1, 1]} : vector<3x108xf32> to vector<3x1xf32>
    %234 = vector.extract_strided_slice %232 {offsets = [0, 0], sizes = [1, 256], strides = [1, 1]} : vector<3x256xf32> to vector<1x256xf32>
    %235 = vector.broadcast %233 : vector<3x1xf32> to vector<3x256xf32>
    %236 = vector.broadcast %234 : vector<1x256xf32> to vector<3x256xf32>
    %237 = arith.mulf %235, %236 : vector<3x256xf32>
    %238 = arith.addf %228, %237 : vector<3x256xf32>
    %239 = vector.extract_strided_slice %0 {offsets = [0, 37], sizes = [3, 1], strides = [1, 1]} : vector<3x108xf32> to vector<3x1xf32>
    %240 = vector.extract_strided_slice %232 {offsets = [1, 0], sizes = [1, 256], strides = [1, 1]} : vector<3x256xf32> to vector<1x256xf32>
    %241 = vector.broadcast %239 : vector<3x1xf32> to vector<3x256xf32>
    %242 = vector.broadcast %240 : vector<1x256xf32> to vector<3x256xf32>
    %243 = arith.mulf %241, %242 : vector<3x256xf32>
    %244 = arith.addf %238, %243 : vector<3x256xf32>
    %245 = vector.extract_strided_slice %0 {offsets = [0, 46], sizes = [3, 1], strides = [1, 1]} : vector<3x108xf32> to vector<3x1xf32>
    %246 = vector.extract_strided_slice %232 {offsets = [2, 0], sizes = [1, 256], strides = [1, 1]} : vector<3x256xf32> to vector<1x256xf32>
    %247 = vector.broadcast %245 : vector<3x1xf32> to vector<3x256xf32>
    %248 = vector.broadcast %246 : vector<1x256xf32> to vector<3x256xf32>
    %249 = arith.mulf %247, %248 : vector<3x256xf32>
    %250 = arith.addf %244, %249 : vector<3x256xf32>
    %c15_i32_11 = arith.constant 15 : i32
    %251 = tpu.dynamic_rotate %202 by %c15_i32_11 dim 1 : vector<3x256xf32>, i32 -> vector<3x256xf32>
    %252 = vector.extract_strided_slice %2 {offsets = [2, 0], sizes = [1, 256], strides = [1, 1]} : vector<9x256xf32> to vector<1x256xf32>
    %253 = vector.broadcast %252 : vector<1x256xf32> to vector<3x256xf32>
    %254 = arith.mulf %251, %253 : vector<3x256xf32>
    %255 = vector.extract_strided_slice %0 {offsets = [0, 29], sizes = [3, 1], strides = [1, 1]} : vector<3x108xf32> to vector<3x1xf32>
    %256 = vector.extract_strided_slice %254 {offsets = [0, 0], sizes = [1, 256], strides = [1, 1]} : vector<3x256xf32> to vector<1x256xf32>
    %257 = vector.broadcast %255 : vector<3x1xf32> to vector<3x256xf32>
    %258 = vector.broadcast %256 : vector<1x256xf32> to vector<3x256xf32>
    %259 = arith.mulf %257, %258 : vector<3x256xf32>
    %260 = arith.addf %250, %259 : vector<3x256xf32>
    %261 = vector.extract_strided_slice %0 {offsets = [0, 38], sizes = [3, 1], strides = [1, 1]} : vector<3x108xf32> to vector<3x1xf32>
    %262 = vector.extract_strided_slice %254 {offsets = [1, 0], sizes = [1, 256], strides = [1, 1]} : vector<3x256xf32> to vector<1x256xf32>
    %263 = vector.broadcast %261 : vector<3x1xf32> to vector<3x256xf32>
    %264 = vector.broadcast %262 : vector<1x256xf32> to vector<3x256xf32>
    %265 = arith.mulf %263, %264 : vector<3x256xf32>
    %266 = arith.addf %260, %265 : vector<3x256xf32>
    %267 = vector.extract_strided_slice %0 {offsets = [0, 47], sizes = [3, 1], strides = [1, 1]} : vector<3x108xf32> to vector<3x1xf32>
    %268 = vector.extract_strided_slice %254 {offsets = [2, 0], sizes = [1, 256], strides = [1, 1]} : vector<3x256xf32> to vector<1x256xf32>
    %269 = vector.broadcast %267 : vector<3x1xf32> to vector<3x256xf32>
    %270 = vector.broadcast %268 : vector<1x256xf32> to vector<3x256xf32>
    %271 = arith.mulf %269, %270 : vector<3x256xf32>
    %272 = arith.addf %266, %271 : vector<3x256xf32>
    %c1_i32_12 = arith.constant 1 : i32
    %273 = tpu.dynamic_rotate %202 by %c1_i32_12 dim 1 : vector<3x256xf32>, i32 -> vector<3x256xf32>
    %274 = vector.extract_strided_slice %2 {offsets = [3, 0], sizes = [1, 256], strides = [1, 1]} : vector<9x256xf32> to vector<1x256xf32>
    %275 = vector.broadcast %274 : vector<1x256xf32> to vector<3x256xf32>
    %276 = arith.mulf %273, %275 : vector<3x256xf32>
    %277 = vector.extract_strided_slice %0 {offsets = [0, 30], sizes = [3, 1], strides = [1, 1]} : vector<3x108xf32> to vector<3x1xf32>
    %278 = vector.extract_strided_slice %276 {offsets = [0, 0], sizes = [1, 256], strides = [1, 1]} : vector<3x256xf32> to vector<1x256xf32>
    %279 = vector.broadcast %277 : vector<3x1xf32> to vector<3x256xf32>
    %280 = vector.broadcast %278 : vector<1x256xf32> to vector<3x256xf32>
    %281 = arith.mulf %279, %280 : vector<3x256xf32>
    %282 = arith.addf %272, %281 : vector<3x256xf32>
    %283 = vector.extract_strided_slice %0 {offsets = [0, 39], sizes = [3, 1], strides = [1, 1]} : vector<3x108xf32> to vector<3x1xf32>
    %284 = vector.extract_strided_slice %276 {offsets = [1, 0], sizes = [1, 256], strides = [1, 1]} : vector<3x256xf32> to vector<1x256xf32>
    %285 = vector.broadcast %283 : vector<3x1xf32> to vector<3x256xf32>
    %286 = vector.broadcast %284 : vector<1x256xf32> to vector<3x256xf32>
    %287 = arith.mulf %285, %286 : vector<3x256xf32>
    %288 = arith.addf %282, %287 : vector<3x256xf32>
    %289 = vector.extract_strided_slice %0 {offsets = [0, 48], sizes = [3, 1], strides = [1, 1]} : vector<3x108xf32> to vector<3x1xf32>
    %290 = vector.extract_strided_slice %276 {offsets = [2, 0], sizes = [1, 256], strides = [1, 1]} : vector<3x256xf32> to vector<1x256xf32>
    %291 = vector.broadcast %289 : vector<3x1xf32> to vector<3x256xf32>
    %292 = vector.broadcast %290 : vector<1x256xf32> to vector<3x256xf32>
    %293 = arith.mulf %291, %292 : vector<3x256xf32>
    %294 = arith.addf %288, %293 : vector<3x256xf32>
    %295 = vector.extract_strided_slice %0 {offsets = [0, 31], sizes = [3, 1], strides = [1, 1]} : vector<3x108xf32> to vector<3x1xf32>
    %296 = vector.extract_strided_slice %202 {offsets = [0, 0], sizes = [1, 256], strides = [1, 1]} : vector<3x256xf32> to vector<1x256xf32>
    %297 = vector.broadcast %295 : vector<3x1xf32> to vector<3x256xf32>
    %298 = vector.broadcast %296 : vector<1x256xf32> to vector<3x256xf32>
    %299 = arith.mulf %297, %298 : vector<3x256xf32>
    %300 = arith.addf %294, %299 : vector<3x256xf32>
    %301 = vector.extract_strided_slice %0 {offsets = [0, 40], sizes = [3, 1], strides = [1, 1]} : vector<3x108xf32> to vector<3x1xf32>
    %302 = vector.extract_strided_slice %202 {offsets = [1, 0], sizes = [1, 256], strides = [1, 1]} : vector<3x256xf32> to vector<1x256xf32>
    %303 = vector.broadcast %301 : vector<3x1xf32> to vector<3x256xf32>
    %304 = vector.broadcast %302 : vector<1x256xf32> to vector<3x256xf32>
    %305 = arith.mulf %303, %304 : vector<3x256xf32>
    %306 = arith.addf %300, %305 : vector<3x256xf32>
    %307 = vector.extract_strided_slice %0 {offsets = [0, 49], sizes = [3, 1], strides = [1, 1]} : vector<3x108xf32> to vector<3x1xf32>
    %308 = vector.extract_strided_slice %202 {offsets = [2, 0], sizes = [1, 256], strides = [1, 1]} : vector<3x256xf32> to vector<1x256xf32>
    %309 = vector.broadcast %307 : vector<3x1xf32> to vector<3x256xf32>
    %310 = vector.broadcast %308 : vector<1x256xf32> to vector<3x256xf32>
    %311 = arith.mulf %309, %310 : vector<3x256xf32>
    %312 = arith.addf %306, %311 : vector<3x256xf32>
    %c255_i32_13 = arith.constant 255 : i32
    %313 = tpu.dynamic_rotate %202 by %c255_i32_13 dim 1 : vector<3x256xf32>, i32 -> vector<3x256xf32>
    %314 = vector.extract_strided_slice %2 {offsets = [5, 0], sizes = [1, 256], strides = [1, 1]} : vector<9x256xf32> to vector<1x256xf32>
    %315 = vector.broadcast %314 : vector<1x256xf32> to vector<3x256xf32>
    %316 = arith.mulf %313, %315 : vector<3x256xf32>
    %317 = vector.extract_strided_slice %0 {offsets = [0, 32], sizes = [3, 1], strides = [1, 1]} : vector<3x108xf32> to vector<3x1xf32>
    %318 = vector.extract_strided_slice %316 {offsets = [0, 0], sizes = [1, 256], strides = [1, 1]} : vector<3x256xf32> to vector<1x256xf32>
    %319 = vector.broadcast %317 : vector<3x1xf32> to vector<3x256xf32>
    %320 = vector.broadcast %318 : vector<1x256xf32> to vector<3x256xf32>
    %321 = arith.mulf %319, %320 : vector<3x256xf32>
    %322 = arith.addf %312, %321 : vector<3x256xf32>
    %323 = vector.extract_strided_slice %0 {offsets = [0, 41], sizes = [3, 1], strides = [1, 1]} : vector<3x108xf32> to vector<3x1xf32>
    %324 = vector.extract_strided_slice %316 {offsets = [1, 0], sizes = [1, 256], strides = [1, 1]} : vector<3x256xf32> to vector<1x256xf32>
    %325 = vector.broadcast %323 : vector<3x1xf32> to vector<3x256xf32>
    %326 = vector.broadcast %324 : vector<1x256xf32> to vector<3x256xf32>
    %327 = arith.mulf %325, %326 : vector<3x256xf32>
    %328 = arith.addf %322, %327 : vector<3x256xf32>
    %329 = vector.extract_strided_slice %0 {offsets = [0, 50], sizes = [3, 1], strides = [1, 1]} : vector<3x108xf32> to vector<3x1xf32>
    %330 = vector.extract_strided_slice %316 {offsets = [2, 0], sizes = [1, 256], strides = [1, 1]} : vector<3x256xf32> to vector<1x256xf32>
    %331 = vector.broadcast %329 : vector<3x1xf32> to vector<3x256xf32>
    %332 = vector.broadcast %330 : vector<1x256xf32> to vector<3x256xf32>
    %333 = arith.mulf %331, %332 : vector<3x256xf32>
    %334 = arith.addf %328, %333 : vector<3x256xf32>
    %c241_i32_14 = arith.constant 241 : i32
    %335 = tpu.dynamic_rotate %202 by %c241_i32_14 dim 1 : vector<3x256xf32>, i32 -> vector<3x256xf32>
    %336 = vector.extract_strided_slice %2 {offsets = [6, 0], sizes = [1, 256], strides = [1, 1]} : vector<9x256xf32> to vector<1x256xf32>
    %337 = vector.broadcast %336 : vector<1x256xf32> to vector<3x256xf32>
    %338 = arith.mulf %335, %337 : vector<3x256xf32>
    %339 = vector.extract_strided_slice %0 {offsets = [0, 33], sizes = [3, 1], strides = [1, 1]} : vector<3x108xf32> to vector<3x1xf32>
    %340 = vector.extract_strided_slice %338 {offsets = [0, 0], sizes = [1, 256], strides = [1, 1]} : vector<3x256xf32> to vector<1x256xf32>
    %341 = vector.broadcast %339 : vector<3x1xf32> to vector<3x256xf32>
    %342 = vector.broadcast %340 : vector<1x256xf32> to vector<3x256xf32>
    %343 = arith.mulf %341, %342 : vector<3x256xf32>
    %344 = arith.addf %334, %343 : vector<3x256xf32>
    %345 = vector.extract_strided_slice %0 {offsets = [0, 42], sizes = [3, 1], strides = [1, 1]} : vector<3x108xf32> to vector<3x1xf32>
    %346 = vector.extract_strided_slice %338 {offsets = [1, 0], sizes = [1, 256], strides = [1, 1]} : vector<3x256xf32> to vector<1x256xf32>
    %347 = vector.broadcast %345 : vector<3x1xf32> to vector<3x256xf32>
    %348 = vector.broadcast %346 : vector<1x256xf32> to vector<3x256xf32>
    %349 = arith.mulf %347, %348 : vector<3x256xf32>
    %350 = arith.addf %344, %349 : vector<3x256xf32>
    %351 = vector.extract_strided_slice %0 {offsets = [0, 51], sizes = [3, 1], strides = [1, 1]} : vector<3x108xf32> to vector<3x1xf32>
    %352 = vector.extract_strided_slice %338 {offsets = [2, 0], sizes = [1, 256], strides = [1, 1]} : vector<3x256xf32> to vector<1x256xf32>
    %353 = vector.broadcast %351 : vector<3x1xf32> to vector<3x256xf32>
    %354 = vector.broadcast %352 : vector<1x256xf32> to vector<3x256xf32>
    %355 = arith.mulf %353, %354 : vector<3x256xf32>
    %356 = arith.addf %350, %355 : vector<3x256xf32>
    %c240_i32_15 = arith.constant 240 : i32
    %357 = tpu.dynamic_rotate %202 by %c240_i32_15 dim 1 : vector<3x256xf32>, i32 -> vector<3x256xf32>
    %358 = vector.extract_strided_slice %2 {offsets = [7, 0], sizes = [1, 256], strides = [1, 1]} : vector<9x256xf32> to vector<1x256xf32>
    %359 = vector.broadcast %358 : vector<1x256xf32> to vector<3x256xf32>
    %360 = arith.mulf %357, %359 : vector<3x256xf32>
    %361 = vector.extract_strided_slice %0 {offsets = [0, 34], sizes = [3, 1], strides = [1, 1]} : vector<3x108xf32> to vector<3x1xf32>
    %362 = vector.extract_strided_slice %360 {offsets = [0, 0], sizes = [1, 256], strides = [1, 1]} : vector<3x256xf32> to vector<1x256xf32>
    %363 = vector.broadcast %361 : vector<3x1xf32> to vector<3x256xf32>
    %364 = vector.broadcast %362 : vector<1x256xf32> to vector<3x256xf32>
    %365 = arith.mulf %363, %364 : vector<3x256xf32>
    %366 = arith.addf %356, %365 : vector<3x256xf32>
    %367 = vector.extract_strided_slice %0 {offsets = [0, 43], sizes = [3, 1], strides = [1, 1]} : vector<3x108xf32> to vector<3x1xf32>
    %368 = vector.extract_strided_slice %360 {offsets = [1, 0], sizes = [1, 256], strides = [1, 1]} : vector<3x256xf32> to vector<1x256xf32>
    %369 = vector.broadcast %367 : vector<3x1xf32> to vector<3x256xf32>
    %370 = vector.broadcast %368 : vector<1x256xf32> to vector<3x256xf32>
    %371 = arith.mulf %369, %370 : vector<3x256xf32>
    %372 = arith.addf %366, %371 : vector<3x256xf32>
    %373 = vector.extract_strided_slice %0 {offsets = [0, 52], sizes = [3, 1], strides = [1, 1]} : vector<3x108xf32> to vector<3x1xf32>
    %374 = vector.extract_strided_slice %360 {offsets = [2, 0], sizes = [1, 256], strides = [1, 1]} : vector<3x256xf32> to vector<1x256xf32>
    %375 = vector.broadcast %373 : vector<3x1xf32> to vector<3x256xf32>
    %376 = vector.broadcast %374 : vector<1x256xf32> to vector<3x256xf32>
    %377 = arith.mulf %375, %376 : vector<3x256xf32>
    %378 = arith.addf %372, %377 : vector<3x256xf32>
    %c239_i32_16 = arith.constant 239 : i32
    %379 = tpu.dynamic_rotate %202 by %c239_i32_16 dim 1 : vector<3x256xf32>, i32 -> vector<3x256xf32>
    %380 = vector.extract_strided_slice %2 {offsets = [8, 0], sizes = [1, 256], strides = [1, 1]} : vector<9x256xf32> to vector<1x256xf32>
    %381 = vector.broadcast %380 : vector<1x256xf32> to vector<3x256xf32>
    %382 = arith.mulf %379, %381 : vector<3x256xf32>
    %383 = vector.extract_strided_slice %0 {offsets = [0, 35], sizes = [3, 1], strides = [1, 1]} : vector<3x108xf32> to vector<3x1xf32>
    %384 = vector.extract_strided_slice %382 {offsets = [0, 0], sizes = [1, 256], strides = [1, 1]} : vector<3x256xf32> to vector<1x256xf32>
    %385 = vector.broadcast %383 : vector<3x1xf32> to vector<3x256xf32>
    %386 = vector.broadcast %384 : vector<1x256xf32> to vector<3x256xf32>
    %387 = arith.mulf %385, %386 : vector<3x256xf32>
    %388 = arith.addf %378, %387 : vector<3x256xf32>
    %389 = vector.extract_strided_slice %0 {offsets = [0, 44], sizes = [3, 1], strides = [1, 1]} : vector<3x108xf32> to vector<3x1xf32>
    %390 = vector.extract_strided_slice %382 {offsets = [1, 0], sizes = [1, 256], strides = [1, 1]} : vector<3x256xf32> to vector<1x256xf32>
    %391 = vector.broadcast %389 : vector<3x1xf32> to vector<3x256xf32>
    %392 = vector.broadcast %390 : vector<1x256xf32> to vector<3x256xf32>
    %393 = arith.mulf %391, %392 : vector<3x256xf32>
    %394 = arith.addf %388, %393 : vector<3x256xf32>
    %395 = vector.extract_strided_slice %0 {offsets = [0, 53], sizes = [3, 1], strides = [1, 1]} : vector<3x108xf32> to vector<3x1xf32>
    %396 = vector.extract_strided_slice %382 {offsets = [2, 0], sizes = [1, 256], strides = [1, 1]} : vector<3x256xf32> to vector<1x256xf32>
    %397 = vector.broadcast %395 : vector<3x1xf32> to vector<3x256xf32>
    %398 = vector.broadcast %396 : vector<1x256xf32> to vector<3x256xf32>
    %399 = arith.mulf %397, %398 : vector<3x256xf32>
    %400 = arith.addf %394, %399 : vector<3x256xf32>
    %cst_17 = arith.constant 0.000000e+00 : f32
    %401 = vector.broadcast %cst_17 : f32 to vector<3x256xf32>
    %402 = vector.extract_strided_slice %1 {offsets = [0, 2], sizes = [3, 1], strides = [1, 1]} : vector<3x4xf32> to vector<3x1xf32>
    %403 = vector.broadcast %402 : vector<3x1xf32> to vector<3x256xf32>
    %404 = arith.addf %401, %403 : vector<3x256xf32>
    %c17_i32_18 = arith.constant 17 : i32
    %405 = tpu.dynamic_rotate %400 by %c17_i32_18 dim 1 : vector<3x256xf32>, i32 -> vector<3x256xf32>
    %406 = vector.extract_strided_slice %2 {offsets = [0, 0], sizes = [1, 256], strides = [1, 1]} : vector<9x256xf32> to vector<1x256xf32>
    %407 = vector.broadcast %406 : vector<1x256xf32> to vector<3x256xf32>
    %408 = arith.mulf %405, %407 : vector<3x256xf32>
    %409 = vector.extract_strided_slice %0 {offsets = [0, 54], sizes = [3, 1], strides = [1, 1]} : vector<3x108xf32> to vector<3x1xf32>
    %410 = vector.extract_strided_slice %408 {offsets = [0, 0], sizes = [1, 256], strides = [1, 1]} : vector<3x256xf32> to vector<1x256xf32>
    %411 = vector.broadcast %409 : vector<3x1xf32> to vector<3x256xf32>
    %412 = vector.broadcast %410 : vector<1x256xf32> to vector<3x256xf32>
    %413 = arith.mulf %411, %412 : vector<3x256xf32>
    %414 = arith.addf %404, %413 : vector<3x256xf32>
    %415 = vector.extract_strided_slice %0 {offsets = [0, 63], sizes = [3, 1], strides = [1, 1]} : vector<3x108xf32> to vector<3x1xf32>
    %416 = vector.extract_strided_slice %408 {offsets = [1, 0], sizes = [1, 256], strides = [1, 1]} : vector<3x256xf32> to vector<1x256xf32>
    %417 = vector.broadcast %415 : vector<3x1xf32> to vector<3x256xf32>
    %418 = vector.broadcast %416 : vector<1x256xf32> to vector<3x256xf32>
    %419 = arith.mulf %417, %418 : vector<3x256xf32>
    %420 = arith.addf %414, %419 : vector<3x256xf32>
    %421 = vector.extract_strided_slice %0 {offsets = [0, 72], sizes = [3, 1], strides = [1, 1]} : vector<3x108xf32> to vector<3x1xf32>
    %422 = vector.extract_strided_slice %408 {offsets = [2, 0], sizes = [1, 256], strides = [1, 1]} : vector<3x256xf32> to vector<1x256xf32>
    %423 = vector.broadcast %421 : vector<3x1xf32> to vector<3x256xf32>
    %424 = vector.broadcast %422 : vector<1x256xf32> to vector<3x256xf32>
    %425 = arith.mulf %423, %424 : vector<3x256xf32>
    %426 = arith.addf %420, %425 : vector<3x256xf32>
    %c16_i32_19 = arith.constant 16 : i32
    %427 = tpu.dynamic_rotate %400 by %c16_i32_19 dim 1 : vector<3x256xf32>, i32 -> vector<3x256xf32>
    %428 = vector.extract_strided_slice %2 {offsets = [1, 0], sizes = [1, 256], strides = [1, 1]} : vector<9x256xf32> to vector<1x256xf32>
    %429 = vector.broadcast %428 : vector<1x256xf32> to vector<3x256xf32>
    %430 = arith.mulf %427, %429 : vector<3x256xf32>
    %431 = vector.extract_strided_slice %0 {offsets = [0, 55], sizes = [3, 1], strides = [1, 1]} : vector<3x108xf32> to vector<3x1xf32>
    %432 = vector.extract_strided_slice %430 {offsets = [0, 0], sizes = [1, 256], strides = [1, 1]} : vector<3x256xf32> to vector<1x256xf32>
    %433 = vector.broadcast %431 : vector<3x1xf32> to vector<3x256xf32>
    %434 = vector.broadcast %432 : vector<1x256xf32> to vector<3x256xf32>
    %435 = arith.mulf %433, %434 : vector<3x256xf32>
    %436 = arith.addf %426, %435 : vector<3x256xf32>
    %437 = vector.extract_strided_slice %0 {offsets = [0, 64], sizes = [3, 1], strides = [1, 1]} : vector<3x108xf32> to vector<3x1xf32>
    %438 = vector.extract_strided_slice %430 {offsets = [1, 0], sizes = [1, 256], strides = [1, 1]} : vector<3x256xf32> to vector<1x256xf32>
    %439 = vector.broadcast %437 : vector<3x1xf32> to vector<3x256xf32>
    %440 = vector.broadcast %438 : vector<1x256xf32> to vector<3x256xf32>
    %441 = arith.mulf %439, %440 : vector<3x256xf32>
    %442 = arith.addf %436, %441 : vector<3x256xf32>
    %443 = vector.extract_strided_slice %0 {offsets = [0, 73], sizes = [3, 1], strides = [1, 1]} : vector<3x108xf32> to vector<3x1xf32>
    %444 = vector.extract_strided_slice %430 {offsets = [2, 0], sizes = [1, 256], strides = [1, 1]} : vector<3x256xf32> to vector<1x256xf32>
    %445 = vector.broadcast %443 : vector<3x1xf32> to vector<3x256xf32>
    %446 = vector.broadcast %444 : vector<1x256xf32> to vector<3x256xf32>
    %447 = arith.mulf %445, %446 : vector<3x256xf32>
    %448 = arith.addf %442, %447 : vector<3x256xf32>
    %c15_i32_20 = arith.constant 15 : i32
    %449 = tpu.dynamic_rotate %400 by %c15_i32_20 dim 1 : vector<3x256xf32>, i32 -> vector<3x256xf32>
    %450 = vector.extract_strided_slice %2 {offsets = [2, 0], sizes = [1, 256], strides = [1, 1]} : vector<9x256xf32> to vector<1x256xf32>
    %451 = vector.broadcast %450 : vector<1x256xf32> to vector<3x256xf32>
    %452 = arith.mulf %449, %451 : vector<3x256xf32>
    %453 = vector.extract_strided_slice %0 {offsets = [0, 56], sizes = [3, 1], strides = [1, 1]} : vector<3x108xf32> to vector<3x1xf32>
    %454 = vector.extract_strided_slice %452 {offsets = [0, 0], sizes = [1, 256], strides = [1, 1]} : vector<3x256xf32> to vector<1x256xf32>
    %455 = vector.broadcast %453 : vector<3x1xf32> to vector<3x256xf32>
    %456 = vector.broadcast %454 : vector<1x256xf32> to vector<3x256xf32>
    %457 = arith.mulf %455, %456 : vector<3x256xf32>
    %458 = arith.addf %448, %457 : vector<3x256xf32>
    %459 = vector.extract_strided_slice %0 {offsets = [0, 65], sizes = [3, 1], strides = [1, 1]} : vector<3x108xf32> to vector<3x1xf32>
    %460 = vector.extract_strided_slice %452 {offsets = [1, 0], sizes = [1, 256], strides = [1, 1]} : vector<3x256xf32> to vector<1x256xf32>
    %461 = vector.broadcast %459 : vector<3x1xf32> to vector<3x256xf32>
    %462 = vector.broadcast %460 : vector<1x256xf32> to vector<3x256xf32>
    %463 = arith.mulf %461, %462 : vector<3x256xf32>
    %464 = arith.addf %458, %463 : vector<3x256xf32>
    %465 = vector.extract_strided_slice %0 {offsets = [0, 74], sizes = [3, 1], strides = [1, 1]} : vector<3x108xf32> to vector<3x1xf32>
    %466 = vector.extract_strided_slice %452 {offsets = [2, 0], sizes = [1, 256], strides = [1, 1]} : vector<3x256xf32> to vector<1x256xf32>
    %467 = vector.broadcast %465 : vector<3x1xf32> to vector<3x256xf32>
    %468 = vector.broadcast %466 : vector<1x256xf32> to vector<3x256xf32>
    %469 = arith.mulf %467, %468 : vector<3x256xf32>
    %470 = arith.addf %464, %469 : vector<3x256xf32>
    %c1_i32_21 = arith.constant 1 : i32
    %471 = tpu.dynamic_rotate %400 by %c1_i32_21 dim 1 : vector<3x256xf32>, i32 -> vector<3x256xf32>
    %472 = vector.extract_strided_slice %2 {offsets = [3, 0], sizes = [1, 256], strides = [1, 1]} : vector<9x256xf32> to vector<1x256xf32>
    %473 = vector.broadcast %472 : vector<1x256xf32> to vector<3x256xf32>
    %474 = arith.mulf %471, %473 : vector<3x256xf32>
    %475 = vector.extract_strided_slice %0 {offsets = [0, 57], sizes = [3, 1], strides = [1, 1]} : vector<3x108xf32> to vector<3x1xf32>
    %476 = vector.extract_strided_slice %474 {offsets = [0, 0], sizes = [1, 256], strides = [1, 1]} : vector<3x256xf32> to vector<1x256xf32>
    %477 = vector.broadcast %475 : vector<3x1xf32> to vector<3x256xf32>
    %478 = vector.broadcast %476 : vector<1x256xf32> to vector<3x256xf32>
    %479 = arith.mulf %477, %478 : vector<3x256xf32>
    %480 = arith.addf %470, %479 : vector<3x256xf32>
    %481 = vector.extract_strided_slice %0 {offsets = [0, 66], sizes = [3, 1], strides = [1, 1]} : vector<3x108xf32> to vector<3x1xf32>
    %482 = vector.extract_strided_slice %474 {offsets = [1, 0], sizes = [1, 256], strides = [1, 1]} : vector<3x256xf32> to vector<1x256xf32>
    %483 = vector.broadcast %481 : vector<3x1xf32> to vector<3x256xf32>
    %484 = vector.broadcast %482 : vector<1x256xf32> to vector<3x256xf32>
    %485 = arith.mulf %483, %484 : vector<3x256xf32>
    %486 = arith.addf %480, %485 : vector<3x256xf32>
    %487 = vector.extract_strided_slice %0 {offsets = [0, 75], sizes = [3, 1], strides = [1, 1]} : vector<3x108xf32> to vector<3x1xf32>
    %488 = vector.extract_strided_slice %474 {offsets = [2, 0], sizes = [1, 256], strides = [1, 1]} : vector<3x256xf32> to vector<1x256xf32>
    %489 = vector.broadcast %487 : vector<3x1xf32> to vector<3x256xf32>
    %490 = vector.broadcast %488 : vector<1x256xf32> to vector<3x256xf32>
    %491 = arith.mulf %489, %490 : vector<3x256xf32>
    %492 = arith.addf %486, %491 : vector<3x256xf32>
    %493 = vector.extract_strided_slice %0 {offsets = [0, 58], sizes = [3, 1], strides = [1, 1]} : vector<3x108xf32> to vector<3x1xf32>
    %494 = vector.extract_strided_slice %400 {offsets = [0, 0], sizes = [1, 256], strides = [1, 1]} : vector<3x256xf32> to vector<1x256xf32>
    %495 = vector.broadcast %493 : vector<3x1xf32> to vector<3x256xf32>
    %496 = vector.broadcast %494 : vector<1x256xf32> to vector<3x256xf32>
    %497 = arith.mulf %495, %496 : vector<3x256xf32>
    %498 = arith.addf %492, %497 : vector<3x256xf32>
    %499 = vector.extract_strided_slice %0 {offsets = [0, 67], sizes = [3, 1], strides = [1, 1]} : vector<3x108xf32> to vector<3x1xf32>
    %500 = vector.extract_strided_slice %400 {offsets = [1, 0], sizes = [1, 256], strides = [1, 1]} : vector<3x256xf32> to vector<1x256xf32>
    %501 = vector.broadcast %499 : vector<3x1xf32> to vector<3x256xf32>
    %502 = vector.broadcast %500 : vector<1x256xf32> to vector<3x256xf32>
    %503 = arith.mulf %501, %502 : vector<3x256xf32>
    %504 = arith.addf %498, %503 : vector<3x256xf32>
    %505 = vector.extract_strided_slice %0 {offsets = [0, 76], sizes = [3, 1], strides = [1, 1]} : vector<3x108xf32> to vector<3x1xf32>
    %506 = vector.extract_strided_slice %400 {offsets = [2, 0], sizes = [1, 256], strides = [1, 1]} : vector<3x256xf32> to vector<1x256xf32>
    %507 = vector.broadcast %505 : vector<3x1xf32> to vector<3x256xf32>
    %508 = vector.broadcast %506 : vector<1x256xf32> to vector<3x256xf32>
    %509 = arith.mulf %507, %508 : vector<3x256xf32>
    %510 = arith.addf %504, %509 : vector<3x256xf32>
    %c255_i32_22 = arith.constant 255 : i32
    %511 = tpu.dynamic_rotate %400 by %c255_i32_22 dim 1 : vector<3x256xf32>, i32 -> vector<3x256xf32>
    %512 = vector.extract_strided_slice %2 {offsets = [5, 0], sizes = [1, 256], strides = [1, 1]} : vector<9x256xf32> to vector<1x256xf32>
    %513 = vector.broadcast %512 : vector<1x256xf32> to vector<3x256xf32>
    %514 = arith.mulf %511, %513 : vector<3x256xf32>
    %515 = vector.extract_strided_slice %0 {offsets = [0, 59], sizes = [3, 1], strides = [1, 1]} : vector<3x108xf32> to vector<3x1xf32>
    %516 = vector.extract_strided_slice %514 {offsets = [0, 0], sizes = [1, 256], strides = [1, 1]} : vector<3x256xf32> to vector<1x256xf32>
    %517 = vector.broadcast %515 : vector<3x1xf32> to vector<3x256xf32>
    %518 = vector.broadcast %516 : vector<1x256xf32> to vector<3x256xf32>
    %519 = arith.mulf %517, %518 : vector<3x256xf32>
    %520 = arith.addf %510, %519 : vector<3x256xf32>
    %521 = vector.extract_strided_slice %0 {offsets = [0, 68], sizes = [3, 1], strides = [1, 1]} : vector<3x108xf32> to vector<3x1xf32>
    %522 = vector.extract_strided_slice %514 {offsets = [1, 0], sizes = [1, 256], strides = [1, 1]} : vector<3x256xf32> to vector<1x256xf32>
    %523 = vector.broadcast %521 : vector<3x1xf32> to vector<3x256xf32>
    %524 = vector.broadcast %522 : vector<1x256xf32> to vector<3x256xf32>
    %525 = arith.mulf %523, %524 : vector<3x256xf32>
    %526 = arith.addf %520, %525 : vector<3x256xf32>
    %527 = vector.extract_strided_slice %0 {offsets = [0, 77], sizes = [3, 1], strides = [1, 1]} : vector<3x108xf32> to vector<3x1xf32>
    %528 = vector.extract_strided_slice %514 {offsets = [2, 0], sizes = [1, 256], strides = [1, 1]} : vector<3x256xf32> to vector<1x256xf32>
    %529 = vector.broadcast %527 : vector<3x1xf32> to vector<3x256xf32>
    %530 = vector.broadcast %528 : vector<1x256xf32> to vector<3x256xf32>
    %531 = arith.mulf %529, %530 : vector<3x256xf32>
    %532 = arith.addf %526, %531 : vector<3x256xf32>
    %c241_i32_23 = arith.constant 241 : i32
    %533 = tpu.dynamic_rotate %400 by %c241_i32_23 dim 1 : vector<3x256xf32>, i32 -> vector<3x256xf32>
    %534 = vector.extract_strided_slice %2 {offsets = [6, 0], sizes = [1, 256], strides = [1, 1]} : vector<9x256xf32> to vector<1x256xf32>
    %535 = vector.broadcast %534 : vector<1x256xf32> to vector<3x256xf32>
    %536 = arith.mulf %533, %535 : vector<3x256xf32>
    %537 = vector.extract_strided_slice %0 {offsets = [0, 60], sizes = [3, 1], strides = [1, 1]} : vector<3x108xf32> to vector<3x1xf32>
    %538 = vector.extract_strided_slice %536 {offsets = [0, 0], sizes = [1, 256], strides = [1, 1]} : vector<3x256xf32> to vector<1x256xf32>
    %539 = vector.broadcast %537 : vector<3x1xf32> to vector<3x256xf32>
    %540 = vector.broadcast %538 : vector<1x256xf32> to vector<3x256xf32>
    %541 = arith.mulf %539, %540 : vector<3x256xf32>
    %542 = arith.addf %532, %541 : vector<3x256xf32>
    %543 = vector.extract_strided_slice %0 {offsets = [0, 69], sizes = [3, 1], strides = [1, 1]} : vector<3x108xf32> to vector<3x1xf32>
    %544 = vector.extract_strided_slice %536 {offsets = [1, 0], sizes = [1, 256], strides = [1, 1]} : vector<3x256xf32> to vector<1x256xf32>
    %545 = vector.broadcast %543 : vector<3x1xf32> to vector<3x256xf32>
    %546 = vector.broadcast %544 : vector<1x256xf32> to vector<3x256xf32>
    %547 = arith.mulf %545, %546 : vector<3x256xf32>
    %548 = arith.addf %542, %547 : vector<3x256xf32>
    %549 = vector.extract_strided_slice %0 {offsets = [0, 78], sizes = [3, 1], strides = [1, 1]} : vector<3x108xf32> to vector<3x1xf32>
    %550 = vector.extract_strided_slice %536 {offsets = [2, 0], sizes = [1, 256], strides = [1, 1]} : vector<3x256xf32> to vector<1x256xf32>
    %551 = vector.broadcast %549 : vector<3x1xf32> to vector<3x256xf32>
    %552 = vector.broadcast %550 : vector<1x256xf32> to vector<3x256xf32>
    %553 = arith.mulf %551, %552 : vector<3x256xf32>
    %554 = arith.addf %548, %553 : vector<3x256xf32>
    %c240_i32_24 = arith.constant 240 : i32
    %555 = tpu.dynamic_rotate %400 by %c240_i32_24 dim 1 : vector<3x256xf32>, i32 -> vector<3x256xf32>
    %556 = vector.extract_strided_slice %2 {offsets = [7, 0], sizes = [1, 256], strides = [1, 1]} : vector<9x256xf32> to vector<1x256xf32>
    %557 = vector.broadcast %556 : vector<1x256xf32> to vector<3x256xf32>
    %558 = arith.mulf %555, %557 : vector<3x256xf32>
    %559 = vector.extract_strided_slice %0 {offsets = [0, 61], sizes = [3, 1], strides = [1, 1]} : vector<3x108xf32> to vector<3x1xf32>
    %560 = vector.extract_strided_slice %558 {offsets = [0, 0], sizes = [1, 256], strides = [1, 1]} : vector<3x256xf32> to vector<1x256xf32>
    %561 = vector.broadcast %559 : vector<3x1xf32> to vector<3x256xf32>
    %562 = vector.broadcast %560 : vector<1x256xf32> to vector<3x256xf32>
    %563 = arith.mulf %561, %562 : vector<3x256xf32>
    %564 = arith.addf %554, %563 : vector<3x256xf32>
    %565 = vector.extract_strided_slice %0 {offsets = [0, 70], sizes = [3, 1], strides = [1, 1]} : vector<3x108xf32> to vector<3x1xf32>
    %566 = vector.extract_strided_slice %558 {offsets = [1, 0], sizes = [1, 256], strides = [1, 1]} : vector<3x256xf32> to vector<1x256xf32>
    %567 = vector.broadcast %565 : vector<3x1xf32> to vector<3x256xf32>
    %568 = vector.broadcast %566 : vector<1x256xf32> to vector<3x256xf32>
    %569 = arith.mulf %567, %568 : vector<3x256xf32>
    %570 = arith.addf %564, %569 : vector<3x256xf32>
    %571 = vector.extract_strided_slice %0 {offsets = [0, 79], sizes = [3, 1], strides = [1, 1]} : vector<3x108xf32> to vector<3x1xf32>
    %572 = vector.extract_strided_slice %558 {offsets = [2, 0], sizes = [1, 256], strides = [1, 1]} : vector<3x256xf32> to vector<1x256xf32>
    %573 = vector.broadcast %571 : vector<3x1xf32> to vector<3x256xf32>
    %574 = vector.broadcast %572 : vector<1x256xf32> to vector<3x256xf32>
    %575 = arith.mulf %573, %574 : vector<3x256xf32>
    %576 = arith.addf %570, %575 : vector<3x256xf32>
    %c239_i32_25 = arith.constant 239 : i32
    %577 = tpu.dynamic_rotate %400 by %c239_i32_25 dim 1 : vector<3x256xf32>, i32 -> vector<3x256xf32>
    %578 = vector.extract_strided_slice %2 {offsets = [8, 0], sizes = [1, 256], strides = [1, 1]} : vector<9x256xf32> to vector<1x256xf32>
    %579 = vector.broadcast %578 : vector<1x256xf32> to vector<3x256xf32>
    %580 = arith.mulf %577, %579 : vector<3x256xf32>
    %581 = vector.extract_strided_slice %0 {offsets = [0, 62], sizes = [3, 1], strides = [1, 1]} : vector<3x108xf32> to vector<3x1xf32>
    %582 = vector.extract_strided_slice %580 {offsets = [0, 0], sizes = [1, 256], strides = [1, 1]} : vector<3x256xf32> to vector<1x256xf32>
    %583 = vector.broadcast %581 : vector<3x1xf32> to vector<3x256xf32>
    %584 = vector.broadcast %582 : vector<1x256xf32> to vector<3x256xf32>
    %585 = arith.mulf %583, %584 : vector<3x256xf32>
    %586 = arith.addf %576, %585 : vector<3x256xf32>
    %587 = vector.extract_strided_slice %0 {offsets = [0, 71], sizes = [3, 1], strides = [1, 1]} : vector<3x108xf32> to vector<3x1xf32>
    %588 = vector.extract_strided_slice %580 {offsets = [1, 0], sizes = [1, 256], strides = [1, 1]} : vector<3x256xf32> to vector<1x256xf32>
    %589 = vector.broadcast %587 : vector<3x1xf32> to vector<3x256xf32>
    %590 = vector.broadcast %588 : vector<1x256xf32> to vector<3x256xf32>
    %591 = arith.mulf %589, %590 : vector<3x256xf32>
    %592 = arith.addf %586, %591 : vector<3x256xf32>
    %593 = vector.extract_strided_slice %0 {offsets = [0, 80], sizes = [3, 1], strides = [1, 1]} : vector<3x108xf32> to vector<3x1xf32>
    %594 = vector.extract_strided_slice %580 {offsets = [2, 0], sizes = [1, 256], strides = [1, 1]} : vector<3x256xf32> to vector<1x256xf32>
    %595 = vector.broadcast %593 : vector<3x1xf32> to vector<3x256xf32>
    %596 = vector.broadcast %594 : vector<1x256xf32> to vector<3x256xf32>
    %597 = arith.mulf %595, %596 : vector<3x256xf32>
    %598 = arith.addf %592, %597 : vector<3x256xf32>
    %cst_26 = arith.constant 0.000000e+00 : f32
    %599 = vector.broadcast %cst_26 : f32 to vector<3x256xf32>
    %600 = vector.extract_strided_slice %1 {offsets = [0, 3], sizes = [3, 1], strides = [1, 1]} : vector<3x4xf32> to vector<3x1xf32>
    %601 = vector.broadcast %600 : vector<3x1xf32> to vector<3x256xf32>
    %602 = arith.addf %599, %601 : vector<3x256xf32>
    %c17_i32_27 = arith.constant 17 : i32
    %603 = tpu.dynamic_rotate %598 by %c17_i32_27 dim 1 : vector<3x256xf32>, i32 -> vector<3x256xf32>
    %604 = vector.extract_strided_slice %2 {offsets = [0, 0], sizes = [1, 256], strides = [1, 1]} : vector<9x256xf32> to vector<1x256xf32>
    %605 = vector.broadcast %604 : vector<1x256xf32> to vector<3x256xf32>
    %606 = arith.mulf %603, %605 : vector<3x256xf32>
    %607 = vector.extract_strided_slice %0 {offsets = [0, 81], sizes = [3, 1], strides = [1, 1]} : vector<3x108xf32> to vector<3x1xf32>
    %608 = vector.extract_strided_slice %606 {offsets = [0, 0], sizes = [1, 256], strides = [1, 1]} : vector<3x256xf32> to vector<1x256xf32>
    %609 = vector.broadcast %607 : vector<3x1xf32> to vector<3x256xf32>
    %610 = vector.broadcast %608 : vector<1x256xf32> to vector<3x256xf32>
    %611 = arith.mulf %609, %610 : vector<3x256xf32>
    %612 = arith.addf %602, %611 : vector<3x256xf32>
    %613 = vector.extract_strided_slice %0 {offsets = [0, 90], sizes = [3, 1], strides = [1, 1]} : vector<3x108xf32> to vector<3x1xf32>
    %614 = vector.extract_strided_slice %606 {offsets = [1, 0], sizes = [1, 256], strides = [1, 1]} : vector<3x256xf32> to vector<1x256xf32>
    %615 = vector.broadcast %613 : vector<3x1xf32> to vector<3x256xf32>
    %616 = vector.broadcast %614 : vector<1x256xf32> to vector<3x256xf32>
    %617 = arith.mulf %615, %616 : vector<3x256xf32>
    %618 = arith.addf %612, %617 : vector<3x256xf32>
    %619 = vector.extract_strided_slice %0 {offsets = [0, 99], sizes = [3, 1], strides = [1, 1]} : vector<3x108xf32> to vector<3x1xf32>
    %620 = vector.extract_strided_slice %606 {offsets = [2, 0], sizes = [1, 256], strides = [1, 1]} : vector<3x256xf32> to vector<1x256xf32>
    %621 = vector.broadcast %619 : vector<3x1xf32> to vector<3x256xf32>
    %622 = vector.broadcast %620 : vector<1x256xf32> to vector<3x256xf32>
    %623 = arith.mulf %621, %622 : vector<3x256xf32>
    %624 = arith.addf %618, %623 : vector<3x256xf32>
    %c16_i32_28 = arith.constant 16 : i32
    %625 = tpu.dynamic_rotate %598 by %c16_i32_28 dim 1 : vector<3x256xf32>, i32 -> vector<3x256xf32>
    %626 = vector.extract_strided_slice %2 {offsets = [1, 0], sizes = [1, 256], strides = [1, 1]} : vector<9x256xf32> to vector<1x256xf32>
    %627 = vector.broadcast %626 : vector<1x256xf32> to vector<3x256xf32>
    %628 = arith.mulf %625, %627 : vector<3x256xf32>
    %629 = vector.extract_strided_slice %0 {offsets = [0, 82], sizes = [3, 1], strides = [1, 1]} : vector<3x108xf32> to vector<3x1xf32>
    %630 = vector.extract_strided_slice %628 {offsets = [0, 0], sizes = [1, 256], strides = [1, 1]} : vector<3x256xf32> to vector<1x256xf32>
    %631 = vector.broadcast %629 : vector<3x1xf32> to vector<3x256xf32>
    %632 = vector.broadcast %630 : vector<1x256xf32> to vector<3x256xf32>
    %633 = arith.mulf %631, %632 : vector<3x256xf32>
    %634 = arith.addf %624, %633 : vector<3x256xf32>
    %635 = vector.extract_strided_slice %0 {offsets = [0, 91], sizes = [3, 1], strides = [1, 1]} : vector<3x108xf32> to vector<3x1xf32>
    %636 = vector.extract_strided_slice %628 {offsets = [1, 0], sizes = [1, 256], strides = [1, 1]} : vector<3x256xf32> to vector<1x256xf32>
    %637 = vector.broadcast %635 : vector<3x1xf32> to vector<3x256xf32>
    %638 = vector.broadcast %636 : vector<1x256xf32> to vector<3x256xf32>
    %639 = arith.mulf %637, %638 : vector<3x256xf32>
    %640 = arith.addf %634, %639 : vector<3x256xf32>
    %641 = vector.extract_strided_slice %0 {offsets = [0, 100], sizes = [3, 1], strides = [1, 1]} : vector<3x108xf32> to vector<3x1xf32>
    %642 = vector.extract_strided_slice %628 {offsets = [2, 0], sizes = [1, 256], strides = [1, 1]} : vector<3x256xf32> to vector<1x256xf32>
    %643 = vector.broadcast %641 : vector<3x1xf32> to vector<3x256xf32>
    %644 = vector.broadcast %642 : vector<1x256xf32> to vector<3x256xf32>
    %645 = arith.mulf %643, %644 : vector<3x256xf32>
    %646 = arith.addf %640, %645 : vector<3x256xf32>
    %c15_i32_29 = arith.constant 15 : i32
    %647 = tpu.dynamic_rotate %598 by %c15_i32_29 dim 1 : vector<3x256xf32>, i32 -> vector<3x256xf32>
    %648 = vector.extract_strided_slice %2 {offsets = [2, 0], sizes = [1, 256], strides = [1, 1]} : vector<9x256xf32> to vector<1x256xf32>
    %649 = vector.broadcast %648 : vector<1x256xf32> to vector<3x256xf32>
    %650 = arith.mulf %647, %649 : vector<3x256xf32>
    %651 = vector.extract_strided_slice %0 {offsets = [0, 83], sizes = [3, 1], strides = [1, 1]} : vector<3x108xf32> to vector<3x1xf32>
    %652 = vector.extract_strided_slice %650 {offsets = [0, 0], sizes = [1, 256], strides = [1, 1]} : vector<3x256xf32> to vector<1x256xf32>
    %653 = vector.broadcast %651 : vector<3x1xf32> to vector<3x256xf32>
    %654 = vector.broadcast %652 : vector<1x256xf32> to vector<3x256xf32>
    %655 = arith.mulf %653, %654 : vector<3x256xf32>
    %656 = arith.addf %646, %655 : vector<3x256xf32>
    %657 = vector.extract_strided_slice %0 {offsets = [0, 92], sizes = [3, 1], strides = [1, 1]} : vector<3x108xf32> to vector<3x1xf32>
    %658 = vector.extract_strided_slice %650 {offsets = [1, 0], sizes = [1, 256], strides = [1, 1]} : vector<3x256xf32> to vector<1x256xf32>
    %659 = vector.broadcast %657 : vector<3x1xf32> to vector<3x256xf32>
    %660 = vector.broadcast %658 : vector<1x256xf32> to vector<3x256xf32>
    %661 = arith.mulf %659, %660 : vector<3x256xf32>
    %662 = arith.addf %656, %661 : vector<3x256xf32>
    %663 = vector.extract_strided_slice %0 {offsets = [0, 101], sizes = [3, 1], strides = [1, 1]} : vector<3x108xf32> to vector<3x1xf32>
    %664 = vector.extract_strided_slice %650 {offsets = [2, 0], sizes = [1, 256], strides = [1, 1]} : vector<3x256xf32> to vector<1x256xf32>
    %665 = vector.broadcast %663 : vector<3x1xf32> to vector<3x256xf32>
    %666 = vector.broadcast %664 : vector<1x256xf32> to vector<3x256xf32>
    %667 = arith.mulf %665, %666 : vector<3x256xf32>
    %668 = arith.addf %662, %667 : vector<3x256xf32>
    %c1_i32_30 = arith.constant 1 : i32
    %669 = tpu.dynamic_rotate %598 by %c1_i32_30 dim 1 : vector<3x256xf32>, i32 -> vector<3x256xf32>
    %670 = vector.extract_strided_slice %2 {offsets = [3, 0], sizes = [1, 256], strides = [1, 1]} : vector<9x256xf32> to vector<1x256xf32>
    %671 = vector.broadcast %670 : vector<1x256xf32> to vector<3x256xf32>
    %672 = arith.mulf %669, %671 : vector<3x256xf32>
    %673 = vector.extract_strided_slice %0 {offsets = [0, 84], sizes = [3, 1], strides = [1, 1]} : vector<3x108xf32> to vector<3x1xf32>
    %674 = vector.extract_strided_slice %672 {offsets = [0, 0], sizes = [1, 256], strides = [1, 1]} : vector<3x256xf32> to vector<1x256xf32>
    %675 = vector.broadcast %673 : vector<3x1xf32> to vector<3x256xf32>
    %676 = vector.broadcast %674 : vector<1x256xf32> to vector<3x256xf32>
    %677 = arith.mulf %675, %676 : vector<3x256xf32>
    %678 = arith.addf %668, %677 : vector<3x256xf32>
    %679 = vector.extract_strided_slice %0 {offsets = [0, 93], sizes = [3, 1], strides = [1, 1]} : vector<3x108xf32> to vector<3x1xf32>
    %680 = vector.extract_strided_slice %672 {offsets = [1, 0], sizes = [1, 256], strides = [1, 1]} : vector<3x256xf32> to vector<1x256xf32>
    %681 = vector.broadcast %679 : vector<3x1xf32> to vector<3x256xf32>
    %682 = vector.broadcast %680 : vector<1x256xf32> to vector<3x256xf32>
    %683 = arith.mulf %681, %682 : vector<3x256xf32>
    %684 = arith.addf %678, %683 : vector<3x256xf32>
    %685 = vector.extract_strided_slice %0 {offsets = [0, 102], sizes = [3, 1], strides = [1, 1]} : vector<3x108xf32> to vector<3x1xf32>
    %686 = vector.extract_strided_slice %672 {offsets = [2, 0], sizes = [1, 256], strides = [1, 1]} : vector<3x256xf32> to vector<1x256xf32>
    %687 = vector.broadcast %685 : vector<3x1xf32> to vector<3x256xf32>
    %688 = vector.broadcast %686 : vector<1x256xf32> to vector<3x256xf32>
    %689 = arith.mulf %687, %688 : vector<3x256xf32>
    %690 = arith.addf %684, %689 : vector<3x256xf32>
    %691 = vector.extract_strided_slice %0 {offsets = [0, 85], sizes = [3, 1], strides = [1, 1]} : vector<3x108xf32> to vector<3x1xf32>
    %692 = vector.extract_strided_slice %598 {offsets = [0, 0], sizes = [1, 256], strides = [1, 1]} : vector<3x256xf32> to vector<1x256xf32>
    %693 = vector.broadcast %691 : vector<3x1xf32> to vector<3x256xf32>
    %694 = vector.broadcast %692 : vector<1x256xf32> to vector<3x256xf32>
    %695 = arith.mulf %693, %694 : vector<3x256xf32>
    %696 = arith.addf %690, %695 : vector<3x256xf32>
    %697 = vector.extract_strided_slice %0 {offsets = [0, 94], sizes = [3, 1], strides = [1, 1]} : vector<3x108xf32> to vector<3x1xf32>
    %698 = vector.extract_strided_slice %598 {offsets = [1, 0], sizes = [1, 256], strides = [1, 1]} : vector<3x256xf32> to vector<1x256xf32>
    %699 = vector.broadcast %697 : vector<3x1xf32> to vector<3x256xf32>
    %700 = vector.broadcast %698 : vector<1x256xf32> to vector<3x256xf32>
    %701 = arith.mulf %699, %700 : vector<3x256xf32>
    %702 = arith.addf %696, %701 : vector<3x256xf32>
    %703 = vector.extract_strided_slice %0 {offsets = [0, 103], sizes = [3, 1], strides = [1, 1]} : vector<3x108xf32> to vector<3x1xf32>
    %704 = vector.extract_strided_slice %598 {offsets = [2, 0], sizes = [1, 256], strides = [1, 1]} : vector<3x256xf32> to vector<1x256xf32>
    %705 = vector.broadcast %703 : vector<3x1xf32> to vector<3x256xf32>
    %706 = vector.broadcast %704 : vector<1x256xf32> to vector<3x256xf32>
    %707 = arith.mulf %705, %706 : vector<3x256xf32>
    %708 = arith.addf %702, %707 : vector<3x256xf32>
    %c255_i32_31 = arith.constant 255 : i32
    %709 = tpu.dynamic_rotate %598 by %c255_i32_31 dim 1 : vector<3x256xf32>, i32 -> vector<3x256xf32>
    %710 = vector.extract_strided_slice %2 {offsets = [5, 0], sizes = [1, 256], strides = [1, 1]} : vector<9x256xf32> to vector<1x256xf32>
    %711 = vector.broadcast %710 : vector<1x256xf32> to vector<3x256xf32>
    %712 = arith.mulf %709, %711 : vector<3x256xf32>
    %713 = vector.extract_strided_slice %0 {offsets = [0, 86], sizes = [3, 1], strides = [1, 1]} : vector<3x108xf32> to vector<3x1xf32>
    %714 = vector.extract_strided_slice %712 {offsets = [0, 0], sizes = [1, 256], strides = [1, 1]} : vector<3x256xf32> to vector<1x256xf32>
    %715 = vector.broadcast %713 : vector<3x1xf32> to vector<3x256xf32>
    %716 = vector.broadcast %714 : vector<1x256xf32> to vector<3x256xf32>
    %717 = arith.mulf %715, %716 : vector<3x256xf32>
    %718 = arith.addf %708, %717 : vector<3x256xf32>
    %719 = vector.extract_strided_slice %0 {offsets = [0, 95], sizes = [3, 1], strides = [1, 1]} : vector<3x108xf32> to vector<3x1xf32>
    %720 = vector.extract_strided_slice %712 {offsets = [1, 0], sizes = [1, 256], strides = [1, 1]} : vector<3x256xf32> to vector<1x256xf32>
    %721 = vector.broadcast %719 : vector<3x1xf32> to vector<3x256xf32>
    %722 = vector.broadcast %720 : vector<1x256xf32> to vector<3x256xf32>
    %723 = arith.mulf %721, %722 : vector<3x256xf32>
    %724 = arith.addf %718, %723 : vector<3x256xf32>
    %725 = vector.extract_strided_slice %0 {offsets = [0, 104], sizes = [3, 1], strides = [1, 1]} : vector<3x108xf32> to vector<3x1xf32>
    %726 = vector.extract_strided_slice %712 {offsets = [2, 0], sizes = [1, 256], strides = [1, 1]} : vector<3x256xf32> to vector<1x256xf32>
    %727 = vector.broadcast %725 : vector<3x1xf32> to vector<3x256xf32>
    %728 = vector.broadcast %726 : vector<1x256xf32> to vector<3x256xf32>
    %729 = arith.mulf %727, %728 : vector<3x256xf32>
    %730 = arith.addf %724, %729 : vector<3x256xf32>
    %c241_i32_32 = arith.constant 241 : i32
    %731 = tpu.dynamic_rotate %598 by %c241_i32_32 dim 1 : vector<3x256xf32>, i32 -> vector<3x256xf32>
    %732 = vector.extract_strided_slice %2 {offsets = [6, 0], sizes = [1, 256], strides = [1, 1]} : vector<9x256xf32> to vector<1x256xf32>
    %733 = vector.broadcast %732 : vector<1x256xf32> to vector<3x256xf32>
    %734 = arith.mulf %731, %733 : vector<3x256xf32>
    %735 = vector.extract_strided_slice %0 {offsets = [0, 87], sizes = [3, 1], strides = [1, 1]} : vector<3x108xf32> to vector<3x1xf32>
    %736 = vector.extract_strided_slice %734 {offsets = [0, 0], sizes = [1, 256], strides = [1, 1]} : vector<3x256xf32> to vector<1x256xf32>
    %737 = vector.broadcast %735 : vector<3x1xf32> to vector<3x256xf32>
    %738 = vector.broadcast %736 : vector<1x256xf32> to vector<3x256xf32>
    %739 = arith.mulf %737, %738 : vector<3x256xf32>
    %740 = arith.addf %730, %739 : vector<3x256xf32>
    %741 = vector.extract_strided_slice %0 {offsets = [0, 96], sizes = [3, 1], strides = [1, 1]} : vector<3x108xf32> to vector<3x1xf32>
    %742 = vector.extract_strided_slice %734 {offsets = [1, 0], sizes = [1, 256], strides = [1, 1]} : vector<3x256xf32> to vector<1x256xf32>
    %743 = vector.broadcast %741 : vector<3x1xf32> to vector<3x256xf32>
    %744 = vector.broadcast %742 : vector<1x256xf32> to vector<3x256xf32>
    %745 = arith.mulf %743, %744 : vector<3x256xf32>
    %746 = arith.addf %740, %745 : vector<3x256xf32>
    %747 = vector.extract_strided_slice %0 {offsets = [0, 105], sizes = [3, 1], strides = [1, 1]} : vector<3x108xf32> to vector<3x1xf32>
    %748 = vector.extract_strided_slice %734 {offsets = [2, 0], sizes = [1, 256], strides = [1, 1]} : vector<3x256xf32> to vector<1x256xf32>
    %749 = vector.broadcast %747 : vector<3x1xf32> to vector<3x256xf32>
    %750 = vector.broadcast %748 : vector<1x256xf32> to vector<3x256xf32>
    %751 = arith.mulf %749, %750 : vector<3x256xf32>
    %752 = arith.addf %746, %751 : vector<3x256xf32>
    %c240_i32_33 = arith.constant 240 : i32
    %753 = tpu.dynamic_rotate %598 by %c240_i32_33 dim 1 : vector<3x256xf32>, i32 -> vector<3x256xf32>
    %754 = vector.extract_strided_slice %2 {offsets = [7, 0], sizes = [1, 256], strides = [1, 1]} : vector<9x256xf32> to vector<1x256xf32>
    %755 = vector.broadcast %754 : vector<1x256xf32> to vector<3x256xf32>
    %756 = arith.mulf %753, %755 : vector<3x256xf32>
    %757 = vector.extract_strided_slice %0 {offsets = [0, 88], sizes = [3, 1], strides = [1, 1]} : vector<3x108xf32> to vector<3x1xf32>
    %758 = vector.extract_strided_slice %756 {offsets = [0, 0], sizes = [1, 256], strides = [1, 1]} : vector<3x256xf32> to vector<1x256xf32>
    %759 = vector.broadcast %757 : vector<3x1xf32> to vector<3x256xf32>
    %760 = vector.broadcast %758 : vector<1x256xf32> to vector<3x256xf32>
    %761 = arith.mulf %759, %760 : vector<3x256xf32>
    %762 = arith.addf %752, %761 : vector<3x256xf32>
    %763 = vector.extract_strided_slice %0 {offsets = [0, 97], sizes = [3, 1], strides = [1, 1]} : vector<3x108xf32> to vector<3x1xf32>
    %764 = vector.extract_strided_slice %756 {offsets = [1, 0], sizes = [1, 256], strides = [1, 1]} : vector<3x256xf32> to vector<1x256xf32>
    %765 = vector.broadcast %763 : vector<3x1xf32> to vector<3x256xf32>
    %766 = vector.broadcast %764 : vector<1x256xf32> to vector<3x256xf32>
    %767 = arith.mulf %765, %766 : vector<3x256xf32>
    %768 = arith.addf %762, %767 : vector<3x256xf32>
    %769 = vector.extract_strided_slice %0 {offsets = [0, 106], sizes = [3, 1], strides = [1, 1]} : vector<3x108xf32> to vector<3x1xf32>
    %770 = vector.extract_strided_slice %756 {offsets = [2, 0], sizes = [1, 256], strides = [1, 1]} : vector<3x256xf32> to vector<1x256xf32>
    %771 = vector.broadcast %769 : vector<3x1xf32> to vector<3x256xf32>
    %772 = vector.broadcast %770 : vector<1x256xf32> to vector<3x256xf32>
    %773 = arith.mulf %771, %772 : vector<3x256xf32>
    %774 = arith.addf %768, %773 : vector<3x256xf32>
    %c239_i32_34 = arith.constant 239 : i32
    %775 = tpu.dynamic_rotate %598 by %c239_i32_34 dim 1 : vector<3x256xf32>, i32 -> vector<3x256xf32>
    %776 = vector.extract_strided_slice %2 {offsets = [8, 0], sizes = [1, 256], strides = [1, 1]} : vector<9x256xf32> to vector<1x256xf32>
    %777 = vector.broadcast %776 : vector<1x256xf32> to vector<3x256xf32>
    %778 = arith.mulf %775, %777 : vector<3x256xf32>
    %779 = vector.extract_strided_slice %0 {offsets = [0, 89], sizes = [3, 1], strides = [1, 1]} : vector<3x108xf32> to vector<3x1xf32>
    %780 = vector.extract_strided_slice %778 {offsets = [0, 0], sizes = [1, 256], strides = [1, 1]} : vector<3x256xf32> to vector<1x256xf32>
    %781 = vector.broadcast %779 : vector<3x1xf32> to vector<3x256xf32>
    %782 = vector.broadcast %780 : vector<1x256xf32> to vector<3x256xf32>
    %783 = arith.mulf %781, %782 : vector<3x256xf32>
    %784 = arith.addf %774, %783 : vector<3x256xf32>
    %785 = vector.extract_strided_slice %0 {offsets = [0, 98], sizes = [3, 1], strides = [1, 1]} : vector<3x108xf32> to vector<3x1xf32>
    %786 = vector.extract_strided_slice %778 {offsets = [1, 0], sizes = [1, 256], strides = [1, 1]} : vector<3x256xf32> to vector<1x256xf32>
    %787 = vector.broadcast %785 : vector<3x1xf32> to vector<3x256xf32>
    %788 = vector.broadcast %786 : vector<1x256xf32> to vector<3x256xf32>
    %789 = arith.mulf %787, %788 : vector<3x256xf32>
    %790 = arith.addf %784, %789 : vector<3x256xf32>
    %791 = vector.extract_strided_slice %0 {offsets = [0, 107], sizes = [3, 1], strides = [1, 1]} : vector<3x108xf32> to vector<3x1xf32>
    %792 = vector.extract_strided_slice %778 {offsets = [2, 0], sizes = [1, 256], strides = [1, 1]} : vector<3x256xf32> to vector<1x256xf32>
    %793 = vector.broadcast %791 : vector<3x1xf32> to vector<3x256xf32>
    %794 = vector.broadcast %792 : vector<1x256xf32> to vector<3x256xf32>
    %795 = arith.mulf %793, %794 : vector<3x256xf32>
    %796 = arith.addf %790, %795 : vector<3x256xf32>
    %c0_35 = arith.constant 0 : index
    %c0_36 = arith.constant 0 : index
    %c0_37 = arith.constant 0 : index
    %797 = vector.load %arg5[%c0_35, %c0_36, %c0_37] : memref<1x3x256xf32, #tpu.memory_space<vmem>>, vector<1x3x256xf32>
    %798 = vector.shape_cast %797 : vector<1x3x256xf32> to vector<3x256xf32>
    %799 = vector.shape_cast %796 : vector<3x256xf32> to vector<1x3x256xf32>
    tpu.vector_store %arg5[%c0_35, %c0_36, %c0_37], %799 {strides = array<i32>} : memref<1x3x256xf32, #tpu.memory_space<vmem>>, vector<1x3x256xf32>,
    return
  }
  func.func @transform_0(%arg0: i32) -> (i32, i32, i32) {
    %c0_i32 = arith.constant 0 : i32
    %c0_i32_0 = arith.constant 0 : i32
    %c0_i32_1 = arith.constant 0 : i32
    return %arg0, %c0_i32, %c0_i32_0 : i32, i32, i32
  }
  func.func @transform_1(%arg0: i32) -> (i32, i32) {
    %c0_i32 = arith.constant 0 : i32
    %c0_i32_0 = arith.constant 0 : i32
    %c0_i32_1 = arith.constant 0 : i32
    return %c0_i32, %c0_i32_0 : i32, i32
  }
  func.func @transform_2(%arg0: i32) -> (i32, i32) {
    %c0_i32 = arith.constant 0 : i32
    %c0_i32_0 = arith.constant 0 : i32
    %c0_i32_1 = arith.constant 0 : i32
    return %c0_i32, %c0_i32_0 : i32, i32
  }
  func.func @transform_3(%arg0: i32) -> (i32, i32) {
    %c0_i32 = arith.constant 0 : i32
    %c0_i32_0 = arith.constant 0 : i32
    %c0_i32_1 = arith.constant 0 : i32
    return %c0_i32, %c0_i32_0 : i32, i32
  }
  func.func @transform_4(%arg0: i32) -> (i32, i32, i32) {
    %c0_i32 = arith.constant 0 : i32
    %c0_i32_0 = arith.constant 0 : i32
    %c0_i32_1 = arith.constant 0 : i32
    return %arg0, %c0_i32, %c0_i32_0 : i32, i32, i32
  }
}

</mosaic_0001>

<bundles_post_ra>
// kernel: my_model_forward.1
= control target key start
LH: loop header
LB: loop body
LE: loop exit
PB: predicated region body
PF: predicated region fallthrough
CT: control target
= control target key end

     0   :  { %s2785_s15 = smov 0   ;;  %s3885_s0 = inlined_call_operand.vmem [shape: f32[2,3,256], index: 0, kind: input, shape index: {}]   ;;  %s3886_s1 = inlined_call_operand.vmem [shape: f32[3,108], index: 1, kind: input, shape index: {}]   ;;  %s3887_s2 = inlined_call_operand.vmem [shape: f32[3,4], index: 2, kind: input, shape index: {}]   ;;  %s3888_s3 = inlined_call_operand.vmem [shape: f32[9,256], index: 3, kind: input, shape index: {}]   ;;  %s3889_s4 = inlined_call_operand.vmem [shape: f32[2,3,256], index: 4, kind: output, shape index: {}]  }
   0x1 LB: > { %s2378_s16 = sadd.s32 4294967295, %s2642_s15   ;;  %p2382_p0 = scmp.ge.s32.totalorder %s2642_s15, 1  ;;  %s2642_s15 = sphi %s2785_s15, %s14_s15  }
   0x2   : > { %p162_p1 = scmp.lt.s32.totalorder %s2642_s15, 3 }
   0x4   : > { %p163_p2 = pnand %p2382_p0, %p162_p1 }
   0x5   : > { %v2796_v0 = vld [vmem:[%s3886_s1] sm:$0x7] (!%p163_p2)  ;;  %v2644_v2 = vmov (!%p163_p2), 0   ;;  %p188_p3 = scmp.lt.s32.totalorder (!%p163_p2), %s2378_s16, 1  ;;  %v2645_v3 = vmov (!%p163_p2), 18   ;;  %v2646_v4 = vmov (!%p163_p2), 9   ;;  %v218_v38 = vlaneseq (!%p163_p2) }
   0x6   : > { %166 = sbr.rel (%p163_p2) target bundleno = 838 (0x346), region = 36  ;;  %v2801_v1 = vld [vmem:[%s3887_s2] sm:$0x7] (!%p163_p2)  ;;  %2518 = vset.pattern.permute.xlu1 (!%p163_p2), %v2644_v2  ;;  %2517 = vset.pattern.permute.xlu0 (!%p163_p2), %v2644_v2  ;;  %s2647_s25 = smov (!%p163_p2), 17   ;;  %v2648_v7 = vmov (!%p163_p2), 1   ;;  %v2650_v8 = vmov (!%p163_p2), 10  }
   0x7   : > { %235 = vperm.xlu1 (!%p163_p2), %2518, %v2796_v0   ;;  %207 = vperm.xlu0 (!%p163_p2), %2517, %v2801_v1   ;;  %s2649_s26 = smov (!%p163_p2), 16   ;;  %v2651_v9 = vmov (!%p163_p2), 19   ;;  %s2652_s27 = smov (!%p163_p2), 15   ;;  %v2653_v10 = vmov (!%p163_p2), 11   ;;  %v2654_v11 = vmov (!%p163_p2), 2   ;;  %v2656_v12 = vmov (!%p163_p2), 12  }
   0x8   : > { %s2655_s28 = smov (!%p163_p2), 1   ;;  %v2657_v13 = vmov (!%p163_p2), 20   ;;  %v2658_v14 = vmov (!%p163_p2), 13   ;;  %v2659_v15 = vmov (!%p163_p2), 3   ;;  %s2660_s29 = smov (!%p163_p2), 127   ;;  %v2661_v16 = vmov (!%p163_p2), 14  }
   0x9   : > { %v2662_v17 = vmov (!%p163_p2), 21   ;;  %s2663_s30 = smov (!%p163_p2), 113   ;;  %v2664_v18 = vmov (!%p163_p2), 4   ;;  %v2665_v19 = vmov (!%p163_p2), 15   ;;  %v2666_v20 = vmov (!%p163_p2), 22   ;;  %s2667_s5 = smov (!%p163_p2), 112  }
   0xa   : > { %v2668_v21 = vmov (!%p163_p2), 16   ;;  %v2669_v22 = vmov (!%p163_p2), 5   ;;  %s2670_s6 = smov (!%p163_p2), 111   ;;  %v2671_v23 = vmov (!%p163_p2), 17   ;;  %v2672_v24 = vmov (!%p163_p2), 23   ;;  %v2901_v48 = vld [vmem:[%s3888_s3] sm:$0xff] (!%p163_p2) }
   0xb   : > { %2520 = vset.pattern.permute.xlu1 (!%p163_p2), %v2645_v3  ;;  %2519 = vset.pattern.permute.xlu0 (!%p163_p2), %v2646_v4  ;;  %v2673_v25 = vmov (!%p163_p2), 27   ;;  %v2674_v26 = vmov (!%p163_p2), 6   ;;  %v2675_v27 = vmov (!%p163_p2), 28   ;;  %v2676_v28 = vmov (!%p163_p2), 24   ;;  %v2906_v49 = vld [vmem:[%s3888_s3 + $0x8] sm:$0xff] (!%p163_p2) }
   0xc   : > { %267 = vperm.xlu1 (!%p163_p2), %2520, %v2796_v0   ;;  %v2677_v29 = vmov (!%p163_p2), 29   ;;  %v2678_v30 = vmov (!%p163_p2), 7   ;;  %v2679_v31 = vmov (!%p163_p2), 30   ;;  %v2680_v32 = vmov (!%p163_p2), 31  }
   0xd   : > { %s3891_s16 = smov (!%p188_p3, %s2378_s16), 1  ;;  %v2681_v33 = vmov 25   ;;  %v2682_v34 = vmov 32   ;;  %v2683_v35 = vmov 8   ;;  %v2684_v36 = vmov 26  }
   0xe   : > { %s2391_s21 = sshll.u32 %s3891_s16, 3  ;;  %v2685_v37 = vmov 36   ;;  %v2686_v39 = vmov 33   ;;  %v2687_v40 = vmov 45   ;;  %v2890_v42 = vshrl.u32 %v218_v38, 7 }
   0xf   : > { %s192_s24 = scalar_lea.vmem %s3885_s0, %s2391_s21  ;;  %v2688_v44 = vmov 37   ;;  %v2893_v45 = vand.u32 127, %v218_v38  ;;  %v2689_v51 = vmov 46   ;;  %v2690_v59 = vmov 38  }
  0x10   : > { %v2814_v5 = vld [vmem:[%s192_s24] sm:$0x77]  ;;  %2521 = vset.pattern.permute.xlu1 %v2648_v7  ;;  %v2896_v46 = vsub.s32 0, %v2890_v42  ;;  %v2691_v2 = vmov 47   ;;  %v2928_v4 = vsub.s32 1, %v2890_v42 }
  0x11   : > { %214 = vrot.lane.b32.xlu0 %v2814_v5, %s2647_s25  ;;  %v2820_v6 = vcombine.high %v2814_v5, %v2814_v5  ;;  %vm220_vm0 = vcmp.lt.s32.totalorder %v2893_v45, 17  ;;  %vm286_vm1 = vcmp.lt.s32.totalorder %v2893_v45, 16  ;;  %vm351_vm2 = vcmp.lt.s32.totalorder %v2893_v45, 15 }
  0x12   : > { %v2912_v52 = vrot.slane %v2901_v48, %v2896_v46  ;;  %v2916_v53 = vrot.slane %v2906_v49, %v2896_v46  ;;  %vm416_vm3 = vcmp.lt.s32.totalorder %v2893_v45, 1  ;;  %vm559_vm4 = vcmp.lt.s32.totalorder %v2893_v45, 127 }
  0x13   : > { %216 = vrot.lane.b32.xlu1 %v2820_v6, %s2647_s25  ;;  %vm624_vm5 = vcmp.lt.s32.totalorder %v2893_v45, 113  ;;  %vm689_vm6 = vcmp.lt.s32.totalorder %v2893_v45, 112  ;;  %vm754_vm7 = vcmp.lt.s32.totalorder %v2893_v45, 111 }
  0x15   : > { %251 = vperm.xlu0 %2519, %v2796_v0  }
  0x17   : > { %282 = vrot.lane.b32.xlu1 %v2814_v5, %s2649_s26 }
  0x19   : > { %284 = vrot.lane.b32.xlu0 %v2820_v6, %s2649_s26 }
  0x1a   : > { %2522 = vset.pattern.permute.xlu0 %v2650_v8 }
  0x1b   : > { %300 = vperm.xlu1 %2521, %v2796_v0  }
  0x1d   : > { %316 = vperm.xlu0 %2522, %v2796_v0  }
  0x1f   : > { %2523 = vset.pattern.permute.xlu1 %v2651_v9  ;;  %v2933_v9 = vsub.s32 2, %v2890_v42 }
  0x20   : > { %332 = vperm.xlu1 %2523, %v2796_v0  }
  0x21   : > { %349 = vrot.lane.b32.xlu0 %v2820_v6, %s2652_s27 }
  0x22   : > { %2525 = vset.pattern.permute.xlu0 %v2653_v10 }
  0x24   : > { %347 = vrot.lane.b32.xlu1 %v2814_v5, %s2652_s27 }
  0x25   : > { %381 = vperm.xlu0 %2525, %v2796_v0   ;;  %2524 = vset.pattern.permute.xlu1 %v2654_v11 }
  0x28   : > { %365 = vperm.xlu1 %2524, %v2796_v0  }
  0x29   : > { %414 = vrot.lane.b32.xlu0 %v2820_v6, %s2655_s28 }
  0x2a   : > { %2528 = vset.pattern.permute.xlu0 %v2656_v12 }
  0x2c   : > { %2526 = vset.pattern.permute.xlu1 %v2657_v13  ;;  %v2939_v13 = vrot.slane %v2901_v48, %v2928_v4 }
  0x2d   : > { %446 = vperm.xlu0 %2528, %v2796_v0   ;;  %397 = vperm.xlu1 %2526, %v2796_v0  }
  0x31   : > { %2531 = vset.pattern.permute.xlu0 %v2658_v14  ;;  %412 = vrot.lane.b32.xlu1 %v2814_v5, %s2655_s28  ;;  %v2943_v14 = vrot.slane %v2906_v49, %v2928_v4 }
  0x32   : > { %504 = vperm.xlu0 %2531, %v2796_v0   ;;  %2527 = vset.pattern.permute.xlu1 %v2659_v15 }
  0x35   : > { %430 = vperm.xlu1 %2527, %v2796_v0  }
  0x36   : > { %557 = vrot.lane.b32.xlu0 %v2820_v6, %s2660_s29 }
  0x37   : > { %2534 = vset.pattern.permute.xlu0 %v2661_v16  ;;  %v2692_v16 = vmov 39  }
  0x39   : > { %2529 = vset.pattern.permute.xlu1 %v2662_v17 }
  0x3a   : > { %589 = vperm.xlu0 %2534, %v2796_v0   ;;  %462 = vperm.xlu1 %2529, %v2796_v0  }
  0x3e   : > { %622 = vrot.lane.b32.xlu0 %v2820_v6, %s2663_s30  ;;  %2530 = vset.pattern.permute.xlu1 %v2664_v18 }
  0x3f   : > { %2537 = vset.pattern.permute.xlu0 %v2665_v19  ;;  %478 = vperm.xlu1 %2530, %v2796_v0  }
  0x42   : > { %654 = vperm.xlu0 %2537, %v2796_v0  }
  0x43   : > { %2532 = vset.pattern.permute.xlu1 %v2666_v20 }
  0x44   : > { %530 = vperm.xlu1 %2532, %v2796_v0  }
  0x46   : > { %687 = vrot.lane.b32.xlu0 %v2820_v6, %s2667_s5 }
  0x47   : > { %2540 = vset.pattern.permute.xlu0 %v2668_v21 }
  0x48   : > { %555 = vrot.lane.b32.xlu1 %v2814_v5, %s2660_s29 }
  0x49   : > { %2533 = vset.pattern.permute.xlu1 %v2669_v22 }
  0x4a   : > { %719 = vperm.xlu0 %2540, %v2796_v0  }
  0x4c   : > { %573 = vperm.xlu1 %2533, %v2796_v0  }
  0x4e   : > { %752 = vrot.lane.b32.xlu0 %v2820_v6, %s2670_s6 }
  0x4f   : > { %2543 = vset.pattern.permute.xlu0 %v2671_v23 }
  0x50   : > { %2535 = vset.pattern.permute.xlu1 %v2672_v24 }
  0x51   : > { %605 = vperm.xlu1 %2535, %v2796_v0  }
  0x52   : > { %784 = vperm.xlu0 %2543, %v2796_v0  }
  0x55   : > { %620 = vrot.lane.b32.xlu1 %v2814_v5, %s2663_s30 }
  0x56   : > { %2546 = vset.pattern.permute.xlu0 %v2673_v25  ;;  %2536 = vset.pattern.permute.xlu1 %v2674_v26 }
  0x57   : > { %829 = vperm.xlu0 %2546, %v2796_v0  }
  0x59   : > { %638 = vperm.xlu1 %2536, %v2796_v0  }
  0x5b   : > { %2549 = vset.pattern.permute.xlu0 %v2675_v27 }
  0x5c   : > { %885 = vperm.xlu0 %2549, %v2796_v0  }
  0x5d   : > { %2538 = vset.pattern.permute.xlu1 %v2676_v28 }
  0x5e   : > { %670 = vperm.xlu1 %2538, %v2796_v0  }
  0x60   : > { %2552 = vset.pattern.permute.xlu0 %v2677_v29 }
  0x61   : > { %941 = vperm.xlu0 %2552, %v2796_v0  }
  0x62   : > { %685 = vrot.lane.b32.xlu1 %v2814_v5, %s2667_s5 }
  0x63   : > { %2539 = vset.pattern.permute.xlu1 %v2678_v30  ;;  %v2693_v30 = vmov 48  }
  0x65   : > { %2555 = vset.pattern.permute.xlu0 %v2679_v31 }
  0x66   : > { %997 = vperm.xlu0 %2555, %v2796_v0   ;;  %703 = vperm.xlu1 %2539, %v2796_v0  }
  0x6a   : > { %2558 = vset.pattern.permute.xlu0 %v2680_v32  ;;  %2541 = vset.pattern.permute.xlu1 %v2681_v33 }
  0x6b   : > { %1045 = vperm.xlu0 %2558, %v2796_v0   ;;  %735 = vperm.xlu1 %2541, %v2796_v0  }
  0x6f   : > { %2561 = vset.pattern.permute.xlu0 %v2682_v34  ;;  %750 = vrot.lane.b32.xlu1 %v2814_v5, %s2670_s6 }
  0x70   : > { %1101 = vperm.xlu0 %2561, %v2796_v0   ;;  %2542 = vset.pattern.permute.xlu1 %v2683_v35 }
  0x73   : > { %768 = vperm.xlu1 %2542, %v2796_v0  }
  0x74   : > { %2564 = vset.pattern.permute.xlu0 %v2686_v39  ;;  %v2962_v39 = vrot.slane %v2901_v48, %v2933_v9 }
  0x77   : > { %2544 = vset.pattern.permute.xlu1 %v2684_v36 }
  0x78   : > { %800 = vperm.xlu1 %2544, %v2796_v0  }
  0x7c   : > { %2545 = vset.pattern.permute.xlu1 %v2648_v7 }
  0x7d   : > { %816 = vperm.xlu1 %2545, %v2801_v1  }
  0x81   : > { %2547 = vset.pattern.permute.xlu1 %v2685_v37 }
  0x82   : > { %845 = vperm.xlu1 %2547, %v2796_v0  }
  0x86   : > { %2548 = vset.pattern.permute.xlu1 %v2687_v40  ;;  %v236_v41 = vpop.permute.xlu1 %235  ;;  %v208_v43 = vpop.permute.xlu0 %207  ;;  %v2966_v40 = vrot.slane %v2906_v49, %v2933_v9 }
  0x87   : > { %861 = vperm.xlu1 %2548, %v2796_v0  }
  0x8a   : > { %v215_v50 = vpop.permute.xlu0 %214 }
  0x8b   : > { %2550 = vset.pattern.permute.xlu1 %v2688_v44  ;;  %v268_v47 = vpop.permute.xlu1 %267 }
  0x8c   : > { %901 = vperm.xlu1 %2550, %v2796_v0  }
  0x8f   : > { %v217_v54 = vpop.permute.xlu1 %216 }
  0x90   : > { %2551 = vset.pattern.permute.xlu1 %v2689_v51  ;;  %v221_v55 = vsel %vm220_vm0, %v215_v50, %v217_v54  ;;  %v222_v56 = vsel %vm220_vm0, %v217_v54, %v215_v50  ;;  %v2694_v50 = vmov 40  }
  0x91   : > { %917 = vperm.xlu1 %2551, %v2796_v0   ;;  %v231_v57 = vmul.f32 %v2912_v52, %v222_v56  ;;  %v232_v58 = vmul.f32 %v2916_v53, %v221_v55 }
  0x93   : > { %v283_v61 = vpop.permute.xlu1 %282  ;;  %v241_v62 = vrot.slane %v231_v57, %v2896_v46  ;;  %v245_v63 = vrot.slane %v232_v58, %v2896_v46  ;;  %v257_v10 = vrot.slane %v231_v57, %v2928_v4  ;;  %v261_v12 = vrot.slane %v232_v58, %v2928_v4 }
  0x94   : > { %v252_v60 = vpop.permute.xlu0 %251  ;;  %v273_v22 = vrot.slane %v231_v57, %v2933_v9  ;;  %v277_v23 = vrot.slane %v232_v58, %v2933_v9 }
  0x95   : > { %2553 = vset.pattern.permute.xlu1 %v2690_v59  ;;  %v246_v7 = vmul.f32 %v241_v62, %v236_v41  ;;  %v247_v8 = vmul.f32 %v245_v63, %v236_v41  ;;  %v262_v25 = vmul.f32 %v257_v10, %v252_v60  ;;  %v263_v26 = vmul.f32 %v261_v12, %v252_v60 }
  0x96   : > { %957 = vperm.xlu1 %2553, %v2796_v0   ;;  %v278_v34 = vmul.f32 %v273_v22, %v268_v47  ;;  %v279_v35 = vmul.f32 %v277_v23, %v268_v47  ;;  %v2695_v63 = vmov 49  }
  0x97   : > { %v248_v20 = vadd.f32 %v246_v7, %v208_v43  ;;  %v249_v21 = vadd.f32 %v247_v8, %v208_v43 }
  0x98   : > { %v285_v6 = vpop.permute.xlu0 %284 }
  0x99   : > { %v287_v18 = vsel %vm286_vm1, %v283_v61, %v285_v6  ;;  %v288_v19 = vsel %vm286_vm1, %v285_v6, %v283_v61  ;;  %v264_v31 = vadd.f32 %v262_v25, %v248_v20  ;;  %v265_v32 = vadd.f32 %v263_v26, %v249_v21 }
  0x9a   : > { %2554 = vset.pattern.permute.xlu1 %v2691_v2  ;;  %v301_v3 = vpop.permute.xlu1 %300  ;;  %v297_v27 = vmul.f32 %v2939_v13, %v288_v19  ;;  %v298_v28 = vmul.f32 %v2943_v14, %v287_v18  ;;  %v421_v2 = vsub.s32 3, %v2890_v42 }
  0x9b   : > { %973 = vperm.xlu1 %2554, %v2796_v0   ;;  %v280_v41 = vadd.f32 %v278_v34, %v264_v31  ;;  %v281_v43 = vadd.f32 %v279_v35, %v265_v32 }
  0x9c   : > { %v317_v24 = vpop.permute.xlu0 %316  ;;  %v306_v36 = vrot.slane %v297_v27, %v2896_v46  ;;  %v310_v37 = vrot.slane %v298_v28, %v2896_v46  ;;  %v322_v55 = vrot.slane %v297_v27, %v2928_v4  ;;  %v326_v56 = vrot.slane %v298_v28, %v2928_v4 }
  0x9d   : > { %v338_v19 = vrot.slane %v297_v27, %v2933_v9  ;;  %v342_v20 = vrot.slane %v298_v28, %v2933_v9  ;;  %v2985_v21 = vrot.slane %v2901_v48, %v421_v2  ;;  %v2988_v22 = vrot.slane %v2906_v49, %v421_v2 }
  0x9e   : > { %v311_v51 = vmul.f32 %v306_v36, %v301_v3  ;;  %v312_v54 = vmul.f32 %v310_v37, %v301_v3  ;;  %v327_v6 = vmul.f32 %v322_v55, %v317_v24  ;;  %v328_v7 = vmul.f32 %v326_v56, %v317_v24 }
  0x9f   : > { %2556 = vset.pattern.permute.xlu1 %v2692_v16  ;;  %v2945_v17 = vpop.permute.xlu1 %332  ;;  %v487_v55 = vsub.s32 4, %v2890_v42 }
  0xa0   : > { %1013 = vperm.xlu1 %2556, %v2796_v0   ;;  %v350_v33 = vpop.permute.xlu0 %349  ;;  %v313_v61 = vadd.f32 %v311_v51, %v280_v41  ;;  %v314_v62 = vadd.f32 %v312_v54, %v281_v43  ;;  %v343_v23 = vmul.f32 %v338_v19, %v2945_v17  ;;  %v344_v24 = vmul.f32 %v342_v20, %v2945_v17 }
  0xa1   : > { %v2697_v41 = vmov 50  }
  0xa2   : > { %v329_v16 = vadd.f32 %v327_v6, %v313_v61  ;;  %v330_v18 = vadd.f32 %v328_v7, %v314_v62  ;;  %v2698_v6 = vmov 42   ;;  %v484_v7 = vrot.slane %v2814_v5, %v2896_v46 }
  0xa3   : > { %v348_v29 = vpop.permute.xlu1 %347 }
  0xa4   : > { %2557 = vset.pattern.permute.xlu1 %v2693_v30  ;;  %v352_v44 = vsel %vm351_vm2, %v348_v29, %v350_v33  ;;  %v353_v47 = vsel %vm351_vm2, %v350_v33, %v348_v29  ;;  %v382_v59 = vpop.permute.xlu0 %381  ;;  %v2696_v29 = vmov 41   ;;  %v345_v31 = vadd.f32 %v343_v23, %v329_v16 }
  0xa5   : > { %1029 = vperm.xlu1 %2557, %v2796_v0   ;;  %v362_v57 = vmul.f32 %v2962_v39, %v353_v47  ;;  %v363_v58 = vmul.f32 %v2966_v40, %v352_v44  ;;  %v346_v32 = vadd.f32 %v344_v24, %v330_v18  ;;  %v494_v23 = vrot.slane %v484_v7, %v2896_v46 }
  0xa7   : > { %v366_v38 = vpop.permute.xlu1 %365  ;;  %v371_v3 = vrot.slane %v362_v57, %v2896_v46  ;;  %v375_v8 = vrot.slane %v363_v58, %v2896_v46  ;;  %v387_v33 = vrot.slane %v362_v57, %v2928_v4  ;;  %v391_v34 = vrot.slane %v363_v58, %v2928_v4 }
  0xa8   : > { %v415_v10 = vpop.permute.xlu0 %414  ;;  %v403_v43 = vrot.slane %v362_v57, %v2933_v9 }
  0xa9   : > { %2559 = vset.pattern.permute.xlu1 %v2694_v50  ;;  %v376_v27 = vmul.f32 %v371_v3, %v366_v38  ;;  %v377_v28 = vmul.f32 %v375_v8, %v366_v38  ;;  %v407_v38 = vrot.slane %v363_v58, %v2933_v9  ;;  %v392_v47 = vmul.f32 %v387_v33, %v382_v59 }
  0xaa   : > { %1061 = vperm.xlu1 %2559, %v2796_v0   ;;  %v393_v50 = vmul.f32 %v391_v34, %v382_v59  ;;  %v488_v59 = vrot.slane %v2814_v5, %v487_v55  ;;  %v513_v8 = vsub.s32 5, %v2890_v42 }
  0xab   : > { %v378_v36 = vadd.f32 %v376_v27, %v345_v31  ;;  %v379_v37 = vadd.f32 %v377_v28, %v346_v32 }
  0xac   : > { %v398_v60 = vpop.permute.xlu1 %397  ;;  %v447_v2 = vpop.permute.xlu0 %446  ;;  %v498_v24 = vrot.slane %v488_v59, %v2896_v46  ;;  %v3023_v34 = vrot.slane %v2901_v48, %v513_v8 }
  0xad   : > { %v394_v56 = vadd.f32 %v392_v47, %v378_v36  ;;  %v395_v61 = vadd.f32 %v393_v50, %v379_v37  ;;  %v408_v62 = vmul.f32 %v403_v43, %v398_v60  ;;  %v3026_v36 = vrot.slane %v2906_v49, %v513_v8 }
  0xae   : > { %2560 = vset.pattern.permute.xlu1 %v2695_v63  ;;  %v409_v63 = vmul.f32 %v407_v38, %v398_v60 }
  0xaf   : > { %1077 = vperm.xlu1 %2560, %v2796_v0  }
  0xb0   : > { %v413_v12 = vpop.permute.xlu1 %412 }
  0xb1   : > { %v417_v25 = vsel %vm416_vm3, %v413_v12, %v415_v10  ;;  %v418_v26 = vsel %vm416_vm3, %v415_v10, %v413_v12  ;;  %v410_v10 = vadd.f32 %v408_v62, %v394_v56  ;;  %v411_v12 = vadd.f32 %v409_v63, %v395_v61  ;;  %v505_v60 = vpop.permute.xlu0 %504 }
  0xb2   : > { %v427_v17 = vmul.f32 %v2985_v21, %v418_v26  ;;  %v428_v35 = vmul.f32 %v2988_v22, %v417_v25  ;;  %v510_v25 = vrot.slane %v2814_v5, %v2928_v4  ;;  %v514_v26 = vrot.slane %v2814_v5, %v513_v8 }
  0xb3   : > { %2562 = vset.pattern.permute.xlu1 %v2696_v29  ;;  %v539_v29 = vsub.s32 6, %v2890_v42 }
  0xb4   : > { %v431_v30 = vpop.permute.xlu1 %430  ;;  %1117 = vperm.xlu1 %2562, %v2796_v0   ;;  %v436_v51 = vrot.slane %v427_v17, %v2896_v46  ;;  %v440_v54 = vrot.slane %v428_v35, %v2896_v46  ;;  %v452_v16 = vrot.slane %v427_v17, %v2928_v4  ;;  %v456_v18 = vrot.slane %v428_v35, %v2928_v4 }
  0xb5   : > { %v468_v31 = vrot.slane %v427_v17, %v2933_v9  ;;  %v472_v32 = vrot.slane %v428_v35, %v2933_v9  ;;  %v558_v33 = vpop.permute.xlu0 %557  ;;  %v520_v47 = vrot.slane %v510_v25, %v2928_v4  ;;  %v524_v50 = vrot.slane %v514_v26, %v2928_v4 }
  0xb6   : > { %v441_v57 = vmul.f32 %v436_v51, %v431_v30  ;;  %v442_v58 = vmul.f32 %v440_v54, %v431_v30  ;;  %v457_v28 = vmul.f32 %v452_v16, %v447_v2  ;;  %v458_v30 = vmul.f32 %v456_v18, %v447_v2 }
  0xb7   : > { %v536_v17 = vrot.slane %v2814_v5, %v2933_v9  ;;  %v540_v35 = vrot.slane %v2814_v5, %v539_v29  ;;  %v526_v59 = vmul.f32 %v524_v50, %v505_v60  ;;  %v3045_v26 = vrot.slane %v2901_v48, %v539_v29 }
  0xb8   : > { %2563 = vset.pattern.permute.xlu1 %v2697_v41  ;;  %v443_v19 = vadd.f32 %v441_v57, %v410_v10  ;;  %v444_v20 = vadd.f32 %v442_v58, %v411_v12 }
  0xb9   : > { %v463_v44 = vpop.permute.xlu1 %462  ;;  %1133 = vperm.xlu1 %2563, %v2796_v0   ;;  %v550_v57 = vrot.slane %v540_v35, %v2933_v9  ;;  %v590_v12 = vpop.permute.xlu0 %589 }
  0xba   : > { %v459_v37 = vadd.f32 %v457_v28, %v443_v19  ;;  %v460_v41 = vadd.f32 %v458_v30, %v444_v20  ;;  %v473_v43 = vmul.f32 %v468_v31, %v463_v44  ;;  %v474_v38 = vmul.f32 %v472_v32, %v463_v44 }
  0xbb   : > { %v3048_v28 = vrot.slane %v2906_v49, %v539_v29 }
  0xbc   : > { %v475_v62 = vadd.f32 %v473_v43, %v459_v37  ;;  %v476_v44 = vadd.f32 %v474_v38, %v460_v41 }
  0xbd   : > { %2565 = vset.pattern.permute.xlu1 %v2698_v6  ;;  %v546_v6 = vrot.slane %v536_v17, %v2933_v9 }
  0xbe   : > { %v479_v3 = vpop.permute.xlu1 %478 }
  0xbf   : > { %v499_v54 = vmul.f32 %v494_v23, %v479_v3  ;;  %v500_v55 = vmul.f32 %v498_v24, %v479_v3  ;;  %v525_v3 = vmul.f32 %v520_v47, %v505_v60 }
  0xc1   : > { %v501_v58 = vadd.f32 %v499_v54, %v475_v62  ;;  %v502_v7 = vadd.f32 %v500_v55, %v476_v44 }
  0xc3   : > { %v531_v27 = vpop.permute.xlu1 %530  ;;  %v527_v16 = vadd.f32 %v525_v3, %v501_v58  ;;  %v528_v18 = vadd.f32 %v526_v59, %v502_v7 }
  0xc4   : > { %v551_v19 = vmul.f32 %v546_v6, %v531_v27  ;;  %v552_v20 = vmul.f32 %v550_v57, %v531_v27 }
  0xc6   : > { %v553_v60 = vadd.f32 %v551_v19, %v527_v16  ;;  %v554_v30 = vadd.f32 %v552_v20, %v528_v18 }
  0xc7   : > { %v556_v51 = vpop.permute.xlu1 %555 }
  0xc8   : > { %v560_v56 = vsel %vm559_vm4, %v556_v51, %v558_v33  ;;  %v561_v61 = vsel %vm559_vm4, %v558_v33, %v556_v51  ;;  %v623_v33 = vpop.permute.xlu0 %622 }
  0xc9   : > { %v570_v63 = vmul.f32 %v3023_v34, %v560_v56  ;;  %v571_v2 = vmul.f32 %v3026_v36, %v561_v61 }
  0xcb   : > { %v574_v5 = vpop.permute.xlu1 %573  ;;  %v579_v8 = vrot.slane %v570_v63, %v2896_v46  ;;  %v583_v10 = vrot.slane %v571_v2, %v2896_v46  ;;  %v595_v31 = vrot.slane %v570_v63, %v2928_v4  ;;  %v599_v32 = vrot.slane %v571_v2, %v2928_v4 }
  0xcc   : > { %v611_v50 = vrot.slane %v570_v63, %v2933_v9  ;;  %v615_v17 = vrot.slane %v571_v2, %v2933_v9  ;;  %v655_v57 = vpop.permute.xlu0 %654 }
  0xcd   : > { %v584_v24 = vmul.f32 %v579_v8, %v574_v5  ;;  %v585_v25 = vmul.f32 %v583_v10, %v574_v5  ;;  %v600_v35 = vmul.f32 %v595_v31, %v590_v12  ;;  %v601_v51 = vmul.f32 %v599_v32, %v590_v12 }
  0xce   : > { %v694_v5 = vsub.s32 7, %v2890_v42 }
  0xcf   : > { %v586_v43 = vadd.f32 %v584_v24, %v553_v60  ;;  %v587_v38 = vadd.f32 %v585_v25, %v554_v30 }
  0xd0   : > { %v606_v23 = vpop.permute.xlu1 %605  ;;  %v3067_v10 = vrot.slane %v2901_v48, %v694_v5  ;;  %v3070_v12 = vrot.slane %v2906_v49, %v694_v5  ;;  %v688_v42 = vpop.permute.xlu0 %687 }
  0xd1   : > { %v602_v61 = vadd.f32 %v600_v35, %v586_v43  ;;  %v603_v62 = vadd.f32 %v601_v51, %v587_v38  ;;  %v616_v44 = vmul.f32 %v611_v50, %v606_v23  ;;  %v617_v6 = vmul.f32 %v615_v17, %v606_v23 }
  0xd3   : > { %v618_v63 = vadd.f32 %v616_v44, %v602_v61  ;;  %v619_v59 = vadd.f32 %v617_v6, %v603_v62  ;;  %v3088_v44 = vld [vmem:[%s3888_s3 + $0x10] ss:$0 sm:$0xff]  ;;  %v3093_v6 = vld [vmem:[%s3888_s3 + $0x18] ss:$0 sm:$0xff] }
  0xd4   : > { %v621_v37 = vpop.permute.xlu1 %620  ;;  %v720_v17 = vpop.permute.xlu0 %719 }
  0xd5   : > { %v625_v27 = vsel %vm624_vm5, %v621_v37, %v623_v33  ;;  %v626_v41 = vsel %vm624_vm5, %v623_v33, %v621_v37 }
  0xd6   : > { %v635_v47 = vmul.f32 %v3045_v26, %v625_v27  ;;  %v636_v29 = vmul.f32 %v3048_v28, %v626_v41 }
  0xd8   : > { %v644_v54 = vrot.slane %v635_v47, %v2896_v46  ;;  %v648_v55 = vrot.slane %v636_v29, %v2896_v46  ;;  %v639_v56 = vpop.permute.xlu1 %638  ;;  %v660_v2 = vrot.slane %v635_v47, %v2928_v4  ;;  %v664_v8 = vrot.slane %v636_v29, %v2928_v4 }
  0xd9   : > { %v676_v60 = vrot.slane %v635_v47, %v2933_v9  ;;  %v680_v48 = vrot.slane %v636_v29, %v2933_v9 }
  0xda   : > { %v649_v58 = vmul.f32 %v644_v54, %v639_v56  ;;  %v650_v7 = vmul.f32 %v648_v55, %v639_v56  ;;  %v665_v20 = vmul.f32 %v660_v2, %v655_v57  ;;  %v666_v23 = vmul.f32 %v664_v8, %v655_v57  ;;  %v753_v57 = vpop.permute.xlu0 %752 }
  0xdc   : > { %v651_v16 = vadd.f32 %v649_v58, %v618_v63  ;;  %v652_v18 = vadd.f32 %v650_v7, %v619_v59 }
  0xdd   : > { %v671_v3 = vpop.permute.xlu1 %670 }
  0xde   : > { %v667_v31 = vadd.f32 %v665_v20, %v651_v16  ;;  %v668_v32 = vadd.f32 %v666_v23, %v652_v18  ;;  %v681_v33 = vmul.f32 %v676_v60, %v671_v3  ;;  %v682_v37 = vmul.f32 %v680_v48, %v671_v3 }
  0xe0   : > { %v683_v35 = vadd.f32 %v681_v33, %v667_v31  ;;  %v684_v47 = vadd.f32 %v682_v37, %v668_v32  ;;  %v785_v31 = vpop.permute.xlu0 %784 }
  0xe1   : > { %v686_v19 = vpop.permute.xlu1 %685 }
  0xe2   : > { %v690_v24 = vsel %vm689_vm6, %v686_v19, %v688_v42  ;;  %v691_v25 = vsel %vm689_vm6, %v688_v42, %v686_v19 }
  0xe3   : > { %v700_v30 = vmul.f32 %v3067_v10, %v690_v24  ;;  %v701_v49 = vmul.f32 %v3070_v12, %v691_v25 }
  0xe5   : > { %v709_v27 = vrot.slane %v700_v30, %v2896_v46  ;;  %v713_v41 = vrot.slane %v701_v49, %v2896_v46  ;;  %v704_v43 = vpop.permute.xlu1 %703  ;;  %v725_v29 = vrot.slane %v700_v30, %v2928_v4  ;;  %v729_v51 = vrot.slane %v701_v49, %v2928_v4 }
  0xe6   : > { %v741_v5 = vrot.slane %v700_v30, %v2933_v9  ;;  %v745_v58 = vrot.slane %v701_v49, %v2933_v9 }
  0xe7   : > { %v714_v38 = vmul.f32 %v709_v27, %v704_v43  ;;  %v715_v50 = vmul.f32 %v713_v41, %v704_v43  ;;  %v730_v61 = vmul.f32 %v725_v29, %v720_v17  ;;  %v731_v62 = vmul.f32 %v729_v51, %v720_v17 }
  0xe9   : > { %v716_v55 = vadd.f32 %v714_v38, %v683_v35  ;;  %v717_v56 = vadd.f32 %v715_v50, %v684_v47 }
  0xea   : > { %v736_v54 = vpop.permute.xlu1 %735 }
  0xeb   : > { %v732_v3 = vadd.f32 %v730_v61, %v716_v55  ;;  %v733_v63 = vadd.f32 %v731_v62, %v717_v56  ;;  %v746_v8 = vmul.f32 %v741_v5, %v736_v54  ;;  %v747_v16 = vmul.f32 %v745_v58, %v736_v54 }
  0xec   : > { %v2699_v54 = vmov 51   ;;  %v2700_v55 = vmov 52   ;;  %v2701_v56 = vmov 34   ;;  %v2702_v61 = vmov 43  }
  0xed   : > { %v748_v60 = vadd.f32 %v746_v8, %v732_v3  ;;  %v749_v48 = vadd.f32 %v747_v16, %v733_v63  ;;  %v2704_v5 = vmov 53   ;;  %v2706_v3 = vmov 63  }
  0xee   : > { %v751_v7 = vpop.permute.xlu1 %750  ;;  %v2708_v8 = vmov 65   ;;  %v2709_v16 = vmov 54  }
  0xef   : > { %v755_v59 = vsel %vm754_vm7, %v751_v7, %v753_v57  ;;  %v756_v2 = vsel %vm754_vm7, %v753_v57, %v751_v7  ;;  %v2703_v57 = vmov 35   ;;  %v2705_v7 = vmov 44  }
  0xf0   : > { %v765_v18 = vmul.f32 %v3088_v44, %v755_v59  ;;  %v766_v42 = vmul.f32 %v3093_v6, %v756_v2  ;;  %v2707_v59 = vmov 64  }
  0xf2   : > { %v790_v19 = vrot.slane %v765_v18, %v2928_v4  ;;  %v794_v20 = vrot.slane %v766_v42, %v2928_v4  ;;  %v774_v23 = vrot.slane %v765_v18, %v2896_v46  ;;  %v778_v24 = vrot.slane %v766_v42, %v2896_v46  ;;  %v769_v25 = vpop.permute.xlu1 %768 }
  0xf3   : > { %v806_v32 = vrot.slane %v765_v18, %v2933_v9  ;;  %v810_v33 = vrot.slane %v766_v42, %v2933_v9  ;;  %v2710_v42 = vmov 66  }
  0xf4   : > { %v779_v30 = vmul.f32 %v774_v23, %v769_v25  ;;  %v780_v49 = vmul.f32 %v778_v24, %v769_v25  ;;  %v795_v41 = vmul.f32 %v790_v19, %v785_v31  ;;  %v796_v43 = vmul.f32 %v794_v20, %v785_v31 }
  0xf5   : > { %v2711_v19 = vmov 72   ;;  %v2712_v20 = vmov 67   ;;  %v2714_v23 = vmov 68   ;;  %v2715_v25 = vmov 73  }
  0xf6   : > { %v781_v37 = vadd.f32 %v779_v30, %v748_v60  ;;  %v782_v27 = vadd.f32 %v780_v49, %v749_v48  ;;  %v2716_v60 = vmov 69   ;;  %v2717_v48 = vmov 56   ;;  %v830_v30 = vpop.permute.xlu0 %829 }
  0xf7   : > { %v801_v38 = vpop.permute.xlu1 %800  ;;  %v2718_v31 = vmov 74  }
  0xf8   : > { %v797_v50 = vadd.f32 %v795_v41, %v781_v37  ;;  %v798_v17 = vadd.f32 %v796_v43, %v782_v27  ;;  %v811_v35 = vmul.f32 %v806_v32, %v801_v38  ;;  %v812_v47 = vmul.f32 %v810_v33, %v801_v38 }
  0xf9   : > { %v2719_v37 = vmov 57   ;;  %v2720_v43 = vmov 75  }
  0xfa   : > { %v3109_v29 = vadd.f32 %v811_v35, %v797_v50  ;;  %v3111_v51 = vadd.f32 %v812_v47, %v798_v17  ;;  %v3189_v32 = vpop.permute.xlu0 %885  ;;  %v2721_v17 = vmov 58  }
  0xfc   : > { %822 = vrot.lane.b32.xlu1 %v3111_v51, %s2647_s25  ;;  %820 = vrot.lane.b32.xlu0 %v3109_v29, %s2647_s25  ;;  %v3147_v62 = vpop.permute.xlu1 %816 }
  0xfe   : > { %v3194_v27 = vpop.permute.xlu0 %941 }
 0x100   : > { %878 = vrot.lane.b32.xlu1 %v3111_v51, %s2649_s26  ;;  %876 = vrot.lane.b32.xlu0 %v3109_v29, %s2649_s26 }
 0x101   : > { %v3152_v58 = vpop.permute.xlu1 %845 }
 0x102   : > { %v3199_v38 = vpop.permute.xlu0 %997 }
 0x104   : > { %1173 = vperm.xlu1 %2565, %v2796_v0   ;;  %932 = vrot.lane.b32.xlu0 %v3109_v29, %s2652_s27 }
 0x106   : > { %v3158_v63 = vpop.permute.xlu1 %861  ;;  %v3206_v47 = vpop.permute.xlu0 %1045 }
 0x108   : > { %934 = vrot.lane.b32.xlu1 %v3111_v51, %s2652_s27  ;;  %1157 = vperm.xlu0 %2564, %v2796_v0  }
 0x109   : > { %2566 = vset.pattern.permute.xlu1 %v2699_v54  ;;  %v2722_v54 = vmov 76  }
 0x10b   : > { %v3164_v2 = vpop.permute.xlu1 %901 }
 0x10c   : > { %990 = vrot.lane.b32.xlu1 %v3111_v51, %s2655_s28  ;;  %988 = vrot.lane.b32.xlu0 %v3109_v29, %s2655_s28 }
 0x10d   : > { %2569 = vset.pattern.permute.xlu0 %v2700_v55  ;;  %v3209_v55 = vpop.permute.xlu0 %1101 }
 0x110   : > { %1189 = vperm.xlu1 %2566, %v2796_v0   ;;  %1092 = vrot.lane.b32.xlu0 %v3109_v29, %s2660_s29  ;;  %v3168_v18 = vpop.permute.xlu1 %917 }
 0x114   : > { %1094 = vrot.lane.b32.xlu1 %v3111_v51, %s2660_s29  ;;  %1148 = vrot.lane.b32.xlu0 %v3109_v29, %s2663_s30 }
 0x115   : > { %2567 = vset.pattern.permute.xlu1 %v2701_v56 }
 0x118   : > { %1150 = vrot.lane.b32.xlu1 %v3111_v51, %s2663_s30  ;;  %1204 = vrot.lane.b32.xlu0 %v3109_v29, %s2667_s5 }
 0x11c   : > { %1213 = vperm.xlu1 %2567, %v2796_v0   ;;  %1206 = vrot.lane.b32.xlu0 %v3111_v51, %s2667_s5 }
 0x120   : > { %2568 = vset.pattern.permute.xlu1 %v2702_v61  ;;  %1245 = vperm.xlu0 %2569, %v2796_v0   ;;  %v2723_v61 = vmov 59  }
 0x121   : > { %1229 = vperm.xlu1 %2568, %v2796_v0  }
 0x124   : > { %1262 = vrot.lane.b32.xlu0 %v3111_v51, %s2670_s6 }
 0x125   : > { %2570 = vset.pattern.permute.xlu1 %v2703_v57  ;;  %2572 = vset.pattern.permute.xlu0 %v2704_v5 }
 0x126   : > { %1269 = vperm.xlu1 %2570, %v2796_v0  }
 0x128   : > { %1301 = vperm.xlu0 %2572, %v2796_v0  }
 0x12a   : > { %1260 = vrot.lane.b32.xlu1 %v3109_v29, %s2670_s6 }
 0x12b   : > { %2571 = vset.pattern.permute.xlu1 %v2705_v7  ;;  %v2724_v7 = vmov 77  }
 0x12c   : > { %2575 = vset.pattern.permute.xlu0 %v2706_v3 }
 0x12d   : > { %1346 = vperm.xlu0 %2575, %v2796_v0  }
 0x12e   : > { %1285 = vperm.xlu1 %2571, %v2796_v0  }
 0x131   : > { %2578 = vset.pattern.permute.xlu0 %v2707_v59 }
 0x132   : > { %2573 = vset.pattern.permute.xlu1 %v2654_v11  ;;  %1402 = vperm.xlu0 %2578, %v2796_v0   ;;  %v3177_v11 = vpop.permute.xlu1 %957 }
 0x133   : > { %1317 = vperm.xlu1 %2573, %v2801_v1   ;;  %v3173_v1 = vld [vmem:[%s3886_s1] sm:$0x7] }
 0x136   : > { %2581 = vset.pattern.permute.xlu0 %v2708_v8  ;;  %v3181_v24 = vpop.permute.xlu1 %973 }
 0x137   : > { %2574 = vset.pattern.permute.xlu1 %v2709_v16  ;;  %1458 = vperm.xlu0 %2581, %v2796_v0  }
 0x138   : > { %1330 = vperm.xlu1 %2574, %v2796_v0   ;;  %v2713_v0 = vmov 55  }
 0x13a   : > { %v3185_v49 = vpop.permute.xlu1 %1013 }
 0x13b   : > { %2584 = vset.pattern.permute.xlu0 %v2710_v42 }
 0x13c   : > { %2576 = vset.pattern.permute.xlu1 %v2711_v19  ;;  %1514 = vperm.xlu0 %2584, %v3173_v1  }
 0x13d   : > { %1362 = vperm.xlu1 %2576, %v3173_v1  }
 0x13e   : > { %v3191_v33 = vpop.permute.xlu1 %1029 }
 0x140   : > { %2587 = vset.pattern.permute.xlu0 %v2712_v20  ;;  %v2725_v20 = vmov 60  }
 0x141   : > { %2577 = vset.pattern.permute.xlu1 %v2713_v0  ;;  %1562 = vperm.xlu0 %2587, %v3173_v1  }
 0x142   : > { %1386 = vperm.xlu1 %2577, %v3173_v1   ;;  %v3196_v41 = vpop.permute.xlu1 %1061 }
 0x145   : > { %2590 = vset.pattern.permute.xlu0 %v2714_v23 }
 0x146   : > { %2579 = vset.pattern.permute.xlu1 %v2715_v25  ;;  %1618 = vperm.xlu0 %2590, %v3173_v1   ;;  %v3201_v50 = vpop.permute.xlu1 %1077 }
 0x147   : > { %1418 = vperm.xlu1 %2579, %v3173_v1  }
 0x14a   : > { %2593 = vset.pattern.permute.xlu0 %v2716_v60  ;;  %v3204_v35 = vpop.permute.xlu1 %1117 }
 0x14b   : > { %2580 = vset.pattern.permute.xlu1 %v2717_v48 }
 0x14c   : > { %1442 = vperm.xlu1 %2580, %v3173_v1  }
 0x14e   : > { %v3211_v56 = vpop.permute.xlu1 %1133 }
 0x150   : > { %2582 = vset.pattern.permute.xlu1 %v2718_v31 }
 0x151   : > { %1474 = vperm.xlu1 %2582, %v3173_v1  }
 0x155   : > { %2583 = vset.pattern.permute.xlu1 %v2719_v37 }
 0x156   : > { %1498 = vperm.xlu1 %2583, %v3173_v1  }
 0x15a   : > { %2585 = vset.pattern.permute.xlu1 %v2720_v43 }
 0x15b   : > { %1530 = vperm.xlu1 %2585, %v3173_v1  }
 0x15f   : > { %2586 = vset.pattern.permute.xlu1 %v2721_v17 }
 0x160   : > { %1546 = vperm.xlu1 %2586, %v3173_v1  }
 0x164   : > { %2588 = vset.pattern.permute.xlu1 %v2722_v54 }
 0x165   : > { %1578 = vperm.xlu1 %2588, %v3173_v1  }
 0x169   : > { %2589 = vset.pattern.permute.xlu1 %v2723_v61 }
 0x16a   : > { %1602 = vperm.xlu1 %2589, %v3173_v1  }
 0x16e   : > { %v821_v57 = vpop.permute.xlu0 %820  ;;  %v823_v5 = vpop.permute.xlu1 %822  ;;  %2591 = vset.pattern.permute.xlu1 %v2724_v7 }
 0x16f   : > { %v824_v3 = vsel %vm220_vm0, %v821_v57, %v823_v5  ;;  %v825_v59 = vsel %vm220_vm0, %v823_v5, %v821_v57  ;;  %1634 = vperm.xlu1 %2591, %v3173_v1  }
 0x170   : > { %v826_v8 = vmul.f32 %v825_v59, %v2912_v52  ;;  %v827_v16 = vmul.f32 %v824_v3, %v2916_v53 }
 0x172   : > { %v835_v42 = vrot.slane %v826_v8, %v2896_v46  ;;  %v839_v19 = vrot.slane %v827_v16, %v2896_v46  ;;  %v877_v25 = vpop.permute.xlu0 %876  ;;  %v879_v60 = vpop.permute.xlu1 %878  ;;  %v851_v48 = vrot.slane %v826_v8, %v2928_v4  ;;  %v855_v31 = vrot.slane %v827_v16, %v2928_v4 }
 0x173   : > { %2592 = vset.pattern.permute.xlu1 %v2725_v20  ;;  %v880_v37 = vsel %vm286_vm1, %v877_v25, %v879_v60  ;;  %v881_v43 = vsel %vm286_vm1, %v879_v60, %v877_v25  ;;  %v867_v61 = vrot.slane %v826_v8, %v2933_v9 }
 0x174   : > { %v840_v0 = vmul.f32 %v835_v42, %v830_v30  ;;  %v841_v23 = vmul.f32 %v839_v19, %v830_v30  ;;  %v871_v30 = vrot.slane %v827_v16, %v2933_v9  ;;  %v856_v57 = vmul.f32 %v851_v48, %v3152_v58 }
 0x175   : > { %v857_v5 = vmul.f32 %v855_v31, %v3152_v58  ;;  %v882_v7 = vmul.f32 %v881_v43, %v2939_v13  ;;  %v883_v3 = vmul.f32 %v880_v37, %v2943_v14  ;;  %v872_v19 = vmul.f32 %v867_v61, %v3158_v63 }
 0x176   : > { %v842_v17 = vadd.f32 %v840_v0, %v3147_v62  ;;  %v843_v54 = vadd.f32 %v841_v23, %v3147_v62  ;;  %v873_v20 = vmul.f32 %v871_v30, %v3158_v63  ;;  %v933_v48 = vpop.permute.xlu0 %932 }
 0x177   : > { %v891_v62 = vrot.slane %v882_v7, %v2896_v46  ;;  %v895_v8 = vrot.slane %v883_v3, %v2896_v46  ;;  %v907_v25 = vrot.slane %v882_v7, %v2928_v4  ;;  %v911_v60 = vrot.slane %v883_v3, %v2928_v4 }
 0x178   : > { %v858_v59 = vadd.f32 %v856_v57, %v842_v17  ;;  %v859_v42 = vadd.f32 %v857_v5, %v843_v54  ;;  %v923_v63 = vrot.slane %v882_v7, %v2933_v9  ;;  %v927_v17 = vrot.slane %v883_v3, %v2933_v9 }
 0x179   : > { %v896_v23 = vmul.f32 %v891_v62, %v3189_v32  ;;  %v897_v58 = vmul.f32 %v895_v8, %v3189_v32  ;;  %v912_v54 = vmul.f32 %v907_v25, %v3164_v2  ;;  %v913_v61 = vmul.f32 %v911_v60, %v3164_v2 }
 0x17a   : > { %v874_v0 = vadd.f32 %v872_v19, %v858_v59  ;;  %v875_v16 = vadd.f32 %v873_v20, %v859_v42  ;;  %v928_v3 = vmul.f32 %v923_v63, %v3168_v18  ;;  %v929_v20 = vmul.f32 %v927_v17, %v3168_v18 }
 0x17c   : > { %v898_v37 = vadd.f32 %v896_v23, %v874_v0  ;;  %v899_v43 = vadd.f32 %v897_v58, %v875_v16 }
 0x17e   : > { %v914_v59 = vadd.f32 %v912_v54, %v898_v37  ;;  %v915_v42 = vadd.f32 %v913_v61, %v899_v43 }
 0x180   : > { %v931_v37 = vadd.f32 %v929_v20, %v915_v42 }
 0x183   : > { %v3245_v31 = vpop.permute.xlu1 %1173 }
 0x187   : > { %v3251_v30 = vpop.permute.xlu0 %1157  ;;  %v935_v32 = vpop.permute.xlu1 %934 }
 0x188   : > { %v936_v57 = vsel %vm351_vm2, %v933_v48, %v935_v32  ;;  %v937_v5 = vsel %vm351_vm2, %v935_v32, %v933_v48  ;;  %v930_v48 = vadd.f32 %v928_v3, %v914_v59 }
 0x189   : > { %v938_v19 = vmul.f32 %v937_v5, %v2962_v39  ;;  %v939_v7 = vmul.f32 %v936_v57, %v2966_v40 }
 0x18b   : > { %v947_v2 = vrot.slane %v938_v19, %v2896_v46  ;;  %v951_v62 = vrot.slane %v939_v7, %v2896_v46  ;;  %v963_v8 = vrot.slane %v938_v19, %v2928_v4  ;;  %v967_v0 = vrot.slane %v939_v7, %v2928_v4  ;;  %v989_v16 = vpop.permute.xlu0 %988  ;;  %v991_v23 = vpop.permute.xlu1 %990 }
 0x18c   : > { %v979_v58 = vrot.slane %v938_v19, %v2933_v9  ;;  %v983_v25 = vrot.slane %v939_v7, %v2933_v9  ;;  %v992_v60 = vsel %vm416_vm3, %v989_v16, %v991_v23  ;;  %v993_v18 = vsel %vm416_vm3, %v991_v23, %v989_v16 }
 0x18d   : > { %v952_v43 = vmul.f32 %v947_v2, %v3194_v27  ;;  %v953_v63 = vmul.f32 %v951_v62, %v3194_v27  ;;  %v994_v17 = vmul.f32 %v993_v18, %v2985_v21  ;;  %v995_v54 = vmul.f32 %v992_v60, %v2988_v22 }
 0x18e   : > { %v968_v57 = vmul.f32 %v963_v8, %v3177_v11  ;;  %v969_v5 = vmul.f32 %v967_v0, %v3177_v11  ;;  %v984_v59 = vmul.f32 %v979_v58, %v3181_v24  ;;  %v985_v42 = vmul.f32 %v983_v25, %v3181_v24 }
 0x18f   : > { %v954_v61 = vadd.f32 %v952_v43, %v930_v48  ;;  %v955_v32 = vadd.f32 %v953_v63, %v931_v37  ;;  %v1093_v19 = vpop.permute.xlu0 %1092  ;;  %v3277_v7 = vpop.permute.xlu1 %1189  ;;  %v1003_v3 = vrot.slane %v994_v17, %v2896_v46  ;;  %v1007_v27 = vrot.slane %v995_v54, %v2896_v46 }
 0x190   : > { %v1019_v62 = vrot.slane %v994_v17, %v2928_v4  ;;  %v1023_v16 = vrot.slane %v995_v54, %v2928_v4  ;;  %v1035_v8 = vrot.slane %v994_v17, %v2933_v9  ;;  %v1039_v11 = vrot.slane %v995_v54, %v2933_v9 }
 0x191   : > { %v970_v20 = vadd.f32 %v968_v57, %v954_v61  ;;  %v971_v2 = vadd.f32 %v969_v5, %v955_v32  ;;  %v1008_v58 = vmul.f32 %v1003_v3, %v3199_v38  ;;  %v1009_v24 = vmul.f32 %v1007_v27, %v3199_v38 }
 0x192   : > { %v1051_v18 = vrot.slane %v3109_v29, %v2896_v46  ;;  %v1055_v48 = vrot.slane %v3111_v51, %v2896_v46  ;;  %v1024_v54 = vmul.f32 %v1019_v62, %v3185_v49  ;;  %v1025_v38 = vmul.f32 %v1023_v16, %v3185_v49 }
 0x193   : > { %v986_v0 = vadd.f32 %v984_v59, %v970_v20  ;;  %v987_v23 = vadd.f32 %v985_v42, %v971_v2  ;;  %v1149_v25 = vpop.permute.xlu0 %1148  ;;  %v1095_v60 = vpop.permute.xlu1 %1094  ;;  %v1040_v59 = vmul.f32 %v1035_v8, %v3191_v33  ;;  %v1041_v42 = vmul.f32 %v1039_v11, %v3191_v33 }
 0x194   : > { %v1096_v37 = vsel %vm559_vm4, %v1093_v19, %v1095_v60  ;;  %v1097_v43 = vsel %vm559_vm4, %v1095_v60, %v1093_v19  ;;  %v1067_v19 = vrot.slane %v3109_v29, %v2928_v4  ;;  %v1071_v20 = vrot.slane %v3111_v51, %v2928_v4 }
 0x195   : > { %v1010_v63 = vadd.f32 %v1008_v58, %v986_v0  ;;  %v1011_v17 = vadd.f32 %v1009_v24, %v987_v23  ;;  %v1098_v61 = vmul.f32 %v1096_v37, %v3023_v34  ;;  %v1099_v32 = vmul.f32 %v1097_v43, %v3026_v36 }
 0x196   : > { %v1083_v49 = vrot.slane %v3109_v29, %v2933_v9  ;;  %v1087_v2 = vrot.slane %v3111_v51, %v2933_v9  ;;  %v1056_v62 = vmul.f32 %v1051_v18, %v3206_v47  ;;  %v1057_v16 = vmul.f32 %v1055_v48, %v3206_v47 }
 0x197   : > { %v1026_v57 = vadd.f32 %v1024_v54, %v1010_v63  ;;  %v1027_v5 = vadd.f32 %v1025_v38, %v1011_v17  ;;  %v1205_v3 = vpop.permute.xlu0 %1204  ;;  %v1151_v27 = vpop.permute.xlu1 %1150  ;;  %v1072_v11 = vmul.f32 %v1067_v19, %v3196_v41  ;;  %v1073_v0 = vmul.f32 %v1071_v20, %v3196_v41 }
 0x198   : > { %v1107_v23 = vrot.slane %v1098_v61, %v2896_v46  ;;  %v1111_v58 = vrot.slane %v1099_v32, %v2896_v46  ;;  %v1152_v29 = vsel %vm624_vm5, %v1149_v25, %v1151_v27  ;;  %v1153_v51 = vsel %vm624_vm5, %v1151_v27, %v1149_v25 }
 0x199   : > { %v1042_v8 = vadd.f32 %v1040_v59, %v1026_v57  ;;  %v1043_v33 = vadd.f32 %v1041_v42, %v1027_v5  ;;  %v1088_v47 = vmul.f32 %v1083_v49, %v3201_v50  ;;  %v1089_v48 = vmul.f32 %v1087_v2, %v3201_v50 }
 0x19a   : > { %v1123_v37 = vrot.slane %v1098_v61, %v2928_v4  ;;  %v1127_v41 = vrot.slane %v1099_v32, %v2928_v4  ;;  %v1154_v54 = vmul.f32 %v1152_v29, %v3045_v26  ;;  %v1155_v38 = vmul.f32 %v1153_v51, %v3048_v28 }
 0x19b   : > { %v1058_v24 = vadd.f32 %v1056_v62, %v1042_v8  ;;  %v1059_v60 = vadd.f32 %v1057_v16, %v1043_v33  ;;  %v1214_v18 = vpop.permute.xlu1 %1213  ;;  %v1207_v43 = vpop.permute.xlu0 %1206  ;;  %v1112_v57 = vmul.f32 %v1107_v23, %v3209_v55  ;;  %v1113_v25 = vmul.f32 %v1111_v58, %v3209_v55 }
 0x19c   : > { %v1139_v5 = vrot.slane %v1098_v61, %v2933_v9  ;;  %v1143_v59 = vrot.slane %v1099_v32, %v2933_v9  ;;  %v1208_v27 = vsel %vm689_vm6, %v1205_v3, %v1207_v43  ;;  %v1209_v19 = vsel %vm689_vm6, %v1207_v43, %v1205_v3 }
 0x19d   : > { %v1074_v63 = vadd.f32 %v1072_v11, %v1058_v24  ;;  %v1075_v17 = vadd.f32 %v1073_v0, %v1059_v60  ;;  %v1128_v20 = vmul.f32 %v1123_v37, %v3204_v35  ;;  %v1129_v49 = vmul.f32 %v1127_v41, %v3204_v35 }
 0x19e   : > { %v1163_v55 = vrot.slane %v1154_v54, %v2896_v46  ;;  %v1167_v61 = vrot.slane %v1155_v38, %v2896_v46  ;;  %v1144_v32 = vmul.f32 %v1139_v5, %v3211_v56  ;;  %v1145_v8 = vmul.f32 %v1143_v59, %v3211_v56 }
 0x19f   : > { %v1090_v50 = vadd.f32 %v1088_v47, %v1074_v63  ;;  %v1091_v42 = vadd.f32 %v1089_v48, %v1075_v17  ;;  %v1210_v33 = vmul.f32 %v1208_v27, %v3067_v10  ;;  %v1211_v11 = vmul.f32 %v1209_v19, %v3070_v12  ;;  %v1246_v58 = vpop.permute.xlu0 %1245 }
 0x1a0   : > { %v1230_v2 = vpop.permute.xlu1 %1229  ;;  %v1179_v23 = vrot.slane %v1154_v54, %v2928_v4  ;;  %v1183_v35 = vrot.slane %v1155_v38, %v2928_v4  ;;  %v1195_v24 = vrot.slane %v1154_v54, %v2933_v9  ;;  %v1199_v60 = vrot.slane %v1155_v38, %v2933_v9 }
 0x1a1   : > { %v1114_v62 = vadd.f32 %v1112_v57, %v1090_v50  ;;  %v1115_v16 = vadd.f32 %v1113_v25, %v1091_v42  ;;  %v1168_v47 = vmul.f32 %v1163_v55, %v3251_v30  ;;  %v1169_v56 = vmul.f32 %v1167_v61, %v3251_v30 }
 0x1a2   : > { %v1219_v37 = vrot.slane %v1210_v33, %v2896_v46  ;;  %v1223_v41 = vrot.slane %v1211_v11, %v2896_v46  ;;  %v1184_v43 = vmul.f32 %v1179_v23, %v3245_v31  ;;  %v1185_v63 = vmul.f32 %v1183_v35, %v3245_v31 }
 0x1a3   : > { %v1130_v3 = vadd.f32 %v1128_v20, %v1114_v62  ;;  %v1131_v0 = vadd.f32 %v1129_v49, %v1115_v16  ;;  %v1200_v54 = vmul.f32 %v1195_v24, %v3277_v7  ;;  %v1201_v38 = vmul.f32 %v1199_v60, %v3277_v7  ;;  %v1263_v27 = vpop.permute.xlu0 %1262 }
 0x1a4   : > { %v1235_v25 = vrot.slane %v1210_v33, %v2928_v4  ;;  %v1239_v5 = vrot.slane %v1211_v11, %v2928_v4  ;;  %v1251_v50 = vrot.slane %v1210_v33, %v2933_v9  ;;  %v1255_v42 = vrot.slane %v1211_v11, %v2933_v9 }
 0x1a5   : > { %v1146_v29 = vadd.f32 %v1144_v32, %v1130_v3  ;;  %v1147_v51 = vadd.f32 %v1145_v8, %v1131_v0  ;;  %v1270_v48 = vpop.permute.xlu1 %1269  ;;  %v1224_v20 = vmul.f32 %v1219_v37, %v1214_v18  ;;  %v1225_v31 = vmul.f32 %v1223_v41, %v1214_v18 }
 0x1a6   : > { %v1240_v32 = vmul.f32 %v1235_v25, %v1230_v2  ;;  %v1241_v8 = vmul.f32 %v1239_v5, %v1230_v2  ;;  %v1256_v0 = vmul.f32 %v1251_v50, %v1246_v58  ;;  %v1257_v23 = vmul.f32 %v1255_v42, %v1246_v58 }
 0x1a7   : > { %v1170_v17 = vadd.f32 %v1168_v47, %v1146_v29  ;;  %v1171_v57 = vadd.f32 %v1169_v56, %v1147_v51  ;;  %v1302_v58 = vpop.permute.xlu0 %1301  ;;  %v2728_v50 = vmov 61   ;;  %v2729_v42 = vmov 79  }
 0x1a9   : > { %v1186_v30 = vadd.f32 %v1184_v43, %v1170_v17  ;;  %v1187_v59 = vadd.f32 %v1185_v63, %v1171_v57  ;;  %v1261_v19 = vpop.permute.xlu1 %1260 }
 0x1aa   : > { %v1264_v49 = vsel %vm754_vm7, %v1261_v19, %v1263_v27  ;;  %v1265_v7 = vsel %vm754_vm7, %v1263_v27, %v1261_v19  ;;  %v2730_v27 = vmov 71   ;;  %v2731_v19 = vmov 62  }
 0x1ab   : > { %v1202_v62 = vadd.f32 %v1200_v54, %v1186_v30  ;;  %v1203_v16 = vadd.f32 %v1201_v38, %v1187_v59  ;;  %v1266_v55 = vmul.f32 %v3088_v44, %v1264_v49  ;;  %v1267_v61 = vmul.f32 %v3093_v6, %v1265_v7 }
 0x1ac   : > { %v2727_v59 = vmov 70   ;;  %v2732_v49 = vmov 81   ;;  %v2733_v7 = vmov 80  }
 0x1ad   : > { %v1226_v33 = vadd.f32 %v1224_v20, %v1202_v62  ;;  %v1227_v11 = vadd.f32 %v1225_v31, %v1203_v16  ;;  %v1275_v3 = vrot.slane %v1266_v55, %v2896_v46  ;;  %v1279_v18 = vrot.slane %v1267_v61, %v2896_v46  ;;  %v1286_v51 = vpop.permute.xlu1 %1285 }
 0x1ae   : > { %v1291_v60 = vrot.slane %v1266_v55, %v2928_v4  ;;  %v1295_v29 = vrot.slane %v1267_v61, %v2928_v4  ;;  %v1307_v44 = vrot.slane %v1266_v55, %v2933_v9  ;;  %v1311_v6 = vrot.slane %v1267_v61, %v2933_v9 }
 0x1af   : > { %v1242_v35 = vadd.f32 %v1240_v32, %v1226_v33  ;;  %v1243_v24 = vadd.f32 %v1241_v8, %v1227_v11  ;;  %v1280_v56 = vmul.f32 %v1275_v3, %v1270_v48  ;;  %v1281_v37 = vmul.f32 %v1279_v18, %v1270_v48  ;;  %v2632_v8 = vld [vmem:[%s3887_s2] sm:$0x7] }
 0x1b0   : > { %v1296_v63 = vmul.f32 %v1291_v60, %v1286_v51  ;;  %v1297_v17 = vmul.f32 %v1295_v29, %v1286_v51  ;;  %v1312_v57 = vmul.f32 %v1307_v44, %v1302_v58  ;;  %v1313_v54 = vmul.f32 %v1311_v6, %v1302_v58  ;;  %v1347_v29 = vpop.permute.xlu0 %1346 }
 0x1b1   : > { %v1258_v2 = vadd.f32 %v1256_v0, %v1242_v35  ;;  %v1259_v47 = vadd.f32 %v1257_v23, %v1243_v24  ;;  %v2726_v48 = vmov 78   ;;  %v2734_v62 = vmov 82  }
 0x1b2   : > { %v3407_v20 = vpop.permute.xlu1 %1317  ;;  %v2735_v55 = vmov 83   ;;  %v2736_v32 = vmov 92   ;;  %v2737_v11 = vmov 90   ;;  %v2738_v3 = vmov 93  }
 0x1b3   : > { %v1282_v41 = vadd.f32 %v1280_v56, %v1258_v2  ;;  %v1283_v43 = vadd.f32 %v1281_v37, %v1259_v47  ;;  %v2739_v18 = vmov 99   ;;  %v2740_v0 = vmov 94  }
 0x1b4   : > { %v2741_v23 = vmov 91   ;;  %v2742_v24 = vmov 95   ;;  %v2743_v60 = vmov 100   ;;  %v2744_v6 = vmov 101   ;;  %v3447_v51 = vpop.permute.xlu0 %1402 }
 0x1b5   : > { %v1298_v38 = vadd.f32 %v1296_v63, %v1282_v41  ;;  %v1299_v25 = vadd.f32 %v1297_v17, %v1283_v43  ;;  %v2745_v47 = vmov 84   ;;  %v2746_v41 = vmov 102  }
 0x1b6   : > { %v2747_v17 = vmov 85  }
 0x1b7   : > { %v3371_v5 = vadd.f32 %v1312_v57, %v1298_v38  ;;  %v3373_v30 = vadd.f32 %v1313_v54, %v1299_v25  ;;  %v3413_v31 = vpop.permute.xlu1 %1330  ;;  %v2748_v57 = vmov 103  }
 0x1b8   : > { %v3452_v56 = vpop.permute.xlu0 %1458 }
 0x1b9   : > { %1323 = vrot.lane.b32.xlu0 %v3373_v30, %s2647_s25  ;;  %1321 = vrot.lane.b32.xlu1 %v3371_v5, %s2647_s25 }
 0x1bc   : > { %v3418_v16 = vpop.permute.xlu1 %1362  ;;  %v3457_v43 = vpop.permute.xlu0 %1514 }
 0x1bd   : > { %1379 = vrot.lane.b32.xlu0 %v3373_v30, %s2649_s26  ;;  %1658 = vperm.xlu1 %2592, %v3173_v1  }
 0x1c0   : > { %v3464_v54 = vpop.permute.xlu0 %1562 }
 0x1c1   : > { %1435 = vrot.lane.b32.xlu0 %v3373_v30, %s2652_s27  ;;  %1377 = vrot.lane.b32.xlu1 %v3371_v5, %s2649_s26  ;;  %v3425_v61 = vpop.permute.xlu1 %1386 }
 0x1c2   : > { %2594 = vset.pattern.permute.xlu1 %v2726_v48  ;;  %v2749_v48 = vmov 86  }
 0x1c5   : > { %1491 = vrot.lane.b32.xlu0 %v3373_v30, %s2655_s28  ;;  %1433 = vrot.lane.b32.xlu1 %v3371_v5, %s2652_s27  ;;  %v3467_v38 = vpop.permute.xlu0 %1618 }
 0x1c6   : > { %v3432_v33 = vpop.permute.xlu1 %1418 }
 0x1c9   : > { %1674 = vperm.xlu0 %2593, %v3173_v1   ;;  %1489 = vrot.lane.b32.xlu1 %v3371_v5, %s2655_s28 }
 0x1cd   : > { %1593 = vrot.lane.b32.xlu0 %v3371_v5, %s2660_s29  ;;  %1690 = vperm.xlu1 %2594, %v3173_v1  }
 0x1ce   : > { %2596 = vset.pattern.permute.xlu0 %v2727_v59  ;;  %v2750_v59 = vmov 104  }
 0x1d1   : > { %1730 = vperm.xlu0 %2596, %v3173_v1   ;;  %2595 = vset.pattern.permute.xlu1 %v2728_v50 }
 0x1d2   : > { %1714 = vperm.xlu1 %2595, %v3173_v1  }
 0x1d5   : > { %1649 = vrot.lane.b32.xlu0 %v3371_v5, %s2663_s30 }
 0x1d6   : > { %2597 = vset.pattern.permute.xlu1 %v2729_v42  ;;  %2599 = vset.pattern.permute.xlu0 %v2730_v27 }
 0x1d7   : > { %1746 = vperm.xlu1 %2597, %v3173_v1  }
 0x1d9   : > { %1705 = vrot.lane.b32.xlu0 %v3371_v5, %s2667_s5 }
 0x1db   : > { %1595 = vrot.lane.b32.xlu1 %v3373_v30, %s2660_s29 }
 0x1dc   : > { %2598 = vset.pattern.permute.xlu1 %v2731_v19 }
 0x1dd   : > { %1761 = vrot.lane.b32.xlu0 %v3371_v5, %s2670_s6 }
 0x1df   : > { %1651 = vrot.lane.b32.xlu1 %v3373_v30, %s2663_s30 }
 0x1e1   : > { %1786 = vperm.xlu0 %2599, %v3173_v1  }
 0x1e3   : > { %1770 = vperm.xlu1 %2598, %v3173_v1  }
 0x1e5   : > { %2602 = vset.pattern.permute.xlu0 %v2732_v49 }
 0x1e6   : > { %1831 = vperm.xlu0 %2602, %v3173_v1  }
 0x1e7   : > { %1707 = vrot.lane.b32.xlu1 %v3373_v30, %s2667_s5 }
 0x1e8   : > { %2600 = vset.pattern.permute.xlu1 %v2733_v7 }
 0x1ea   : > { %2605 = vset.pattern.permute.xlu0 %v2734_v62 }
 0x1eb   : > { %1887 = vperm.xlu0 %2605, %v3173_v1   ;;  %1763 = vrot.lane.b32.xlu1 %v3373_v30, %s2670_s6 }
 0x1ef   : > { %2608 = vset.pattern.permute.xlu0 %v2735_v55  ;;  %1802 = vperm.xlu1 %2600, %v3173_v1  }
 0x1f0   : > { %1943 = vperm.xlu0 %2608, %v3173_v1  }
 0x1f3   : > { %2601 = vset.pattern.permute.xlu1 %v2659_v15  ;;  %v3436_v15 = vpop.permute.xlu1 %1442 }
 0x1f4   : > { %2609 = vset.pattern.permute.xlu0 %v2736_v32  ;;  %1818 = vperm.xlu1 %2601, %v2632_v8  }
 0x1f5   : > { %1959 = vperm.xlu0 %2609, %v3173_v1  }
 0x1f7   : > { %v3440_v35 = vpop.permute.xlu1 %1474 }
 0x1f8   : > { %2603 = vset.pattern.permute.xlu1 %v2737_v11 }
 0x1f9   : > { %2612 = vset.pattern.permute.xlu0 %v2738_v3  ;;  %1847 = vperm.xlu1 %2603, %v3173_v1  }
 0x1fa   : > { %2015 = vperm.xlu0 %2612, %v3173_v1  }
 0x1fb   : > { %v3444_v44 = vpop.permute.xlu1 %1498 }
 0x1fd   : > { %2604 = vset.pattern.permute.xlu1 %v2739_v18 }
 0x1fe   : > { %2615 = vset.pattern.permute.xlu0 %v2740_v0  ;;  %1863 = vperm.xlu1 %2604, %v3173_v1  }
 0x1ff   : > { %2063 = vperm.xlu0 %2615, %v3173_v1   ;;  %v3449_v2 = vpop.permute.xlu1 %1530 }
 0x202   : > { %2606 = vset.pattern.permute.xlu1 %v2741_v23 }
 0x203   : > { %1903 = vperm.xlu1 %2606, %v3173_v1   ;;  %2618 = vset.pattern.permute.xlu0 %v2742_v24  ;;  %v3454_v37 = vpop.permute.xlu1 %1546 }
 0x207   : > { %2607 = vset.pattern.permute.xlu1 %v2743_v60  ;;  %v3459_v63 = vpop.permute.xlu1 %1578 }
 0x208   : > { %1919 = vperm.xlu1 %2607, %v3173_v1  }
 0x20b   : > { %v3462_v58 = vpop.permute.xlu1 %1602 }
 0x20c   : > { %2610 = vset.pattern.permute.xlu1 %v2744_v6 }
 0x20d   : > { %1975 = vperm.xlu1 %2610, %v3173_v1  }
 0x20f   : > { %v3469_v25 = vpop.permute.xlu1 %1634 }
 0x211   : > { %2611 = vset.pattern.permute.xlu1 %v2745_v47 }
 0x212   : > { %1999 = vperm.xlu1 %2611, %v3173_v1  }
 0x216   : > { %2613 = vset.pattern.permute.xlu1 %v2746_v41 }
 0x217   : > { %2031 = vperm.xlu1 %2613, %v3173_v1  }
 0x21b   : > { %2614 = vset.pattern.permute.xlu1 %v2747_v17 }
 0x21c   : > { %2047 = vperm.xlu1 %2614, %v3173_v1  }
 0x220   : > { %2616 = vset.pattern.permute.xlu1 %v2748_v57 }
 0x221   : > { %2079 = vperm.xlu1 %2616, %v3173_v1  }
 0x225   : > { %2617 = vset.pattern.permute.xlu1 %v2749_v48 }
 0x226   : > { %2103 = vperm.xlu1 %2617, %v3173_v1  }
 0x22a   : > { %2619 = vset.pattern.permute.xlu1 %v2750_v59 }
 0x22b   : > { %v1324_v50 = vpop.permute.xlu0 %1323  ;;  %v1322_v42 = vpop.permute.xlu1 %1321 }
 0x22c   : > { %v1325_v27 = vsel %vm220_vm0, %v1322_v42, %v1324_v50  ;;  %v1326_v19 = vsel %vm220_vm0, %v1324_v50, %v1322_v42 }
 0x22d   : > { %v1327_v49 = vmul.f32 %v1326_v19, %v2912_v52  ;;  %v1328_v7 = vmul.f32 %v1325_v27, %v2916_v53 }
 0x22f   : > { %v1336_v62 = vrot.slane %v1327_v49, %v2896_v46  ;;  %v1340_v55 = vrot.slane %v1328_v7, %v2896_v46  ;;  %v1352_v8 = vrot.slane %v1327_v49, %v2928_v4  ;;  %v1356_v11 = vrot.slane %v1328_v7, %v2928_v4  ;;  %v1380_v23 = vpop.permute.xlu0 %1379 }
 0x230   : > { %v1368_v6 = vrot.slane %v1327_v49, %v2933_v9  ;;  %v1372_v47 = vrot.slane %v1328_v7, %v2933_v9 }
 0x231   : > { %v1341_v1 = vmul.f32 %v1336_v62, %v3413_v31  ;;  %v1342_v32 = vmul.f32 %v1340_v55, %v3413_v31  ;;  %v1357_v24 = vmul.f32 %v1352_v8, %v1347_v29  ;;  %v1358_v60 = vmul.f32 %v1356_v11, %v1347_v29 }
 0x232   : > { %v1373_v50 = vmul.f32 %v1368_v6, %v3418_v16  ;;  %v1374_v29 = vmul.f32 %v1372_v47, %v3418_v16 }
 0x233   : > { %v1343_v18 = vadd.f32 %v1341_v1, %v3407_v20  ;;  %v1344_v0 = vadd.f32 %v1342_v32, %v3407_v20  ;;  %v1436_v42 = vpop.permute.xlu0 %1435 }
 0x235   : > { %v1359_v17 = vadd.f32 %v1357_v24, %v1343_v18  ;;  %v1360_v31 = vadd.f32 %v1358_v60, %v1344_v0 }
 0x237   : > { %v1375_v55 = vadd.f32 %v1373_v50, %v1359_v17  ;;  %v1376_v1 = vadd.f32 %v1374_v29, %v1360_v31  ;;  %v1492_v31 = vpop.permute.xlu0 %1491 }
 0x23c   : > { %v3484_v3 = vpop.permute.xlu1 %1658 }
 0x240   : > { %v1378_v41 = vpop.permute.xlu1 %1377 }
 0x241   : > { %v1381_v57 = vsel %vm286_vm1, %v1378_v41, %v1380_v23  ;;  %v1382_v48 = vsel %vm286_vm1, %v1380_v23, %v1378_v41 }
 0x242   : > { %v1383_v59 = vmul.f32 %v1382_v48, %v2939_v13  ;;  %v1384_v20 = vmul.f32 %v1381_v57, %v2943_v14 }
 0x244   : > { %v1392_v27 = vrot.slane %v1383_v59, %v2896_v46  ;;  %v1396_v19 = vrot.slane %v1384_v20, %v2896_v46  ;;  %v1408_v49 = vrot.slane %v1383_v59, %v2928_v4  ;;  %v1412_v7 = vrot.slane %v1384_v20, %v2928_v4  ;;  %v1434_v62 = vpop.permute.xlu1 %1433 }
 0x245   : > { %v1437_v32 = vsel %vm351_vm2, %v1434_v62, %v1436_v42  ;;  %v1438_v8 = vsel %vm351_vm2, %v1436_v42, %v1434_v62  ;;  %v1424_v18 = vrot.slane %v1383_v59, %v2933_v9  ;;  %v1428_v0 = vrot.slane %v1384_v20, %v2933_v9 }
 0x246   : > { %v1397_v16 = vmul.f32 %v1392_v27, %v3425_v61  ;;  %v1398_v11 = vmul.f32 %v1396_v19, %v3425_v61  ;;  %v1439_v23 = vmul.f32 %v1438_v8, %v2962_v39  ;;  %v1440_v24 = vmul.f32 %v1437_v32, %v2966_v40 }
 0x247   : > { %v1413_v47 = vmul.f32 %v1408_v49, %v3447_v51  ;;  %v1414_v41 = vmul.f32 %v1412_v7, %v3447_v51  ;;  %v1429_v29 = vmul.f32 %v1424_v18, %v3432_v33  ;;  %v1430_v42 = vmul.f32 %v1428_v0, %v3432_v33 }
 0x248   : > { %v1399_v60 = vadd.f32 %v1397_v16, %v1375_v55  ;;  %v1400_v6 = vadd.f32 %v1398_v11, %v1376_v1  ;;  %v1490_v17 = vpop.permute.xlu1 %1489  ;;  %v1448_v57 = vrot.slane %v1439_v23, %v2896_v46  ;;  %v1452_v61 = vrot.slane %v1440_v24, %v2896_v46  ;;  %v3528_v8 = vpop.permute.xlu0 %1674 }
 0x249   : > { %v1464_v48 = vrot.slane %v1439_v23, %v2928_v4  ;;  %v1468_v59 = vrot.slane %v1440_v24, %v2928_v4  ;;  %v1480_v27 = vrot.slane %v1439_v23, %v2933_v9  ;;  %v1484_v51 = vrot.slane %v1440_v24, %v2933_v9 }
 0x24a   : > { %v1415_v20 = vadd.f32 %v1413_v47, %v1399_v60  ;;  %v1416_v50 = vadd.f32 %v1414_v41, %v1400_v6  ;;  %v1453_v7 = vmul.f32 %v1448_v57, %v3436_v15  ;;  %v1454_v62 = vmul.f32 %v1452_v61, %v3436_v15 }
 0x24b   : > { %v1469_v1 = vmul.f32 %v1464_v48, %v3452_v56  ;;  %v1470_v32 = vmul.f32 %v1468_v59, %v3452_v56  ;;  %v1493_v33 = vsel %vm416_vm3, %v1490_v17, %v1492_v31  ;;  %v1494_v16 = vsel %vm416_vm3, %v1492_v31, %v1490_v17 }
 0x24c   : > { %v1431_v19 = vadd.f32 %v1429_v29, %v1415_v20  ;;  %v1432_v49 = vadd.f32 %v1430_v42, %v1416_v50  ;;  %v3524_v55 = vpop.permute.xlu1 %1690  ;;  %v1495_v0 = vmul.f32 %v1494_v16, %v2985_v21  ;;  %v1496_v15 = vmul.f32 %v1493_v33, %v2988_v22  ;;  %v1594_v50 = vpop.permute.xlu0 %1593 }
 0x24d   : > { %v1485_v23 = vmul.f32 %v1480_v27, %v3440_v35  ;;  %v1486_v24 = vmul.f32 %v1484_v51, %v3440_v35  ;;  %v1568_v33 = vrot.slane %v3371_v5, %v2928_v4 }
 0x24e   : > { %v1455_v11 = vadd.f32 %v1453_v7, %v1431_v19  ;;  %v1456_v18 = vadd.f32 %v1454_v62, %v1432_v49  ;;  %v1504_v6 = vrot.slane %v1495_v0, %v2896_v46  ;;  %v1508_v47 = vrot.slane %v1496_v15, %v2896_v46 }
 0x24f   : > { %v1520_v41 = vrot.slane %v1495_v0, %v2928_v4  ;;  %v1524_v17 = vrot.slane %v1496_v15, %v2928_v4  ;;  %v1536_v31 = vrot.slane %v1495_v0, %v2933_v9  ;;  %v1540_v57 = vrot.slane %v1496_v15, %v2933_v9 }
 0x250   : > { %v1471_v60 = vadd.f32 %v1469_v1, %v1455_v11  ;;  %v1472_v56 = vadd.f32 %v1470_v32, %v1456_v18  ;;  %v1509_v35 = vmul.f32 %v1504_v6, %v3444_v44  ;;  %v1510_v20 = vmul.f32 %v1508_v47, %v3444_v44 }
 0x251   : > { %v3544_v61 = vpop.permute.xlu1 %1714  ;;  %v1525_v27 = vmul.f32 %v1520_v41, %v3457_v43  ;;  %v1526_v51 = vmul.f32 %v1524_v17, %v3457_v43  ;;  %v1552_v19 = vrot.slane %v3371_v5, %v2896_v46  ;;  %v1556_v49 = vrot.slane %v3373_v30, %v2896_v46 }
 0x252   : > { %v1487_v48 = vadd.f32 %v1485_v23, %v1471_v60  ;;  %v1488_v59 = vadd.f32 %v1486_v24, %v1472_v56  ;;  %v1541_v1 = vmul.f32 %v1536_v31, %v3449_v2  ;;  %v1542_v32 = vmul.f32 %v1540_v57, %v3449_v2  ;;  %v3568_v23 = vpop.permute.xlu0 %1730 }
 0x253   : > { %v1572_v43 = vrot.slane %v3373_v30, %v2928_v4  ;;  %v1557_v16 = vmul.f32 %v1552_v19, %v3454_v37  ;;  %v1558_v11 = vmul.f32 %v1556_v49, %v3454_v37  ;;  %v1584_v15 = vrot.slane %v3371_v5, %v2933_v9 }
 0x254   : > { %v1511_v29 = vadd.f32 %v1509_v35, %v1487_v48  ;;  %v1512_v42 = vadd.f32 %v1510_v20, %v1488_v59  ;;  %v1588_v2 = vrot.slane %v3373_v30, %v2933_v9  ;;  %v1573_v24 = vmul.f32 %v1568_v33, %v3464_v54 }
 0x255   : > { %v1574_v60 = vmul.f32 %v1572_v43, %v3464_v54  ;;  %v1589_v41 = vmul.f32 %v1584_v15, %v3459_v63 }
 0x256   : > { %v1527_v7 = vadd.f32 %v1525_v27, %v1511_v29  ;;  %v1528_v62 = vadd.f32 %v1526_v51, %v1512_v42  ;;  %v3556_v44 = vpop.permute.xlu1 %1746  ;;  %v1590_v37 = vmul.f32 %v1588_v2, %v3459_v63  ;;  %v1650_v63 = vpop.permute.xlu0 %1649 }
 0x258   : > { %v1543_v18 = vadd.f32 %v1541_v1, %v1527_v7  ;;  %v1544_v0 = vadd.f32 %v1542_v32, %v1528_v62 }
 0x25a   : > { %v1559_v56 = vadd.f32 %v1557_v16, %v1543_v18  ;;  %v1560_v6 = vadd.f32 %v1558_v11, %v1544_v0  ;;  %v1596_v47 = vpop.permute.xlu1 %1595 }
 0x25b   : > { %v1597_v17 = vsel %vm559_vm4, %v1594_v50, %v1596_v47  ;;  %v1598_v5 = vsel %vm559_vm4, %v1596_v47, %v1594_v50 }
 0x25c   : > { %v1575_v30 = vadd.f32 %v1573_v24, %v1559_v56  ;;  %v1576_v31 = vadd.f32 %v1574_v60, %v1560_v6  ;;  %v1599_v57 = vmul.f32 %v1597_v17, %v3023_v34  ;;  %v1600_v48 = vmul.f32 %v1598_v5, %v3026_v36 }
 0x25e   : > { %v1591_v54 = vadd.f32 %v1589_v41, %v1575_v30  ;;  %v1592_v59 = vadd.f32 %v1590_v37, %v1576_v31  ;;  %v1608_v35 = vrot.slane %v1599_v57, %v2896_v46  ;;  %v1612_v20 = vrot.slane %v1600_v48, %v2896_v46  ;;  %v1652_v29 = vpop.permute.xlu1 %1651  ;;  %v1706_v30 = vpop.permute.xlu0 %1705 }
 0x25f   : > { %v1624_v42 = vrot.slane %v1599_v57, %v2928_v4  ;;  %v1628_v27 = vrot.slane %v1600_v48, %v2928_v4  ;;  %v1640_v50 = vrot.slane %v1599_v57, %v2933_v9  ;;  %v1644_v51 = vrot.slane %v1600_v48, %v2933_v9 }
 0x260   : > { %v1613_v19 = vmul.f32 %v1608_v35, %v3462_v58  ;;  %v1614_v49 = vmul.f32 %v1612_v20, %v3462_v58  ;;  %v1653_v7 = vsel %vm624_vm5, %v1650_v63, %v1652_v29  ;;  %v1654_v62 = vsel %vm624_vm5, %v1652_v29, %v1650_v63 }
 0x261   : > { %v1629_v1 = vmul.f32 %v1624_v42, %v3467_v38  ;;  %v1630_v32 = vmul.f32 %v1628_v27, %v3467_v38  ;;  %v1655_v16 = vmul.f32 %v1653_v7, %v3045_v26  ;;  %v1656_v11 = vmul.f32 %v1654_v62, %v3048_v28 }
 0x262   : > { %v1615_v33 = vadd.f32 %v1613_v19, %v1591_v54  ;;  %v1616_v43 = vadd.f32 %v1614_v49, %v1592_v59  ;;  %v1771_v18 = vpop.permute.xlu1 %1770  ;;  %v1645_v0 = vmul.f32 %v1640_v50, %v3469_v25  ;;  %v1646_v58 = vmul.f32 %v1644_v51, %v3469_v25 }
 0x263   : > { %v1664_v24 = vrot.slane %v1655_v16, %v2896_v46  ;;  %v1668_v60 = vrot.slane %v1656_v11, %v2896_v46  ;;  %v1680_v56 = vrot.slane %v1655_v16, %v2928_v4  ;;  %v1684_v38 = vrot.slane %v1656_v11, %v2928_v4 }
 0x264   : > { %v1631_v15 = vadd.f32 %v1629_v1, %v1615_v33  ;;  %v1632_v2 = vadd.f32 %v1630_v32, %v1616_v43  ;;  %v1696_v6 = vrot.slane %v1655_v16, %v2933_v9  ;;  %v1700_v47 = vrot.slane %v1656_v11, %v2933_v9  ;;  %v1762_v33 = vpop.permute.xlu0 %1761 }
 0x265   : > { %v1669_v17 = vmul.f32 %v1664_v24, %v3484_v3  ;;  %v1670_v25 = vmul.f32 %v1668_v60, %v3484_v3  ;;  %v1685_v31 = vmul.f32 %v1680_v56, %v3528_v8  ;;  %v1686_v57 = vmul.f32 %v1684_v38, %v3528_v8  ;;  %v3633_v24 = vld [vmem:[%s3888_s3 + $0x10] ss:$0 sm:$0xff] }
 0x266   : > { %v1647_v41 = vadd.f32 %v1645_v0, %v1631_v15  ;;  %v1648_v37 = vadd.f32 %v1646_v58, %v1632_v2  ;;  %v1708_v5 = vpop.permute.xlu1 %1707  ;;  %v1701_v42 = vmul.f32 %v1696_v6, %v3524_v55  ;;  %v1702_v27 = vmul.f32 %v1700_v47, %v3524_v55 }
 0x267   : > { %v1709_v59 = vsel %vm689_vm6, %v1706_v30, %v1708_v5  ;;  %v1710_v35 = vsel %vm689_vm6, %v1708_v5, %v1706_v30 }
 0x268   : > { %v1671_v48 = vadd.f32 %v1669_v17, %v1647_v41  ;;  %v1672_v54 = vadd.f32 %v1670_v25, %v1648_v37  ;;  %v1711_v20 = vmul.f32 %v1709_v59, %v3067_v10  ;;  %v1712_v29 = vmul.f32 %v1710_v35, %v3070_v12  ;;  %v1787_v59 = vpop.permute.xlu0 %1786 }
 0x26a   : > { %v1687_v63 = vadd.f32 %v1685_v31, %v1671_v48  ;;  %v1688_v3 = vadd.f32 %v1686_v57, %v1672_v54  ;;  %v1720_v8 = vrot.slane %v1711_v20, %v2896_v46  ;;  %v1724_v50 = vrot.slane %v1712_v29, %v2896_v46  ;;  %v1764_v49 = vpop.permute.xlu1 %1763 }
 0x26b   : > { %v1736_v51 = vrot.slane %v1711_v20, %v2928_v4  ;;  %v1740_v19 = vrot.slane %v1712_v29, %v2928_v4  ;;  %v1752_v1 = vrot.slane %v1711_v20, %v2933_v9  ;;  %v1756_v32 = vrot.slane %v1712_v29, %v2933_v9 }
 0x26c   : > { %v1703_v7 = vadd.f32 %v1701_v42, %v1687_v63  ;;  %v1704_v62 = vadd.f32 %v1702_v27, %v1688_v3  ;;  %v1725_v43 = vmul.f32 %v1720_v8, %v3544_v61  ;;  %v1726_v55 = vmul.f32 %v1724_v50, %v3544_v61  ;;  %v3639_v61 = vld [vmem:[%s3888_s3 + $0x18] ss:$0 sm:$0xff] }
 0x26d   : > { %v1741_v16 = vmul.f32 %v1736_v51, %v3568_v23  ;;  %v1742_v11 = vmul.f32 %v1740_v19, %v3568_v23  ;;  %v1765_v0 = vsel %vm754_vm7, %v1762_v33, %v1764_v49  ;;  %v1766_v58 = vsel %vm754_vm7, %v1764_v49, %v1762_v33 }
 0x26e   : > { %v1727_v15 = vadd.f32 %v1725_v43, %v1703_v7  ;;  %v1728_v2 = vadd.f32 %v1726_v55, %v1704_v62  ;;  %v1767_v60 = vmul.f32 %v3633_v24, %v1765_v0  ;;  %v1768_v23 = vmul.f32 %v3639_v61, %v1766_v58 }
 0x26f   : > { %v1757_v56 = vmul.f32 %v1752_v1, %v3556_v44  ;;  %v1758_v38 = vmul.f32 %v1756_v32, %v3556_v44  ;;  %v1803_v44 = vpop.permute.xlu1 %1802  ;;  %v2751_v19 = vmov 87   ;;  %v2752_v49 = vmov 96  }
 0x270   : > { %v1743_v6 = vadd.f32 %v1741_v16, %v1727_v15  ;;  %v1744_v47 = vadd.f32 %v1742_v11, %v1728_v2  ;;  %v1776_v41 = vrot.slane %v1767_v60, %v2896_v46  ;;  %v1780_v37 = vrot.slane %v1768_v23, %v2896_v46  ;;  %v1832_v2 = vpop.permute.xlu0 %1831 }
 0x271   : > { %v1792_v17 = vrot.slane %v1767_v60, %v2928_v4  ;;  %v1796_v25 = vrot.slane %v1768_v23, %v2928_v4  ;;  %v1808_v5 = vrot.slane %v1767_v60, %v2933_v9  ;;  %v1812_v30 = vrot.slane %v1768_v23, %v2933_v9 }
 0x272   : > { %v1781_v31 = vmul.f32 %v1776_v41, %v1771_v18  ;;  %v1782_v57 = vmul.f32 %v1780_v37, %v1771_v18  ;;  %v1759_v48 = vadd.f32 %v1757_v56, %v1743_v6  ;;  %v1760_v54 = vadd.f32 %v1758_v38, %v1744_v47  ;;  %v2635_v18 = vld [vmem:[%s3886_s1] sm:$0x7] }
 0x273   : > { %v1797_v29 = vmul.f32 %v1792_v17, %v1787_v59  ;;  %v1798_v63 = vmul.f32 %v1796_v25, %v1787_v59  ;;  %v1813_v27 = vmul.f32 %v1808_v5, %v1803_v44  ;;  %v1814_v8 = vmul.f32 %v1812_v30, %v1803_v44  ;;  %v1819_v16 = vpop.permute.xlu1 %1818 }
 0x274   : > { %v1783_v35 = vadd.f32 %v1781_v31, %v1759_v48  ;;  %v1784_v20 = vadd.f32 %v1782_v57, %v1760_v54  ;;  %v2753_v7 = vmov 105   ;;  %v2754_v62 = vmov 97   ;;  %v1888_v23 = vpop.permute.xlu0 %1887 }
 0x275   : > { %v2755_v1 = vmov 98   ;;  %v2756_v32 = vmov 88   ;;  %v2757_v33 = vmov 106   ;;  %v2758_v43 = vmov 89  }
 0x276   : > { %v1799_v3 = vadd.f32 %v1797_v29, %v1783_v35  ;;  %v1800_v42 = vadd.f32 %v1798_v63, %v1784_v20  ;;  %v2759_v55 = vmov 107  }
 0x278   : > { %v3650_v50 = vadd.f32 %v1813_v27, %v1799_v3  ;;  %v3652_v51 = vadd.f32 %v1814_v8, %v1800_v42  ;;  %v1848_v11 = vpop.permute.xlu1 %1847  ;;  %v3695_v38 = vpop.permute.xlu0 %1943 }
 0x27a   : > { %1824 = vrot.lane.b32.xlu1 %v3652_v51, %s2647_s25  ;;  %1822 = vrot.lane.b32.xlu0 %v3650_v50, %s2647_s25 }
 0x27c   : > { %v3699_v47 = vpop.permute.xlu0 %1959 }
 0x27d   : > { %v1864_v0 = vpop.permute.xlu1 %1863 }
 0x27e   : > { %2135 = vperm.xlu1 %2619, %v2635_v18   ;;  %1878 = vrot.lane.b32.xlu0 %v3650_v50, %s2649_s26 }
 0x280   : > { %v3703_v37 = vpop.permute.xlu0 %2015 }
 0x282   : > { %2620 = vset.pattern.permute.xlu1 %v2751_v19  ;;  %2119 = vperm.xlu0 %2618, %v2635_v18   ;;  %v1904_v58 = vpop.permute.xlu1 %1903 }
 0x283   : > { %2159 = vperm.xlu1 %2620, %v2635_v18  }
 0x284   : > { %v3709_v5 = vpop.permute.xlu0 %2063 }
 0x286   : > { %1990 = vrot.lane.b32.xlu0 %v3650_v50, %s2655_s28 }
 0x287   : > { %1880 = vrot.lane.b32.xlu1 %v3652_v51, %s2649_s26  ;;  %2621 = vset.pattern.permute.xlu0 %v2752_v49  ;;  %v3689_v15 = vpop.permute.xlu1 %1919 }
 0x288   : > { %2622 = vset.pattern.permute.xlu1 %v2753_v7 }
 0x28a   : > { %2175 = vperm.xlu0 %2621, %v2635_v18  }
 0x28b   : > { %1934 = vrot.lane.b32.xlu1 %v3650_v50, %s2652_s27 }
 0x28c   : > { %v3691_v60 = vpop.permute.xlu1 %1975 }
 0x28e   : > { %2094 = vrot.lane.b32.xlu0 %v3650_v50, %s2660_s29 }
 0x28f   : > { %1936 = vrot.lane.b32.xlu1 %v3652_v51, %s2652_s27  ;;  %2624 = vset.pattern.permute.xlu0 %v2754_v62  ;;  %s197_s27 = scalar_lea.vmem %s3889_s4, %s2391_s21 }
 0x291   : > { %v3693_v56 = vpop.permute.xlu1 %1999 }
 0x292   : > { %2231 = vperm.xlu0 %2624, %v2635_v18  }
 0x293   : > { %2191 = vperm.xlu1 %2622, %v2635_v18  }
 0x296   : > { %2150 = vrot.lane.b32.xlu0 %v3650_v50, %s2663_s30  ;;  %v3697_v6 = vpop.permute.xlu1 %2031 }
 0x297   : > { %1992 = vrot.lane.b32.xlu1 %v3652_v51, %s2655_s28  ;;  %2627 = vset.pattern.permute.xlu0 %v2755_v1 }
 0x298   : > { %2623 = vset.pattern.permute.xlu1 %v2756_v32 }
 0x29a   : > { %2206 = vrot.lane.b32.xlu0 %v3650_v50, %s2667_s5 }
 0x29b   : > { %2215 = vperm.xlu1 %2623, %v2635_v18   ;;  %v3701_v41 = vpop.permute.xlu1 %2047 }
 0x29e   : > { %2262 = vrot.lane.b32.xlu0 %v3650_v50, %s2670_s6 }
 0x29f   : > { %2625 = vset.pattern.permute.xlu1 %v2757_v33 }
 0x2a0   : > { %2247 = vperm.xlu1 %2625, %v2635_v18   ;;  %v3705_v17 = vpop.permute.xlu1 %2079 }
 0x2a2   : > { %2287 = vperm.xlu0 %2627, %v2635_v18  }
 0x2a4   : > { %2096 = vrot.lane.b32.xlu1 %v3652_v51, %s2660_s29 }
 0x2a5   : > { %2626 = vset.pattern.permute.xlu1 %v2758_v43  ;;  %v3707_v25 = vpop.permute.xlu1 %2103 }
 0x2a6   : > { %2629 = vset.pattern.permute.xlu0 %v2759_v55 }
 0x2a8   : > { %2152 = vrot.lane.b32.xlu1 %v3652_v51, %s2663_s30 }
 0x2ac   : > { %2271 = vperm.xlu1 %2626, %v2635_v18  }
 0x2b0   : > { %2208 = vrot.lane.b32.xlu1 %v3652_v51, %s2667_s5 }
 0x2b1   : > { %2628 = vset.pattern.permute.xlu1 %v2759_v55 }
 0x2b4   : > { %2264 = vrot.lane.b32.xlu1 %v3652_v51, %s2670_s6 }
 0x2b8   : > { %2303 = vperm.xlu1 %2628, %v2635_v18  }
 0x2ec   : > { %v1823_v30 = vpop.permute.xlu0 %1822  ;;  %v1825_v31 = vpop.permute.xlu1 %1824 }
 0x2ed   : > { %v1826_v57 = vsel %vm220_vm0, %v1823_v30, %v1825_v31  ;;  %v1827_v48 = vsel %vm220_vm0, %v1825_v31, %v1823_v30 }
 0x2ee   : > { %v1828_v54 = vmul.f32 %v1827_v48, %v2912_v52  ;;  %v1829_v59 = vmul.f32 %v1826_v57, %v2916_v53 }
 0x2f0   : > { %v1837_v44 = vrot.slane %v1828_v54, %v2896_v46  ;;  %v1841_v35 = vrot.slane %v1829_v59, %v2896_v46  ;;  %v1853_v3 = vrot.slane %v1828_v54, %v2928_v4  ;;  %v1857_v42 = vrot.slane %v1829_v59, %v2928_v4  ;;  %v1879_v7 = vpop.permute.xlu0 %1878 }
 0x2f1   : > { %v1869_v52 = vrot.slane %v1828_v54, %v2933_v9  ;;  %v1873_v53 = vrot.slane %v1829_v59, %v2933_v9 }
 0x2f2   : > { %v1842_v29 = vmul.f32 %v1837_v44, %v1832_v2  ;;  %v1843_v63 = vmul.f32 %v1841_v35, %v1832_v2  ;;  %v1858_v19 = vmul.f32 %v1853_v3, %v1848_v11  ;;  %v1859_v49 = vmul.f32 %v1857_v42, %v1848_v11 }
 0x2f3   : > { %v1874_v2 = vmul.f32 %v1869_v52, %v1864_v0  ;;  %v1875_v30 = vmul.f32 %v1873_v53, %v1864_v0 }
 0x2f4   : > { %v1844_v8 = vadd.f32 %v1842_v29, %v1819_v16  ;;  %v1845_v18 = vadd.f32 %v1843_v63, %v1819_v16 }
 0x2f6   : > { %v1860_v33 = vadd.f32 %v1858_v19, %v1844_v8  ;;  %v1861_v43 = vadd.f32 %v1859_v49, %v1845_v18 }
 0x2f8   : > { %v1876_v44 = vadd.f32 %v1874_v2, %v1860_v33  ;;  %v1877_v35 = vadd.f32 %v1875_v30, %v1861_v43 }
 0x2fd   : > { %v3719_v20 = vpop.permute.xlu1 %2135 }
 0x301   : > { %v3737_v59 = vpop.permute.xlu0 %2119 }
 0x302   : > { %v3723_v27 = vpop.permute.xlu1 %2159 }
 0x306   : > { %v1881_v62 = vpop.permute.xlu1 %1880 }
 0x307   : > { %v1882_v1 = vsel %vm286_vm1, %v1879_v7, %v1881_v62  ;;  %v1883_v32 = vsel %vm286_vm1, %v1881_v62, %v1879_v7  ;;  %v1991_v62 = vpop.permute.xlu0 %1990 }
 0x308   : > { %v1884_v55 = vmul.f32 %v1883_v32, %v2939_v13  ;;  %v1885_v16 = vmul.f32 %v1882_v1, %v2943_v14 }
 0x30a   : > { %v1893_v31 = vrot.slane %v1884_v55, %v2896_v46  ;;  %v1897_v11 = vrot.slane %v1885_v16, %v2896_v46  ;;  %v1909_v57 = vrot.slane %v1884_v55, %v2928_v4  ;;  %v1913_v48 = vrot.slane %v1885_v16, %v2928_v4  ;;  %v1935_v54 = vpop.permute.xlu1 %1934 }
 0x30b   : > { %v1925_v13 = vrot.slane %v1884_v55, %v2933_v9  ;;  %v1929_v14 = vrot.slane %v1885_v16, %v2933_v9 }
 0x30c   : > { %v1898_v29 = vmul.f32 %v1893_v31, %v1888_v23  ;;  %v1899_v63 = vmul.f32 %v1897_v11, %v1888_v23  ;;  %v1914_v42 = vmul.f32 %v1909_v57, %v1904_v58  ;;  %v1915_v8 = vmul.f32 %v1913_v48, %v1904_v58 }
 0x30d   : > { %v1930_v1 = vmul.f32 %v1925_v13, %v3689_v15  ;;  %v1931_v32 = vmul.f32 %v1929_v14, %v3689_v15 }
 0x30e   : > { %v1900_v0 = vadd.f32 %v1898_v29, %v1876_v44  ;;  %v1901_v3 = vadd.f32 %v1899_v63, %v1877_v35  ;;  %v1937_v18 = vpop.permute.xlu1 %1936  ;;  %v3761_v35 = vpop.permute.xlu0 %2175 }
 0x30f   : > { %v1938_v52 = vsel %vm351_vm2, %v1935_v54, %v1937_v18  ;;  %v1939_v53 = vsel %vm351_vm2, %v1937_v18, %v1935_v54 }
 0x310   : > { %v1916_v19 = vadd.f32 %v1914_v42, %v1900_v0  ;;  %v1917_v49 = vadd.f32 %v1915_v8, %v1901_v3  ;;  %v1940_v7 = vmul.f32 %v1939_v53, %v2962_v39  ;;  %v1941_v23 = vmul.f32 %v1938_v52, %v2966_v40 }
 0x312   : > { %v1949_v58 = vrot.slane %v1940_v7, %v2896_v46  ;;  %v1953_v33 = vrot.slane %v1941_v23, %v2896_v46  ;;  %v3751_v43 = vpop.permute.xlu1 %2191  ;;  %v1965_v55 = vrot.slane %v1940_v7, %v2928_v4  ;;  %v1969_v16 = vrot.slane %v1941_v23, %v2928_v4 }
 0x313   : > { %v1932_v2 = vadd.f32 %v1930_v1, %v1916_v19  ;;  %v1933_v30 = vadd.f32 %v1931_v32, %v1917_v49  ;;  %v1981_v31 = vrot.slane %v1940_v7, %v2933_v9  ;;  %v1985_v15 = vrot.slane %v1941_v23, %v2933_v9  ;;  %v2095_v23 = vpop.permute.xlu0 %2094 }
 0x314   : > { %v1954_v39 = vmul.f32 %v1949_v58, %v3695_v38  ;;  %v1955_v40 = vmul.f32 %v1953_v33, %v3695_v38  ;;  %v1970_v48 = vmul.f32 %v1965_v55, %v3699_v47  ;;  %v1971_v54 = vmul.f32 %v1969_v16, %v3699_v47 }
 0x315   : > { %v1986_v3 = vmul.f32 %v1981_v31, %v3691_v60  ;;  %v1987_v42 = vmul.f32 %v1985_v15, %v3691_v60  ;;  %v2053_v33 = vrot.slane %v3650_v50, %v2896_v46  ;;  %v2057_v55 = vrot.slane %v3652_v51, %v2896_v46 }
 0x316   : > { %v1956_v11 = vadd.f32 %v1954_v39, %v1932_v2  ;;  %v1957_v57 = vadd.f32 %v1955_v40, %v1933_v30  ;;  %v1993_v44 = vpop.permute.xlu1 %1992  ;;  %v2069_v40 = vrot.slane %v3650_v50, %v2928_v4 }
 0x317   : > { %v1994_v29 = vsel %vm416_vm3, %v1991_v62, %v1993_v44  ;;  %v1995_v63 = vsel %vm416_vm3, %v1993_v44, %v1991_v62  ;;  %v2058_v31 = vmul.f32 %v2053_v33, %v3701_v41  ;;  %v2059_v15 = vmul.f32 %v2057_v55, %v3701_v41 }
 0x318   : > { %v1972_v38 = vadd.f32 %v1970_v48, %v1956_v11  ;;  %v1973_v13 = vadd.f32 %v1971_v54, %v1957_v57  ;;  %v1996_v14 = vmul.f32 %v1995_v63, %v2985_v21  ;;  %v1997_v0 = vmul.f32 %v1994_v29, %v2988_v22  ;;  %v3803_v29 = vpop.permute.xlu0 %2231 }
 0x319   : > { %v2074_v48 = vmul.f32 %v2069_v40, %v3709_v5  ;;  %v2085_v44 = vrot.slane %v3650_v50, %v2933_v9 }
 0x31a   : > { %v2005_v47 = vrot.slane %v1996_v14, %v2896_v46  ;;  %v2009_v8 = vrot.slane %v1997_v0, %v2896_v46  ;;  %v3773_v18 = vpop.permute.xlu1 %2215  ;;  %v1988_v52 = vadd.f32 %v1986_v3, %v1972_v38  ;;  %v1989_v53 = vadd.f32 %v1987_v42, %v1973_v13 }
 0x31b   : > { %v2021_v19 = vrot.slane %v1996_v14, %v2928_v4  ;;  %v2025_v49 = vrot.slane %v1997_v0, %v2928_v4  ;;  %v2037_v7 = vrot.slane %v1996_v14, %v2933_v9  ;;  %v2041_v60 = vrot.slane %v1997_v0, %v2933_v9 }
 0x31c   : > { %v2010_v21 = vmul.f32 %v2005_v47, %v3693_v56  ;;  %v2011_v22 = vmul.f32 %v2009_v8, %v3693_v56  ;;  %v2090_v50 = vmul.f32 %v2085_v44, %v3705_v17 }
 0x31d   : > { %v2026_v32 = vmul.f32 %v2021_v19, %v3703_v37  ;;  %v2027_v58 = vmul.f32 %v2025_v49, %v3703_v37  ;;  %v2042_v30 = vmul.f32 %v2037_v7, %v3697_v6  ;;  %v2043_v39 = vmul.f32 %v2041_v60, %v3697_v6 }
 0x31e   : > { %v2012_v62 = vadd.f32 %v2010_v21, %v1988_v52  ;;  %v2013_v1 = vadd.f32 %v2011_v22, %v1989_v53  ;;  %v2073_v37 = vrot.slane %v3652_v51, %v2928_v4  ;;  %v2089_v6 = vrot.slane %v3652_v51, %v2933_v9  ;;  %v2151_v22 = vpop.permute.xlu0 %2150 }
 0x31f   : > { %v3787_v16 = vpop.permute.xlu1 %2247 }
 0x320   : > { %v2028_v56 = vadd.f32 %v2026_v32, %v2012_v62  ;;  %v2029_v2 = vadd.f32 %v2027_v58, %v2013_v1  ;;  %v2075_v54 = vmul.f32 %v2073_v37, %v3709_v5  ;;  %v2091_v3 = vmul.f32 %v2089_v6, %v3705_v17 }
 0x322   : > { %v2044_v11 = vadd.f32 %v2042_v30, %v2028_v56  ;;  %v2045_v57 = vadd.f32 %v2043_v39, %v2029_v2 }
 0x323   : > { %v2097_v63 = vpop.permute.xlu1 %2096 }
 0x324   : > { %v2060_v38 = vadd.f32 %v2058_v31, %v2044_v11  ;;  %v2061_v13 = vadd.f32 %v2059_v15, %v2045_v57  ;;  %v2098_v41 = vsel %vm559_vm4, %v2095_v23, %v2097_v63  ;;  %v2099_v14 = vsel %vm559_vm4, %v2097_v63, %v2095_v23 }
 0x325   : > { %v2100_v0 = vmul.f32 %v2098_v41, %v3023_v34  ;;  %v2101_v5 = vmul.f32 %v2099_v14, %v3026_v36 }
 0x326   : > { %v2076_v51 = vadd.f32 %v2074_v48, %v2060_v38  ;;  %v2077_v42 = vadd.f32 %v2075_v54, %v2061_v13  ;;  %v2207_v54 = vpop.permute.xlu0 %2206 }
 0x327   : > { %v2109_v47 = vrot.slane %v2100_v0, %v2896_v46  ;;  %v2113_v8 = vrot.slane %v2101_v5, %v2896_v46  ;;  %v2125_v52 = vrot.slane %v2100_v0, %v2928_v4  ;;  %v2129_v53 = vrot.slane %v2101_v5, %v2928_v4  ;;  %v2153_v19 = vpop.permute.xlu1 %2152 }
 0x328   : > { %v2092_v49 = vadd.f32 %v2090_v50, %v2076_v51  ;;  %v2093_v21 = vadd.f32 %v2091_v3, %v2077_v42  ;;  %v2141_v34 = vrot.slane %v2100_v0, %v2933_v9  ;;  %v2145_v36 = vrot.slane %v2101_v5, %v2933_v9 }
 0x329   : > { %v2114_v17 = vmul.f32 %v2109_v47, %v3707_v25  ;;  %v2115_v7 = vmul.f32 %v2113_v8, %v3707_v25  ;;  %v2130_v60 = vmul.f32 %v2125_v52, %v3737_v59  ;;  %v2131_v23 = vmul.f32 %v2129_v53, %v3737_v59 }
 0x32a   : > { %v2154_v62 = vsel %vm624_vm5, %v2151_v22, %v2153_v19  ;;  %v2155_v1 = vsel %vm624_vm5, %v2153_v19, %v2151_v22  ;;  %v2146_v25 = vmul.f32 %v2141_v34, %v3719_v20  ;;  %v2147_v2 = vmul.f32 %v2145_v36, %v3719_v20  ;;  %v2263_v19 = vpop.permute.xlu0 %2262 }
 0x32b   : > { %v2116_v32 = vadd.f32 %v2114_v17, %v2092_v49  ;;  %v2117_v58 = vadd.f32 %v2115_v7, %v2093_v21  ;;  %v2156_v33 = vmul.f32 %v2154_v62, %v3045_v26  ;;  %v2157_v55 = vmul.f32 %v2155_v1, %v3048_v28  ;;  %v3829_v56 = vpop.permute.xlu1 %2271 }
 0x32d   : > { %v2132_v30 = vadd.f32 %v2130_v60, %v2116_v32  ;;  %v2133_v59 = vadd.f32 %v2131_v23, %v2117_v58  ;;  %v2165_v39 = vrot.slane %v2156_v33, %v2896_v46  ;;  %v2169_v40 = vrot.slane %v2157_v55, %v2896_v46 }
 0x32e   : > { %v2181_v37 = vrot.slane %v2156_v33, %v2928_v4  ;;  %v2185_v31 = vrot.slane %v2157_v55, %v2928_v4  ;;  %v2197_v26 = vrot.slane %v2156_v33, %v2933_v9  ;;  %v2201_v28 = vrot.slane %v2157_v55, %v2933_v9  ;;  %v2288_v33 = vpop.permute.xlu0 %2287 }
 0x32f   : > { %v2148_v15 = vadd.f32 %v2146_v25, %v2132_v30  ;;  %v2149_v11 = vadd.f32 %v2147_v2, %v2133_v59  ;;  %v2170_v57 = vmul.f32 %v2165_v39, %v3723_v27  ;;  %v2171_v20 = vmul.f32 %v2169_v40, %v3723_v27  ;;  %v2209_v48 = vpop.permute.xlu1 %2208 }
 0x330   : > { %v2186_v44 = vmul.f32 %v2181_v37, %v3761_v35  ;;  %v2187_v6 = vmul.f32 %v2185_v31, %v3761_v35  ;;  %v2210_v13 = vsel %vm689_vm6, %v2207_v54, %v2209_v48  ;;  %v2211_v41 = vsel %vm689_vm6, %v2209_v48, %v2207_v54 }
 0x331   : > { %v2172_v63 = vadd.f32 %v2170_v57, %v2148_v15  ;;  %v2173_v38 = vadd.f32 %v2171_v20, %v2149_v11  ;;  %v2212_v14 = vmul.f32 %v2210_v13, %v3067_v10  ;;  %v2213_v0 = vmul.f32 %v2211_v41, %v3070_v12 }
 0x332   : > { %v2202_v50 = vmul.f32 %v2197_v26, %v3751_v43  ;;  %v2203_v3 = vmul.f32 %v2201_v28, %v3751_v43 }
 0x333   : > { %v2188_v5 = vadd.f32 %v2186_v44, %v2172_v63  ;;  %v2189_v27 = vadd.f32 %v2187_v6, %v2173_v38  ;;  %v2221_v35 = vrot.slane %v2212_v14, %v2896_v46  ;;  %v2225_v51 = vrot.slane %v2213_v0, %v2896_v46  ;;  %v2265_v8 = vpop.permute.xlu1 %2264 }
 0x334   : > { %v2237_v42 = vrot.slane %v2212_v14, %v2928_v4  ;;  %v2241_v47 = vrot.slane %v2213_v0, %v2928_v4  ;;  %v2253_v10 = vrot.slane %v2212_v14, %v2933_v9  ;;  %v2257_v12 = vrot.slane %v2213_v0, %v2933_v9 }
 0x335   : > { %v2204_v52 = vadd.f32 %v2202_v50, %v2188_v5  ;;  %v2205_v53 = vadd.f32 %v2203_v3, %v2189_v27  ;;  %v2226_v49 = vmul.f32 %v2221_v35, %v3773_v18  ;;  %v2227_v43 = vmul.f32 %v2225_v51, %v3773_v18 }
 0x336   : > { %v2242_v21 = vmul.f32 %v2237_v42, %v3803_v29  ;;  %v2243_v34 = vmul.f32 %v2241_v47, %v3803_v29  ;;  %v2266_v36 = vsel %vm754_vm7, %v2263_v19, %v2265_v8  ;;  %v2267_v22 = vsel %vm754_vm7, %v2265_v8, %v2263_v19 }
 0x337   : > { %v2268_v17 = vmul.f32 %v3633_v24, %v2266_v36  ;;  %v2269_v7 = vmul.f32 %v3639_v61, %v2267_v22  ;;  %v2228_v60 = vadd.f32 %v2226_v49, %v2204_v52  ;;  %v2229_v23 = vadd.f32 %v2227_v43, %v2205_v53  ;;  %v2304_v59 = vpop.permute.xlu1 %2303 }
 0x338   : > { %v2258_v62 = vmul.f32 %v2253_v10, %v3787_v16  ;;  %v2259_v18 = vmul.f32 %v2257_v12, %v3787_v16 }
 0x339   : > { %v2277_v1 = vrot.slane %v2268_v17, %v2896_v46  ;;  %v2281_v29 = vrot.slane %v2269_v7, %v2896_v46  ;;  %v2244_v32 = vadd.f32 %v2242_v21, %v2228_v60  ;;  %v2245_v58 = vadd.f32 %v2243_v34, %v2229_v23 }
 0x33a   : > { %v2293_v45 = vrot.slane %v2268_v17, %v2928_v4  ;;  %v2297_v55 = vrot.slane %v2269_v7, %v2928_v4  ;;  %v2309_v24 = vrot.slane %v2268_v17, %v2933_v9  ;;  %v2313_v61 = vrot.slane %v2269_v7, %v2933_v9 }
 0x33b   : > { %v2260_v25 = vadd.f32 %v2258_v62, %v2244_v32  ;;  %v2261_v2 = vadd.f32 %v2259_v18, %v2245_v58  ;;  %v2282_v16 = vmul.f32 %v2277_v1, %v3829_v56  ;;  %v2283_v30 = vmul.f32 %v2281_v29, %v3829_v56 }
 0x33c   : > { %v2298_v40 = vmul.f32 %v2293_v45, %v2288_v33  ;;  %v2299_v37 = vmul.f32 %v2297_v55, %v2288_v33  ;;  %v2314_v28 = vmul.f32 %v2309_v24, %v2304_v59  ;;  %v2315_v4 = vmul.f32 %v2313_v61, %v2304_v59 }
 0x33d   : > { %v2284_v46 = vadd.f32 %v2282_v16, %v2260_v25  ;;  %v2285_v39 = vadd.f32 %v2283_v30, %v2261_v2 }
 0x33f   : > { %v2300_v31 = vadd.f32 %v2298_v40, %v2284_v46  ;;  %v2301_v26 = vadd.f32 %v2299_v37, %v2285_v39 }
 0x341   : > { %v2316_v15 = vadd.f32 %v2314_v28, %v2300_v31  ;;  %v2317_v11 = vadd.f32 %v2315_v4, %v2301_v26 }
 0x343   : > { %v2320_v9 = vcombine.low %v2316_v15, %v2317_v11 }
 0x345   : > { %2322 = vst [vmem:[%s197_s27] sm:$0x77] %v2320_v9 }
 0x346 PF: > { %s14_s15 = sadd.s32 1, %s2642_s15  }
 0x347   : > { %p11_p4 = scmp.ge.s32.totalorder %s14_s15, 4  }
 0x349   :  { %13 = sbr.rel (!%p11_p4) target bundleno = 1 (0x1), region = 66 }

</bundles_post_ra>
